<compile_context>
chip_gen: v6e
topology: v6e:2x2x1
jax: 0.10.0
libtpu: 0.0.40
codegen_flags: <defaults>
</compile_context>

<pallas_src>
import functools
import math

import jax
import jax.numpy as jnp
from jax.experimental import pallas as pl
from jax.experimental.pallas import tpu as pltpu


# bf16 operands feed the MXU at full rate on v5e/v6e/v7x and halve weight DMA;
# accumulation is always f32 (preferred_element_type below).
MXU_DTYPE = jnp.bfloat16


def _mxu(a):
    return a.astype(MXU_DTYPE)


# ----------------------------------------------------------------------------
# In-kernel helpers
# ----------------------------------------------------------------------------
def _add_layernorm(x, y, gamma, beta, eps):
    """LayerNorm(x + y) over last dim (f32).  x, y: (M, E)."""
    h = x + y
    mean = jnp.mean(h, axis=-1, keepdims=True)
    var = jnp.mean((h - mean) ** 2, axis=-1, keepdims=True)
    return (h - mean) * jax.lax.rsqrt(var + eps) * gamma + beta


def _mha_proj(q, k, v, wo, *, nhead, causal):
    """Multi-head attention with the output projection folded into the head
    loop: returns sum_h softmax(q_h k_h^T / sqrt(Dh)) v_h @ wo[h].  (S, E) f32.
    """
    S, E = q.shape
    T = k.shape[0]
    Dh = E // nhead
    scale = 1.0 / math.sqrt(Dh)

    q = _mxu(q)
    k = _mxu(k)
    v = _mxu(v)

    if causal:
        row = jax.lax.broadcasted_iota(jnp.int32, (S, T), 0)
        col = jax.lax.broadcasted_iota(jnp.int32, (S, T), 1)
        mask = col > row

    acc = jnp.zeros((S, E), jnp.float32)
    for h in range(nhead):                      # static unroll over heads
        sl = slice(h * Dh, (h + 1) * Dh)
        qh, kh, vh = q[:, sl], k[:, sl], v[:, sl]
        s = jax.lax.dot_general(qh, kh, (((1,), (1,)), ((), ())),
                                preferred_element_type=jnp.float32) * scale
        if causal:
            s = jnp.where(mask, jnp.float32(-1e30), s)   # no extra (S,T) temp
        m = jnp.max(s, axis=-1, keepdims=True)
        p = jnp.exp(s - m)
        denom = jnp.sum(p, axis=-1, keepdims=True)
        p = p * pl.reciprocal(denom, approx=True)        # EUP slot, not VALU
        oh = jnp.dot(p.astype(MXU_DTYPE), vh,
                     preferred_element_type=jnp.float32)             # (S, Dh)
        acc = acc + jnp.dot(_mxu(oh), _mxu(wo[sl, :]),
                            preferred_element_type=jnp.float32)      # (S, E)
    return acc


# ----------------------------------------------------------------------------
# Fused kernels
# ----------------------------------------------------------------------------
def _decoder_layer_kernel(
        x_ref, mem_ref,
        sa_wqkv_ref, sa_bqkv_ref, sa_wo_ref, sa_bo_ref, ln1_g_ref, ln1_b_ref,
        ca_wq_ref, ca_bq_ref, ca_wkv_ref, ca_bkv_ref, ca_wo_ref, ca_bo_ref,
        ln2_g_ref, ln2_b_ref,
        w1_ref, b1_ref, w2_ref, b2_ref, ln3_g_ref, ln3_b_ref,
        o_ref, *, nhead, eps):
    """One full post-norm TransformerDecoderLayer on one batch element.
    x stays resident in VMEM across self-attn, cross-attn and FFN."""
    x = x_ref[...].astype(jnp.float32)                         # (S, E)
    mem = mem_ref[...]                                         # (T, E)
    E = x.shape[-1]

    # ---- self-attention (causal) + residual + LayerNorm -------------------
    qkv = jnp.dot(_mxu(x), _mxu(sa_wqkv_ref[...]),
                  preferred_element_type=jnp.float32) + sa_bqkv_ref[...]
    q, k, v = qkv[:, :E], qkv[:, E:2 * E], qkv[:, 2 * E:]
    proj = _mha_proj(q, k, v, sa_wo_ref[...], nhead=nhead, causal=True)
    proj = proj + sa_bo_ref[...]
    x = _add_layernorm(x, proj, ln1_g_ref[...], ln1_b_ref[...], eps)

    # ---- cross-attention + residual + LayerNorm ----------------------------
    q = jnp.dot(_mxu(x), _mxu(ca_wq_ref[...]),
                preferred_element_type=jnp.float32) + ca_bq_ref[...]
    kv = jnp.dot(_mxu(mem), _mxu(ca_wkv_ref[...]),
                 preferred_element_type=jnp.float32) + ca_bkv_ref[...]
    k, v = kv[:, :E], kv[:, E:]
    proj = _mha_proj(q, k, v, ca_wo_ref[...], nhead=nhead, causal=False)
    proj = proj + ca_bo_ref[...]
    x = _add_layernorm(x, proj, ln2_g_ref[...], ln2_b_ref[...], eps)

    # ---- FFN (ReLU) + residual + LayerNorm ---------------------------------
    h = jnp.dot(_mxu(x), _mxu(w1_ref[...]),
                preferred_element_type=jnp.float32) + b1_ref[...]
    h = jnp.maximum(h, 0.0)                                    # (S, F) in VMEM
    y = jnp.dot(_mxu(h), _mxu(w2_ref[...]),
                preferred_element_type=jnp.float32) + b2_ref[...]
    o_ref[...] = _add_layernorm(x, y, ln3_g_ref[...], ln3_b_ref[...],
                                eps).astype(o_ref.dtype)


def _out_proj_kernel(x_ref, w_ref, b_ref, o_ref):
    o_ref[...] = (jnp.dot(_mxu(x_ref[...]), _mxu(w_ref[...]),
                          preferred_element_type=jnp.float32)
                  + b_ref[...]).astype(o_ref.dtype)


# ----------------------------------------------------------------------------
# pallas_call wrappers
# ----------------------------------------------------------------------------
def decoder_layer_block(x, mem, lp, *, nhead, eps=1e-5):
    """x: (B,S,E) f32, mem: (B,T,E) f32 -> (B,S,E) f32.  One pallas_call per
    layer; grid over batch, 'parallel' so v7x shards it across both cores."""
    B, S, E = x.shape
    T = mem.shape[1]
    F = lp["w1"].shape[1]

    def fixed(shape):
        nd = len(shape)
        return pl.BlockSpec(shape, lambda b, _nd=nd: (0,) * _nd)

    in_specs = [
        pl.BlockSpec((pl.Squeezed(), S, E), lambda b: (b, 0, 0)),   # x
        pl.BlockSpec((pl.Squeezed(), T, E), lambda b: (b, 0, 0)),   # mem
        fixed((E, 3 * E)), fixed((1, 3 * E)), fixed((E, E)), fixed((1, E)),
        fixed((1, E)), fixed((1, E)),
        fixed((E, E)), fixed((1, E)), fixed((E, 2 * E)), fixed((1, 2 * E)),
        fixed((E, E)), fixed((1, E)), fixed((1, E)), fixed((1, E)),
        fixed((E, F)), fixed((1, F)), fixed((F, E)), fixed((1, E)),
        fixed((1, E)), fixed((1, E)),
    ]
    return pl.pallas_call(
        functools.partial(_decoder_layer_kernel, nhead=nhead, eps=eps),
        out_shape=jax.ShapeDtypeStruct((B, S, E), jnp.float32),
        grid=(B,),
        in_specs=in_specs,
        out_specs=pl.BlockSpec((pl.Squeezed(), S, E), lambda b: (b, 0, 0)),
        compiler_params=pltpu.CompilerParams(
            dimension_semantics=("parallel",),
            vmem_limit_bytes=64 * 1024 * 1024),
    )(x, mem,
      lp["sa_wqkv"], lp["sa_bqkv"].reshape(1, 3 * E),
      lp["sa_wo"], lp["sa_bo"].reshape(1, E),
      lp["ln1_g"].reshape(1, E), lp["ln1_b"].reshape(1, E),
      lp["ca_wq"], lp["ca_bq"].reshape(1, E),
      lp["ca_wkv"], lp["ca_bkv"].reshape(1, 2 * E),
      lp["ca_wo"], lp["ca_bo"].reshape(1, E),
      lp["ln2_g"].reshape(1, E), lp["ln2_b"].reshape(1, E),
      lp["w1"], lp["b1"].reshape(1, F), lp["w2"], lp["b2"].reshape(1, E),
      lp["ln3_g"].reshape(1, E), lp["ln3_b"].reshape(1, E))


def _pick_vocab_tile(n_pad, max_tile=2048):
    """Largest multiple of 128 <= max_tile that divides n_pad (n_pad % 128 == 0)."""
    best = 128
    t = 128
    while t <= max_tile:
        if n_pad % t == 0:
            best = t
        t += 128
    return best


def out_projection(x, w, b):
    """(B,S,E) @ (E,N) + b, vocab-tiled so the (E,N) weight never needs to be
    VMEM-resident all at once.  N must be a multiple of 128 (lane-dense)."""
    B, S, E = x.shape
    N = w.shape[1]
    tn = _pick_vocab_tile(N)
    return pl.pallas_call(
        _out_proj_kernel,
        out_shape=jax.ShapeDtypeStruct((B, S, N), jnp.float32),
        grid=(B, N // tn),
        in_specs=[
            pl.BlockSpec((pl.Squeezed(), S, E), lambda b, j: (b, 0, 0)),
            pl.BlockSpec((E, tn), lambda b, j: (0, j)),
            pl.BlockSpec((1, tn), lambda b, j: (0, j)),
        ],
        out_specs=pl.BlockSpec((pl.Squeezed(), S, tn), lambda b, j: (b, 0, j)),
        compiler_params=pltpu.CompilerParams(
            dimension_semantics=("parallel", "parallel"),
            vmem_limit_bytes=32 * 1024 * 1024),
    )(x, w, b.reshape(1, N))


# ----------------------------------------------------------------------------
# Model glue (plain JAX): embedding lookup, layer composition
# ----------------------------------------------------------------------------
def audio_decoder_forward(params, audio, text_embed, *, nhead, vocab):
    """audio: (B, S) int32 token ids; text_embed (memory): (T, B, E).
    Returns (B, S, vocab) logits, matching the PyTorch module output."""
    B, S = audio.shape
    # embedding lookup (tiny gather, plain JAX)
    emb = jnp.take(params["embedding"], audio, axis=0)              # (B, S, E)
    # positional encoding in (B, S, E) layout (dropout = identity in eval)
    x = emb.astype(jnp.float32) + params["pe"][:S, 0][None, :, :]
    # memory transposed once to (B, T, E); no transposes in the layer loop
    mem = jnp.transpose(text_embed, (1, 0, 2)).astype(jnp.float32)
    for lp in params["layers"]:
        x = decoder_layer_block(x, mem, lp, nhead=nhead)
    # vocab projection; weight/bias were padded to a 128-multiple at init time
    logits = out_projection(x, params["out_w"], params["out_b"])    # (B,S,v_pad)
    return logits[:, :, :vocab]


def make_positional_encoding(max_len, d_model):
    position = jnp.arange(max_len, dtype=jnp.float32)[:, None]
    div_term = jnp.exp(jnp.arange(0, d_model, 2, dtype=jnp.float32)
                       * (-math.log(10000.0) / d_model))
    pe = jnp.zeros((max_len, 1, d_model), dtype=jnp.float32)
    pe = pe.at[:, 0, 0::2].set(jnp.sin(position * div_term))
    pe = pe.at[:, 0, 1::2].set(jnp.cos(position * div_term))
    return pe


def init_params(key, vocab, E, nhead, num_layers, dim_ff=1024):
    keys = iter(jax.random.split(key, 4 + 8 * num_layers))

    def nrm(shape, scale=0.02, dtype=MXU_DTYPE):
        return (scale * jax.random.normal(next(keys), shape,
                                          dtype=jnp.float32)).astype(dtype)

    layers = []
    for _ in range(num_layers):
        layers.append({
            # self-attention: packed q|k|v columns == PyTorch in_proj_weight.T
            "sa_wqkv": nrm((E, 3 * E)), "sa_bqkv": jnp.zeros((3 * E,), jnp.float32),
            "sa_wo": nrm((E, E)), "sa_bo": jnp.zeros((E,), jnp.float32),
            # cross-attention: q separate, packed k|v
            "ca_wq": nrm((E, E)), "ca_bq": jnp.zeros((E,), jnp.float32),
            "ca_wkv": nrm((E, 2 * E)), "ca_bkv": jnp.zeros((2 * E,), jnp.float32),
            "ca_wo": nrm((E, E)), "ca_bo": jnp.zeros((E,), jnp.float32),
            # FFN
            "w1": nrm((E, dim_ff)), "b1": jnp.zeros((dim_ff,), jnp.float32),
            "w2": nrm((dim_ff, E)), "b2": jnp.zeros((E,), jnp.float32),
            # LayerNorms (f32)
            "ln1_g": jnp.ones((E,), jnp.float32), "ln1_b": jnp.zeros((E,), jnp.float32),
            "ln2_g": jnp.ones((E,), jnp.float32), "ln2_b": jnp.zeros((E,), jnp.float32),
            "ln3_g": jnp.ones((E,), jnp.float32), "ln3_b": jnp.zeros((E,), jnp.float32),
        })

    # vocab projection padded to a multiple of 128 ONCE here (not per forward)
    v_pad = ((vocab + 127) // 128) * 128
    out_w = nrm((E, vocab))
    out_w = jnp.pad(out_w.astype(jnp.float32),
                    ((0, 0), (0, v_pad - vocab))).astype(MXU_DTYPE)
    out_b = jnp.pad(jnp.zeros((vocab,), jnp.float32), ((0, v_pad - vocab),))

    return {
        "embedding": nrm((vocab, E), 1.0, dtype=jnp.float32),  # nn.Embedding ~ N(0,1)
        "pe": make_positional_encoding(2048, E),               # max_len=2048 as in module
        "layers": layers,
        "out_w": out_w,            # (E, v_pad) bf16
        "out_b": out_b,            # (v_pad,)   f32
    }


if __name__ == "__main__":
    vocab, E, nhead, num_layers = 50, 32, 4, 2
    B, S, T = 2, 8, 6

    key = jax.random.PRNGKey(0)
    k_params, k_audio, k_mem = jax.random.split(key, 3)

    params = init_params(k_params, vocab, E, nhead, num_layers)
    audio = jax.random.randint(k_audio, (B, S), 0, vocab, dtype=jnp.int32)
    text_embed = jax.random.normal(k_mem, (T, B, E), dtype=jnp.float32)

    fwd = jax.jit(functools.partial(audio_decoder_forward, nhead=nhead, vocab=vocab))
    out = fwd(params, audio, text_embed)
    out = jax.block_until_ready(out)

    assert out.shape == (B, S, vocab), out.shape
    assert jnp.all(jnp.isfinite(out))
    print("KERNEL_OK")
</pallas_src>

<mosaic_0001>
module attributes {stable_mosaic.version = 11 : i64} {
  func.func @_decoder_layer_kernel(%arg0: i32, %arg1: memref<1x8x32xf32, #tpu.memory_space<vmem>>, %arg2: memref<1x6x32xf32, #tpu.memory_space<vmem>>, %arg3: memref<32x96xbf16, #tpu.memory_space<vmem>>, %arg4: memref<1x96xf32, #tpu.memory_space<vmem>>, %arg5: memref<32x32xbf16, #tpu.memory_space<vmem>>, %arg6: memref<1x32xf32, #tpu.memory_space<vmem>>, %arg7: memref<1x32xf32, #tpu.memory_space<vmem>>, %arg8: memref<1x32xf32, #tpu.memory_space<vmem>>, %arg9: memref<32x32xbf16, #tpu.memory_space<vmem>>, %arg10: memref<1x32xf32, #tpu.memory_space<vmem>>, %arg11: memref<32x64xbf16, #tpu.memory_space<vmem>>, %arg12: memref<1x64xf32, #tpu.memory_space<vmem>>, %arg13: memref<32x32xbf16, #tpu.memory_space<vmem>>, %arg14: memref<1x32xf32, #tpu.memory_space<vmem>>, %arg15: memref<1x32xf32, #tpu.memory_space<vmem>>, %arg16: memref<1x32xf32, #tpu.memory_space<vmem>>, %arg17: memref<32x1024xbf16, #tpu.memory_space<vmem>>, %arg18: memref<1x1024xf32, #tpu.memory_space<vmem>>, %arg19: memref<1024x32xbf16, #tpu.memory_space<vmem>>, %arg20: memref<1x32xf32, #tpu.memory_space<vmem>>, %arg21: memref<1x32xf32, #tpu.memory_space<vmem>>, %arg22: memref<1x32xf32, #tpu.memory_space<vmem>>, %arg23: memref<1x8x32xf32, #tpu.memory_space<vmem>>) attributes {dimension_semantics = [#tpu.dimension_semantics<parallel>], iteration_bounds = array<i64: 2>, scalar_prefetch = 0 : i64, scratch_operands = 0 : i64, tpu.core_type = #tpu.core_type<tc>, window_params = [{transform_indices = @transform_0, window_bounds = array<i64: 1, 8, 32>}, {transform_indices = @transform_1, window_bounds = array<i64: 1, 6, 32>}, {pipeline_mode = #tpu.pipeline_mode<synchronous>, transform_indices = @transform_2, window_bounds = array<i64: 32, 96>}, {pipeline_mode = #tpu.pipeline_mode<synchronous>, transform_indices = @transform_3, window_bounds = array<i64: 1, 96>}, {pipeline_mode = #tpu.pipeline_mode<synchronous>, transform_indices = @transform_4, window_bounds = array<i64: 32, 32>}, {pipeline_mode = #tpu.pipeline_mode<synchronous>, transform_indices = @transform_5, window_bounds = array<i64: 1, 32>}, {pipeline_mode = #tpu.pipeline_mode<synchronous>, transform_indices = @transform_6, window_bounds = array<i64: 1, 32>}, {pipeline_mode = #tpu.pipeline_mode<synchronous>, transform_indices = @transform_7, window_bounds = array<i64: 1, 32>}, {pipeline_mode = #tpu.pipeline_mode<synchronous>, transform_indices = @transform_8, window_bounds = array<i64: 32, 32>}, {pipeline_mode = #tpu.pipeline_mode<synchronous>, transform_indices = @transform_9, window_bounds = array<i64: 1, 32>}, {pipeline_mode = #tpu.pipeline_mode<synchronous>, transform_indices = @transform_10, window_bounds = array<i64: 32, 64>}, {pipeline_mode = #tpu.pipeline_mode<synchronous>, transform_indices = @transform_11, window_bounds = array<i64: 1, 64>}, {pipeline_mode = #tpu.pipeline_mode<synchronous>, transform_indices = @transform_12, window_bounds = array<i64: 32, 32>}, {pipeline_mode = #tpu.pipeline_mode<synchronous>, transform_indices = @transform_13, window_bounds = array<i64: 1, 32>}, {pipeline_mode = #tpu.pipeline_mode<synchronous>, transform_indices = @transform_14, window_bounds = array<i64: 1, 32>}, {pipeline_mode = #tpu.pipeline_mode<synchronous>, transform_indices = @transform_15, window_bounds = array<i64: 1, 32>}, {pipeline_mode = #tpu.pipeline_mode<synchronous>, transform_indices = @transform_16, window_bounds = array<i64: 32, 1024>}, {pipeline_mode = #tpu.pipeline_mode<synchronous>, transform_indices = @transform_17, window_bounds = array<i64: 1, 1024>}, {pipeline_mode = #tpu.pipeline_mode<synchronous>, transform_indices = @transform_18, window_bounds = array<i64: 1024, 32>}, {pipeline_mode = #tpu.pipeline_mode<synchronous>, transform_indices = @transform_19, window_bounds = array<i64: 1, 32>}, {pipeline_mode = #tpu.pipeline_mode<synchronous>, transform_indices = @transform_20, window_bounds = array<i64: 1, 32>}, {pipeline_mode = #tpu.pipeline_mode<synchronous>, transform_indices = @transform_21, window_bounds = array<i64: 1, 32>}, {transform_indices = @transform_22, window_bounds = array<i64: 1, 8, 32>}]} {
    %c0 = arith.constant 0 : index
    %c0_0 = arith.constant 0 : index
    %c0_1 = arith.constant 0 : index
    %0 = vector.load %arg1[%c0, %c0_0, %c0_1] : memref<1x8x32xf32, #tpu.memory_space<vmem>>, vector<1x8x32xf32>
    %1 = vector.shape_cast %0 : vector<1x8x32xf32> to vector<8x32xf32>
    %c0_2 = arith.constant 0 : index
    %c0_3 = arith.constant 0 : index
    %c0_4 = arith.constant 0 : index
    %2 = vector.load %arg2[%c0_2, %c0_3, %c0_4] : memref<1x6x32xf32, #tpu.memory_space<vmem>>, vector<1x6x32xf32>
    %3 = vector.shape_cast %2 : vector<1x6x32xf32> to vector<6x32xf32>
    %4 = arith.truncf %1 : vector<8x32xf32> to vector<8x32xbf16>
    %c0_5 = arith.constant 0 : index
    %c0_6 = arith.constant 0 : index
    %5 = vector.load %arg3[%c0_5, %c0_6] : memref<32x96xbf16, #tpu.memory_space<vmem>>, vector<32x96xbf16>
    %cst = arith.constant dense<0.000000e+00> : vector<8x96xf32>
    %6 = tpu.matmul %4, %5, %cst {dimension_numbers = #tpu.dot_dimension_numbers<[1], [0], [0], [1], [0, 0, 1, 1], [], []>} : vector<8x32xbf16>, vector<32x96xbf16>, vector<8x96xf32> -> vector<8x96xf32>
    %c0_7 = arith.constant 0 : index
    %c0_8 = arith.constant 0 : index
    %7 = vector.load %arg4[%c0_7, %c0_8] : memref<1x96xf32, #tpu.memory_space<vmem>>, vector<1x96xf32>
    %8 = vector.broadcast %7 : vector<1x96xf32> to vector<8x96xf32>
    %9 = arith.addf %6, %8 : vector<8x96xf32>
    %10 = vector.extract_strided_slice %9 {offsets = [0, 0], sizes = [8, 32], strides = [1, 1]} : vector<8x96xf32> to vector<8x32xf32>
    %11 = vector.extract_strided_slice %9 {offsets = [0, 32], sizes = [8, 32], strides = [1, 1]} : vector<8x96xf32> to vector<8x32xf32>
    %12 = vector.extract_strided_slice %9 {offsets = [0, 64], sizes = [8, 32], strides = [1, 1]} : vector<8x96xf32> to vector<8x32xf32>
    %c0_9 = arith.constant 0 : index
    %c0_10 = arith.constant 0 : index
    %13 = vector.load %arg5[%c0_9, %c0_10] : memref<32x32xbf16, #tpu.memory_space<vmem>>, vector<32x32xbf16>
    %14 = arith.truncf %10 : vector<8x32xf32> to vector<8x32xbf16>
    %15 = arith.truncf %11 : vector<8x32xf32> to vector<8x32xbf16>
    %16 = arith.truncf %12 : vector<8x32xf32> to vector<8x32xbf16>
    %17 = tpu.iota {dimensions = array<i32: 0>} : vector<8x8xi32>
    %18 = tpu.iota {dimensions = array<i32: 1>} : vector<8x8xi32>
    %19 = arith.cmpi sgt, %18, %17 : vector<8x8xi32>
    %cst_11 = arith.constant 0.000000e+00 : f32
    %20 = vector.broadcast %cst_11 : f32 to vector<8x32xf32>
    %21 = vector.extract_strided_slice %14 {offsets = [0, 0], sizes = [8, 8], strides = [1, 1]} : vector<8x32xbf16> to vector<8x8xbf16>
    %22 = vector.extract_strided_slice %15 {offsets = [0, 0], sizes = [8, 8], strides = [1, 1]} : vector<8x32xbf16> to vector<8x8xbf16>
    %23 = vector.extract_strided_slice %16 {offsets = [0, 0], sizes = [8, 8], strides = [1, 1]} : vector<8x32xbf16> to vector<8x8xbf16>
    %cst_12 = arith.constant dense<0.000000e+00> : vector<8x8xf32>
    %24 = tpu.matmul %21, %22, %cst_12 {dimension_numbers = #tpu.dot_dimension_numbers<[1], [1], [0], [0], [0, 0, 1, 0], [], []>} : vector<8x8xbf16>, vector<8x8xbf16>, vector<8x8xf32> -> vector<8x8xf32>
    %cst_13 = arith.constant 0.353553385 : f32
    %25 = vector.broadcast %cst_13 : f32 to vector<8x8xf32>
    %26 = arith.mulf %24, %25 : vector<8x8xf32>
    %cst_14 = arith.constant -1.000000e+30 : f32
    %27 = vector.broadcast %cst_14 : f32 to vector<8x8xf32>
    %28 = arith.select %19, %27, %26 : vector<8x8xi1>, vector<8x8xf32>
    %cst_15 = arith.constant dense<0xFF800000> : vector<8xf32>
    %29 = vector.multi_reduction <maximumf>, %28, %cst_15 [1] : vector<8x8xf32> to vector<8xf32>
    %30 = vector.shape_cast %29 : vector<8xf32> to vector<8x1xf32>
    %31 = vector.broadcast %30 : vector<8x1xf32> to vector<8x8xf32>
    %32 = arith.subf %28, %31 : vector<8x8xf32>
    %33 = math.exp %32 : vector<8x8xf32>
    %cst_16 = arith.constant dense<0.000000e+00> : vector<8xf32>
    %34 = vector.multi_reduction <add>, %33, %cst_16 [1] : vector<8x8xf32> to vector<8xf32>
    %35 = vector.shape_cast %34 : vector<8xf32> to vector<8x1xf32>
    %36 = tpu.reciprocal %35 {approx = true} : vector<8x1xf32> -> vector<8x1xf32>
    %37 = vector.broadcast %36 : vector<8x1xf32> to vector<8x8xf32>
    %38 = arith.mulf %33, %37 : vector<8x8xf32>
    %39 = arith.truncf %38 : vector<8x8xf32> to vector<8x8xbf16>
    %cst_17 = arith.constant dense<0.000000e+00> : vector<8x8xf32>
    %40 = tpu.matmul %39, %23, %cst_17 {dimension_numbers = #tpu.dot_dimension_numbers<[1], [0], [0], [1], [0, 0, 1, 1], [], []>} : vector<8x8xbf16>, vector<8x8xbf16>, vector<8x8xf32> -> vector<8x8xf32>
    %41 = arith.truncf %40 : vector<8x8xf32> to vector<8x8xbf16>
    %42 = vector.extract_strided_slice %13 {offsets = [0, 0], sizes = [8, 32], strides = [1, 1]} : vector<32x32xbf16> to vector<8x32xbf16>
    %cst_18 = arith.constant dense<0.000000e+00> : vector<8x32xf32>
    %43 = tpu.matmul %41, %42, %cst_18 {dimension_numbers = #tpu.dot_dimension_numbers<[1], [0], [0], [1], [0, 0, 1, 1], [], []>} : vector<8x8xbf16>, vector<8x32xbf16>, vector<8x32xf32> -> vector<8x32xf32>
    %44 = arith.addf %20, %43 : vector<8x32xf32>
    %45 = vector.extract_strided_slice %14 {offsets = [0, 8], sizes = [8, 8], strides = [1, 1]} : vector<8x32xbf16> to vector<8x8xbf16>
    %46 = vector.extract_strided_slice %15 {offsets = [0, 8], sizes = [8, 8], strides = [1, 1]} : vector<8x32xbf16> to vector<8x8xbf16>
    %47 = vector.extract_strided_slice %16 {offsets = [0, 8], sizes = [8, 8], strides = [1, 1]} : vector<8x32xbf16> to vector<8x8xbf16>
    %cst_19 = arith.constant dense<0.000000e+00> : vector<8x8xf32>
    %48 = tpu.matmul %45, %46, %cst_19 {dimension_numbers = #tpu.dot_dimension_numbers<[1], [1], [0], [0], [0, 0, 1, 0], [], []>} : vector<8x8xbf16>, vector<8x8xbf16>, vector<8x8xf32> -> vector<8x8xf32>
    %cst_20 = arith.constant 0.353553385 : f32
    %49 = vector.broadcast %cst_20 : f32 to vector<8x8xf32>
    %50 = arith.mulf %48, %49 : vector<8x8xf32>
    %cst_21 = arith.constant -1.000000e+30 : f32
    %51 = vector.broadcast %cst_21 : f32 to vector<8x8xf32>
    %52 = arith.select %19, %51, %50 : vector<8x8xi1>, vector<8x8xf32>
    %cst_22 = arith.constant dense<0xFF800000> : vector<8xf32>
    %53 = vector.multi_reduction <maximumf>, %52, %cst_22 [1] : vector<8x8xf32> to vector<8xf32>
    %54 = vector.shape_cast %53 : vector<8xf32> to vector<8x1xf32>
    %55 = vector.broadcast %54 : vector<8x1xf32> to vector<8x8xf32>
    %56 = arith.subf %52, %55 : vector<8x8xf32>
    %57 = math.exp %56 : vector<8x8xf32>
    %cst_23 = arith.constant dense<0.000000e+00> : vector<8xf32>
    %58 = vector.multi_reduction <add>, %57, %cst_23 [1] : vector<8x8xf32> to vector<8xf32>
    %59 = vector.shape_cast %58 : vector<8xf32> to vector<8x1xf32>
    %60 = tpu.reciprocal %59 {approx = true} : vector<8x1xf32> -> vector<8x1xf32>
    %61 = vector.broadcast %60 : vector<8x1xf32> to vector<8x8xf32>
    %62 = arith.mulf %57, %61 : vector<8x8xf32>
    %63 = arith.truncf %62 : vector<8x8xf32> to vector<8x8xbf16>
    %cst_24 = arith.constant dense<0.000000e+00> : vector<8x8xf32>
    %64 = tpu.matmul %63, %47, %cst_24 {dimension_numbers = #tpu.dot_dimension_numbers<[1], [0], [0], [1], [0, 0, 1, 1], [], []>} : vector<8x8xbf16>, vector<8x8xbf16>, vector<8x8xf32> -> vector<8x8xf32>
    %65 = arith.truncf %64 : vector<8x8xf32> to vector<8x8xbf16>
    %66 = vector.extract_strided_slice %13 {offsets = [8, 0], sizes = [8, 32], strides = [1, 1]} : vector<32x32xbf16> to vector<8x32xbf16>
    %cst_25 = arith.constant dense<0.000000e+00> : vector<8x32xf32>
    %67 = tpu.matmul %65, %66, %cst_25 {dimension_numbers = #tpu.dot_dimension_numbers<[1], [0], [0], [1], [0, 0, 1, 1], [], []>} : vector<8x8xbf16>, vector<8x32xbf16>, vector<8x32xf32> -> vector<8x32xf32>
    %68 = arith.addf %44, %67 : vector<8x32xf32>
    %69 = vector.extract_strided_slice %14 {offsets = [0, 16], sizes = [8, 8], strides = [1, 1]} : vector<8x32xbf16> to vector<8x8xbf16>
    %70 = vector.extract_strided_slice %15 {offsets = [0, 16], sizes = [8, 8], strides = [1, 1]} : vector<8x32xbf16> to vector<8x8xbf16>
    %71 = vector.extract_strided_slice %16 {offsets = [0, 16], sizes = [8, 8], strides = [1, 1]} : vector<8x32xbf16> to vector<8x8xbf16>
    %cst_26 = arith.constant dense<0.000000e+00> : vector<8x8xf32>
    %72 = tpu.matmul %69, %70, %cst_26 {dimension_numbers = #tpu.dot_dimension_numbers<[1], [1], [0], [0], [0, 0, 1, 0], [], []>} : vector<8x8xbf16>, vector<8x8xbf16>, vector<8x8xf32> -> vector<8x8xf32>
    %cst_27 = arith.constant 0.353553385 : f32
    %73 = vector.broadcast %cst_27 : f32 to vector<8x8xf32>
    %74 = arith.mulf %72, %73 : vector<8x8xf32>
    %cst_28 = arith.constant -1.000000e+30 : f32
    %75 = vector.broadcast %cst_28 : f32 to vector<8x8xf32>
    %76 = arith.select %19, %75, %74 : vector<8x8xi1>, vector<8x8xf32>
    %cst_29 = arith.constant dense<0xFF800000> : vector<8xf32>
    %77 = vector.multi_reduction <maximumf>, %76, %cst_29 [1] : vector<8x8xf32> to vector<8xf32>
    %78 = vector.shape_cast %77 : vector<8xf32> to vector<8x1xf32>
    %79 = vector.broadcast %78 : vector<8x1xf32> to vector<8x8xf32>
    %80 = arith.subf %76, %79 : vector<8x8xf32>
    %81 = math.exp %80 : vector<8x8xf32>
    %cst_30 = arith.constant dense<0.000000e+00> : vector<8xf32>
    %82 = vector.multi_reduction <add>, %81, %cst_30 [1] : vector<8x8xf32> to vector<8xf32>
    %83 = vector.shape_cast %82 : vector<8xf32> to vector<8x1xf32>
    %84 = tpu.reciprocal %83 {approx = true} : vector<8x1xf32> -> vector<8x1xf32>
    %85 = vector.broadcast %84 : vector<8x1xf32> to vector<8x8xf32>
    %86 = arith.mulf %81, %85 : vector<8x8xf32>
    %87 = arith.truncf %86 : vector<8x8xf32> to vector<8x8xbf16>
    %cst_31 = arith.constant dense<0.000000e+00> : vector<8x8xf32>
    %88 = tpu.matmul %87, %71, %cst_31 {dimension_numbers = #tpu.dot_dimension_numbers<[1], [0], [0], [1], [0, 0, 1, 1], [], []>} : vector<8x8xbf16>, vector<8x8xbf16>, vector<8x8xf32> -> vector<8x8xf32>
    %89 = arith.truncf %88 : vector<8x8xf32> to vector<8x8xbf16>
    %90 = vector.extract_strided_slice %13 {offsets = [16, 0], sizes = [8, 32], strides = [1, 1]} : vector<32x32xbf16> to vector<8x32xbf16>
    %cst_32 = arith.constant dense<0.000000e+00> : vector<8x32xf32>
    %91 = tpu.matmul %89, %90, %cst_32 {dimension_numbers = #tpu.dot_dimension_numbers<[1], [0], [0], [1], [0, 0, 1, 1], [], []>} : vector<8x8xbf16>, vector<8x32xbf16>, vector<8x32xf32> -> vector<8x32xf32>
    %92 = arith.addf %68, %91 : vector<8x32xf32>
    %93 = vector.extract_strided_slice %14 {offsets = [0, 24], sizes = [8, 8], strides = [1, 1]} : vector<8x32xbf16> to vector<8x8xbf16>
    %94 = vector.extract_strided_slice %15 {offsets = [0, 24], sizes = [8, 8], strides = [1, 1]} : vector<8x32xbf16> to vector<8x8xbf16>
    %95 = vector.extract_strided_slice %16 {offsets = [0, 24], sizes = [8, 8], strides = [1, 1]} : vector<8x32xbf16> to vector<8x8xbf16>
    %cst_33 = arith.constant dense<0.000000e+00> : vector<8x8xf32>
    %96 = tpu.matmul %93, %94, %cst_33 {dimension_numbers = #tpu.dot_dimension_numbers<[1], [1], [0], [0], [0, 0, 1, 0], [], []>} : vector<8x8xbf16>, vector<8x8xbf16>, vector<8x8xf32> -> vector<8x8xf32>
    %cst_34 = arith.constant 0.353553385 : f32
    %97 = vector.broadcast %cst_34 : f32 to vector<8x8xf32>
    %98 = arith.mulf %96, %97 : vector<8x8xf32>
    %cst_35 = arith.constant -1.000000e+30 : f32
    %99 = vector.broadcast %cst_35 : f32 to vector<8x8xf32>
    %100 = arith.select %19, %99, %98 : vector<8x8xi1>, vector<8x8xf32>
    %cst_36 = arith.constant dense<0xFF800000> : vector<8xf32>
    %101 = vector.multi_reduction <maximumf>, %100, %cst_36 [1] : vector<8x8xf32> to vector<8xf32>
    %102 = vector.shape_cast %101 : vector<8xf32> to vector<8x1xf32>
    %103 = vector.broadcast %102 : vector<8x1xf32> to vector<8x8xf32>
    %104 = arith.subf %100, %103 : vector<8x8xf32>
    %105 = math.exp %104 : vector<8x8xf32>
    %cst_37 = arith.constant dense<0.000000e+00> : vector<8xf32>
    %106 = vector.multi_reduction <add>, %105, %cst_37 [1] : vector<8x8xf32> to vector<8xf32>
    %107 = vector.shape_cast %106 : vector<8xf32> to vector<8x1xf32>
    %108 = tpu.reciprocal %107 {approx = true} : vector<8x1xf32> -> vector<8x1xf32>
    %109 = vector.broadcast %108 : vector<8x1xf32> to vector<8x8xf32>
    %110 = arith.mulf %105, %109 : vector<8x8xf32>
    %111 = arith.truncf %110 : vector<8x8xf32> to vector<8x8xbf16>
    %cst_38 = arith.constant dense<0.000000e+00> : vector<8x8xf32>
    %112 = tpu.matmul %111, %95, %cst_38 {dimension_numbers = #tpu.dot_dimension_numbers<[1], [0], [0], [1], [0, 0, 1, 1], [], []>} : vector<8x8xbf16>, vector<8x8xbf16>, vector<8x8xf32> -> vector<8x8xf32>
    %113 = arith.truncf %112 : vector<8x8xf32> to vector<8x8xbf16>
    %114 = vector.extract_strided_slice %13 {offsets = [24, 0], sizes = [8, 32], strides = [1, 1]} : vector<32x32xbf16> to vector<8x32xbf16>
    %cst_39 = arith.constant dense<0.000000e+00> : vector<8x32xf32>
    %115 = tpu.matmul %113, %114, %cst_39 {dimension_numbers = #tpu.dot_dimension_numbers<[1], [0], [0], [1], [0, 0, 1, 1], [], []>} : vector<8x8xbf16>, vector<8x32xbf16>, vector<8x32xf32> -> vector<8x32xf32>
    %116 = arith.addf %92, %115 : vector<8x32xf32>
    %c0_40 = arith.constant 0 : index
    %c0_41 = arith.constant 0 : index
    %117 = vector.load %arg6[%c0_40, %c0_41] : memref<1x32xf32, #tpu.memory_space<vmem>>, vector<1x32xf32>
    %118 = vector.broadcast %117 : vector<1x32xf32> to vector<8x32xf32>
    %119 = arith.addf %116, %118 : vector<8x32xf32>
    %c0_42 = arith.constant 0 : index
    %c0_43 = arith.constant 0 : index
    %120 = vector.load %arg7[%c0_42, %c0_43] : memref<1x32xf32, #tpu.memory_space<vmem>>, vector<1x32xf32>
    %c0_44 = arith.constant 0 : index
    %c0_45 = arith.constant 0 : index
    %121 = vector.load %arg8[%c0_44, %c0_45] : memref<1x32xf32, #tpu.memory_space<vmem>>, vector<1x32xf32>
    %122 = arith.addf %1, %119 : vector<8x32xf32>
    %cst_46 = arith.constant dense<0.000000e+00> : vector<8xf32>
    %123 = vector.multi_reduction <add>, %122, %cst_46 [1] : vector<8x32xf32> to vector<8xf32>
    %124 = vector.shape_cast %123 : vector<8xf32> to vector<8x1xf32>
    %cst_47 = arith.constant 3.200000e+01 : f32
    %125 = vector.broadcast %cst_47 : f32 to vector<8x1xf32>
    %126 = arith.divf %124, %125 : vector<8x1xf32>
    %127 = vector.broadcast %126 : vector<8x1xf32> to vector<8x32xf32>
    %128 = arith.subf %122, %127 : vector<8x32xf32>
    %129 = arith.mulf %128, %128 : vector<8x32xf32>
    %cst_48 = arith.constant dense<0.000000e+00> : vector<8xf32>
    %130 = vector.multi_reduction <add>, %129, %cst_48 [1] : vector<8x32xf32> to vector<8xf32>
    %131 = vector.shape_cast %130 : vector<8xf32> to vector<8x1xf32>
    %cst_49 = arith.constant 3.200000e+01 : f32
    %132 = vector.broadcast %cst_49 : f32 to vector<8x1xf32>
    %133 = arith.divf %131, %132 : vector<8x1xf32>
    %134 = vector.broadcast %126 : vector<8x1xf32> to vector<8x32xf32>
    %135 = arith.subf %122, %134 : vector<8x32xf32>
    %cst_50 = arith.constant 9.99999974E-6 : f32
    %136 = vector.broadcast %cst_50 : f32 to vector<8x1xf32>
    %137 = arith.addf %133, %136 : vector<8x1xf32>
    %138 = math.rsqrt %137 : vector<8x1xf32>
    %139 = vector.broadcast %138 : vector<8x1xf32> to vector<8x32xf32>
    %140 = arith.mulf %135, %139 : vector<8x32xf32>
    %141 = vector.broadcast %120 : vector<1x32xf32> to vector<8x32xf32>
    %142 = arith.mulf %140, %141 : vector<8x32xf32>
    %143 = vector.broadcast %121 : vector<1x32xf32> to vector<8x32xf32>
    %144 = arith.addf %142, %143 : vector<8x32xf32>
    %145 = arith.truncf %144 : vector<8x32xf32> to vector<8x32xbf16>
    %c0_51 = arith.constant 0 : index
    %c0_52 = arith.constant 0 : index
    %146 = vector.load %arg9[%c0_51, %c0_52] : memref<32x32xbf16, #tpu.memory_space<vmem>>, vector<32x32xbf16>
    %cst_53 = arith.constant dense<0.000000e+00> : vector<8x32xf32>
    %147 = tpu.matmul %145, %146, %cst_53 {dimension_numbers = #tpu.dot_dimension_numbers<[1], [0], [0], [1], [0, 0, 1, 1], [], []>} : vector<8x32xbf16>, vector<32x32xbf16>, vector<8x32xf32> -> vector<8x32xf32>
    %c0_54 = arith.constant 0 : index
    %c0_55 = arith.constant 0 : index
    %148 = vector.load %arg10[%c0_54, %c0_55] : memref<1x32xf32, #tpu.memory_space<vmem>>, vector<1x32xf32>
    %149 = vector.broadcast %148 : vector<1x32xf32> to vector<8x32xf32>
    %150 = arith.addf %147, %149 : vector<8x32xf32>
    %151 = arith.truncf %3 : vector<6x32xf32> to vector<6x32xbf16>
    %c0_56 = arith.constant 0 : index
    %c0_57 = arith.constant 0 : index
    %152 = vector.load %arg11[%c0_56, %c0_57] : memref<32x64xbf16, #tpu.memory_space<vmem>>, vector<32x64xbf16>
    %cst_58 = arith.constant dense<0.000000e+00> : vector<6x64xf32>
    %153 = tpu.matmul %151, %152, %cst_58 {dimension_numbers = #tpu.dot_dimension_numbers<[1], [0], [0], [1], [0, 0, 1, 1], [], []>} : vector<6x32xbf16>, vector<32x64xbf16>, vector<6x64xf32> -> vector<6x64xf32>
    %c0_59 = arith.constant 0 : index
    %c0_60 = arith.constant 0 : index
    %154 = vector.load %arg12[%c0_59, %c0_60] : memref<1x64xf32, #tpu.memory_space<vmem>>, vector<1x64xf32>
    %155 = vector.broadcast %154 : vector<1x64xf32> to vector<6x64xf32>
    %156 = arith.addf %153, %155 : vector<6x64xf32>
    %157 = vector.extract_strided_slice %156 {offsets = [0, 0], sizes = [6, 32], strides = [1, 1]} : vector<6x64xf32> to vector<6x32xf32>
    %158 = vector.extract_strided_slice %156 {offsets = [0, 32], sizes = [6, 32], strides = [1, 1]} : vector<6x64xf32> to vector<6x32xf32>
    %c0_61 = arith.constant 0 : index
    %c0_62 = arith.constant 0 : index
    %159 = vector.load %arg13[%c0_61, %c0_62] : memref<32x32xbf16, #tpu.memory_space<vmem>>, vector<32x32xbf16>
    %160 = arith.truncf %150 : vector<8x32xf32> to vector<8x32xbf16>
    %161 = arith.truncf %157 : vector<6x32xf32> to vector<6x32xbf16>
    %162 = arith.truncf %158 : vector<6x32xf32> to vector<6x32xbf16>
    %cst_63 = arith.constant 0.000000e+00 : f32
    %163 = vector.broadcast %cst_63 : f32 to vector<8x32xf32>
    %164 = vector.extract_strided_slice %160 {offsets = [0, 0], sizes = [8, 8], strides = [1, 1]} : vector<8x32xbf16> to vector<8x8xbf16>
    %165 = vector.extract_strided_slice %161 {offsets = [0, 0], sizes = [6, 8], strides = [1, 1]} : vector<6x32xbf16> to vector<6x8xbf16>
    %166 = vector.extract_strided_slice %162 {offsets = [0, 0], sizes = [6, 8], strides = [1, 1]} : vector<6x32xbf16> to vector<6x8xbf16>
    %cst_64 = arith.constant dense<0.000000e+00> : vector<8x6xf32>
    %167 = tpu.matmul %164, %165, %cst_64 {dimension_numbers = #tpu.dot_dimension_numbers<[1], [1], [0], [0], [0, 0, 1, 0], [], []>} : vector<8x8xbf16>, vector<6x8xbf16>, vector<8x6xf32> -> vector<8x6xf32>
    %cst_65 = arith.constant 0.353553385 : f32
    %168 = vector.broadcast %cst_65 : f32 to vector<8x6xf32>
    %169 = arith.mulf %167, %168 : vector<8x6xf32>
    %cst_66 = arith.constant dense<0xFF800000> : vector<8xf32>
    %170 = vector.multi_reduction <maximumf>, %169, %cst_66 [1] : vector<8x6xf32> to vector<8xf32>
    %171 = vector.shape_cast %170 : vector<8xf32> to vector<8x1xf32>
    %172 = vector.broadcast %171 : vector<8x1xf32> to vector<8x6xf32>
    %173 = arith.subf %169, %172 : vector<8x6xf32>
    %174 = math.exp %173 : vector<8x6xf32>
    %cst_67 = arith.constant dense<0.000000e+00> : vector<8xf32>
    %175 = vector.multi_reduction <add>, %174, %cst_67 [1] : vector<8x6xf32> to vector<8xf32>
    %176 = vector.shape_cast %175 : vector<8xf32> to vector<8x1xf32>
    %177 = tpu.reciprocal %176 {approx = true} : vector<8x1xf32> -> vector<8x1xf32>
    %178 = vector.broadcast %177 : vector<8x1xf32> to vector<8x6xf32>
    %179 = arith.mulf %174, %178 : vector<8x6xf32>
    %180 = arith.truncf %179 : vector<8x6xf32> to vector<8x6xbf16>
    %cst_68 = arith.constant dense<0.000000e+00> : vector<8x8xf32>
    %181 = tpu.matmul %180, %166, %cst_68 {dimension_numbers = #tpu.dot_dimension_numbers<[1], [0], [0], [1], [0, 0, 1, 1], [], []>} : vector<8x6xbf16>, vector<6x8xbf16>, vector<8x8xf32> -> vector<8x8xf32>
    %182 = arith.truncf %181 : vector<8x8xf32> to vector<8x8xbf16>
    %183 = vector.extract_strided_slice %159 {offsets = [0, 0], sizes = [8, 32], strides = [1, 1]} : vector<32x32xbf16> to vector<8x32xbf16>
    %cst_69 = arith.constant dense<0.000000e+00> : vector<8x32xf32>
    %184 = tpu.matmul %182, %183, %cst_69 {dimension_numbers = #tpu.dot_dimension_numbers<[1], [0], [0], [1], [0, 0, 1, 1], [], []>} : vector<8x8xbf16>, vector<8x32xbf16>, vector<8x32xf32> -> vector<8x32xf32>
    %185 = arith.addf %163, %184 : vector<8x32xf32>
    %186 = vector.extract_strided_slice %160 {offsets = [0, 8], sizes = [8, 8], strides = [1, 1]} : vector<8x32xbf16> to vector<8x8xbf16>
    %187 = vector.extract_strided_slice %161 {offsets = [0, 8], sizes = [6, 8], strides = [1, 1]} : vector<6x32xbf16> to vector<6x8xbf16>
    %188 = vector.extract_strided_slice %162 {offsets = [0, 8], sizes = [6, 8], strides = [1, 1]} : vector<6x32xbf16> to vector<6x8xbf16>
    %cst_70 = arith.constant dense<0.000000e+00> : vector<8x6xf32>
    %189 = tpu.matmul %186, %187, %cst_70 {dimension_numbers = #tpu.dot_dimension_numbers<[1], [1], [0], [0], [0, 0, 1, 0], [], []>} : vector<8x8xbf16>, vector<6x8xbf16>, vector<8x6xf32> -> vector<8x6xf32>
    %cst_71 = arith.constant 0.353553385 : f32
    %190 = vector.broadcast %cst_71 : f32 to vector<8x6xf32>
    %191 = arith.mulf %189, %190 : vector<8x6xf32>
    %cst_72 = arith.constant dense<0xFF800000> : vector<8xf32>
    %192 = vector.multi_reduction <maximumf>, %191, %cst_72 [1] : vector<8x6xf32> to vector<8xf32>
    %193 = vector.shape_cast %192 : vector<8xf32> to vector<8x1xf32>
    %194 = vector.broadcast %193 : vector<8x1xf32> to vector<8x6xf32>
    %195 = arith.subf %191, %194 : vector<8x6xf32>
    %196 = math.exp %195 : vector<8x6xf32>
    %cst_73 = arith.constant dense<0.000000e+00> : vector<8xf32>
    %197 = vector.multi_reduction <add>, %196, %cst_73 [1] : vector<8x6xf32> to vector<8xf32>
    %198 = vector.shape_cast %197 : vector<8xf32> to vector<8x1xf32>
    %199 = tpu.reciprocal %198 {approx = true} : vector<8x1xf32> -> vector<8x1xf32>
    %200 = vector.broadcast %199 : vector<8x1xf32> to vector<8x6xf32>
    %201 = arith.mulf %196, %200 : vector<8x6xf32>
    %202 = arith.truncf %201 : vector<8x6xf32> to vector<8x6xbf16>
    %cst_74 = arith.constant dense<0.000000e+00> : vector<8x8xf32>
    %203 = tpu.matmul %202, %188, %cst_74 {dimension_numbers = #tpu.dot_dimension_numbers<[1], [0], [0], [1], [0, 0, 1, 1], [], []>} : vector<8x6xbf16>, vector<6x8xbf16>, vector<8x8xf32> -> vector<8x8xf32>
    %204 = arith.truncf %203 : vector<8x8xf32> to vector<8x8xbf16>
    %205 = vector.extract_strided_slice %159 {offsets = [8, 0], sizes = [8, 32], strides = [1, 1]} : vector<32x32xbf16> to vector<8x32xbf16>
    %cst_75 = arith.constant dense<0.000000e+00> : vector<8x32xf32>
    %206 = tpu.matmul %204, %205, %cst_75 {dimension_numbers = #tpu.dot_dimension_numbers<[1], [0], [0], [1], [0, 0, 1, 1], [], []>} : vector<8x8xbf16>, vector<8x32xbf16>, vector<8x32xf32> -> vector<8x32xf32>
    %207 = arith.addf %185, %206 : vector<8x32xf32>
    %208 = vector.extract_strided_slice %160 {offsets = [0, 16], sizes = [8, 8], strides = [1, 1]} : vector<8x32xbf16> to vector<8x8xbf16>
    %209 = vector.extract_strided_slice %161 {offsets = [0, 16], sizes = [6, 8], strides = [1, 1]} : vector<6x32xbf16> to vector<6x8xbf16>
    %210 = vector.extract_strided_slice %162 {offsets = [0, 16], sizes = [6, 8], strides = [1, 1]} : vector<6x32xbf16> to vector<6x8xbf16>
    %cst_76 = arith.constant dense<0.000000e+00> : vector<8x6xf32>
    %211 = tpu.matmul %208, %209, %cst_76 {dimension_numbers = #tpu.dot_dimension_numbers<[1], [1], [0], [0], [0, 0, 1, 0], [], []>} : vector<8x8xbf16>, vector<6x8xbf16>, vector<8x6xf32> -> vector<8x6xf32>
    %cst_77 = arith.constant 0.353553385 : f32
    %212 = vector.broadcast %cst_77 : f32 to vector<8x6xf32>
    %213 = arith.mulf %211, %212 : vector<8x6xf32>
    %cst_78 = arith.constant dense<0xFF800000> : vector<8xf32>
    %214 = vector.multi_reduction <maximumf>, %213, %cst_78 [1] : vector<8x6xf32> to vector<8xf32>
    %215 = vector.shape_cast %214 : vector<8xf32> to vector<8x1xf32>
    %216 = vector.broadcast %215 : vector<8x1xf32> to vector<8x6xf32>
    %217 = arith.subf %213, %216 : vector<8x6xf32>
    %218 = math.exp %217 : vector<8x6xf32>
    %cst_79 = arith.constant dense<0.000000e+00> : vector<8xf32>
    %219 = vector.multi_reduction <add>, %218, %cst_79 [1] : vector<8x6xf32> to vector<8xf32>
    %220 = vector.shape_cast %219 : vector<8xf32> to vector<8x1xf32>
    %221 = tpu.reciprocal %220 {approx = true} : vector<8x1xf32> -> vector<8x1xf32>
    %222 = vector.broadcast %221 : vector<8x1xf32> to vector<8x6xf32>
    %223 = arith.mulf %218, %222 : vector<8x6xf32>
    %224 = arith.truncf %223 : vector<8x6xf32> to vector<8x6xbf16>
    %cst_80 = arith.constant dense<0.000000e+00> : vector<8x8xf32>
    %225 = tpu.matmul %224, %210, %cst_80 {dimension_numbers = #tpu.dot_dimension_numbers<[1], [0], [0], [1], [0, 0, 1, 1], [], []>} : vector<8x6xbf16>, vector<6x8xbf16>, vector<8x8xf32> -> vector<8x8xf32>
    %226 = arith.truncf %225 : vector<8x8xf32> to vector<8x8xbf16>
    %227 = vector.extract_strided_slice %159 {offsets = [16, 0], sizes = [8, 32], strides = [1, 1]} : vector<32x32xbf16> to vector<8x32xbf16>
    %cst_81 = arith.constant dense<0.000000e+00> : vector<8x32xf32>
    %228 = tpu.matmul %226, %227, %cst_81 {dimension_numbers = #tpu.dot_dimension_numbers<[1], [0], [0], [1], [0, 0, 1, 1], [], []>} : vector<8x8xbf16>, vector<8x32xbf16>, vector<8x32xf32> -> vector<8x32xf32>
    %229 = arith.addf %207, %228 : vector<8x32xf32>
    %230 = vector.extract_strided_slice %160 {offsets = [0, 24], sizes = [8, 8], strides = [1, 1]} : vector<8x32xbf16> to vector<8x8xbf16>
    %231 = vector.extract_strided_slice %161 {offsets = [0, 24], sizes = [6, 8], strides = [1, 1]} : vector<6x32xbf16> to vector<6x8xbf16>
    %232 = vector.extract_strided_slice %162 {offsets = [0, 24], sizes = [6, 8], strides = [1, 1]} : vector<6x32xbf16> to vector<6x8xbf16>
    %cst_82 = arith.constant dense<0.000000e+00> : vector<8x6xf32>
    %233 = tpu.matmul %230, %231, %cst_82 {dimension_numbers = #tpu.dot_dimension_numbers<[1], [1], [0], [0], [0, 0, 1, 0], [], []>} : vector<8x8xbf16>, vector<6x8xbf16>, vector<8x6xf32> -> vector<8x6xf32>
    %cst_83 = arith.constant 0.353553385 : f32
    %234 = vector.broadcast %cst_83 : f32 to vector<8x6xf32>
    %235 = arith.mulf %233, %234 : vector<8x6xf32>
    %cst_84 = arith.constant dense<0xFF800000> : vector<8xf32>
    %236 = vector.multi_reduction <maximumf>, %235, %cst_84 [1] : vector<8x6xf32> to vector<8xf32>
    %237 = vector.shape_cast %236 : vector<8xf32> to vector<8x1xf32>
    %238 = vector.broadcast %237 : vector<8x1xf32> to vector<8x6xf32>
    %239 = arith.subf %235, %238 : vector<8x6xf32>
    %240 = math.exp %239 : vector<8x6xf32>
    %cst_85 = arith.constant dense<0.000000e+00> : vector<8xf32>
    %241 = vector.multi_reduction <add>, %240, %cst_85 [1] : vector<8x6xf32> to vector<8xf32>
    %242 = vector.shape_cast %241 : vector<8xf32> to vector<8x1xf32>
    %243 = tpu.reciprocal %242 {approx = true} : vector<8x1xf32> -> vector<8x1xf32>
    %244 = vector.broadcast %243 : vector<8x1xf32> to vector<8x6xf32>
    %245 = arith.mulf %240, %244 : vector<8x6xf32>
    %246 = arith.truncf %245 : vector<8x6xf32> to vector<8x6xbf16>
    %cst_86 = arith.constant dense<0.000000e+00> : vector<8x8xf32>
    %247 = tpu.matmul %246, %232, %cst_86 {dimension_numbers = #tpu.dot_dimension_numbers<[1], [0], [0], [1], [0, 0, 1, 1], [], []>} : vector<8x6xbf16>, vector<6x8xbf16>, vector<8x8xf32> -> vector<8x8xf32>
    %248 = arith.truncf %247 : vector<8x8xf32> to vector<8x8xbf16>
    %249 = vector.extract_strided_slice %159 {offsets = [24, 0], sizes = [8, 32], strides = [1, 1]} : vector<32x32xbf16> to vector<8x32xbf16>
    %cst_87 = arith.constant dense<0.000000e+00> : vector<8x32xf32>
    %250 = tpu.matmul %248, %249, %cst_87 {dimension_numbers = #tpu.dot_dimension_numbers<[1], [0], [0], [1], [0, 0, 1, 1], [], []>} : vector<8x8xbf16>, vector<8x32xbf16>, vector<8x32xf32> -> vector<8x32xf32>
    %251 = arith.addf %229, %250 : vector<8x32xf32>
    %c0_88 = arith.constant 0 : index
    %c0_89 = arith.constant 0 : index
    %252 = vector.load %arg14[%c0_88, %c0_89] : memref<1x32xf32, #tpu.memory_space<vmem>>, vector<1x32xf32>
    %253 = vector.broadcast %252 : vector<1x32xf32> to vector<8x32xf32>
    %254 = arith.addf %251, %253 : vector<8x32xf32>
    %c0_90 = arith.constant 0 : index
    %c0_91 = arith.constant 0 : index
    %255 = vector.load %arg15[%c0_90, %c0_91] : memref<1x32xf32, #tpu.memory_space<vmem>>, vector<1x32xf32>
    %c0_92 = arith.constant 0 : index
    %c0_93 = arith.constant 0 : index
    %256 = vector.load %arg16[%c0_92, %c0_93] : memref<1x32xf32, #tpu.memory_space<vmem>>, vector<1x32xf32>
    %257 = arith.addf %144, %254 : vector<8x32xf32>
    %cst_94 = arith.constant dense<0.000000e+00> : vector<8xf32>
    %258 = vector.multi_reduction <add>, %257, %cst_94 [1] : vector<8x32xf32> to vector<8xf32>
    %259 = vector.shape_cast %258 : vector<8xf32> to vector<8x1xf32>
    %cst_95 = arith.constant 3.200000e+01 : f32
    %260 = vector.broadcast %cst_95 : f32 to vector<8x1xf32>
    %261 = arith.divf %259, %260 : vector<8x1xf32>
    %262 = vector.broadcast %261 : vector<8x1xf32> to vector<8x32xf32>
    %263 = arith.subf %257, %262 : vector<8x32xf32>
    %264 = arith.mulf %263, %263 : vector<8x32xf32>
    %cst_96 = arith.constant dense<0.000000e+00> : vector<8xf32>
    %265 = vector.multi_reduction <add>, %264, %cst_96 [1] : vector<8x32xf32> to vector<8xf32>
    %266 = vector.shape_cast %265 : vector<8xf32> to vector<8x1xf32>
    %cst_97 = arith.constant 3.200000e+01 : f32
    %267 = vector.broadcast %cst_97 : f32 to vector<8x1xf32>
    %268 = arith.divf %266, %267 : vector<8x1xf32>
    %269 = vector.broadcast %261 : vector<8x1xf32> to vector<8x32xf32>
    %270 = arith.subf %257, %269 : vector<8x32xf32>
    %cst_98 = arith.constant 9.99999974E-6 : f32
    %271 = vector.broadcast %cst_98 : f32 to vector<8x1xf32>
    %272 = arith.addf %268, %271 : vector<8x1xf32>
    %273 = math.rsqrt %272 : vector<8x1xf32>
    %274 = vector.broadcast %273 : vector<8x1xf32> to vector<8x32xf32>
    %275 = arith.mulf %270, %274 : vector<8x32xf32>
    %276 = vector.broadcast %255 : vector<1x32xf32> to vector<8x32xf32>
    %277 = arith.mulf %275, %276 : vector<8x32xf32>
    %278 = vector.broadcast %256 : vector<1x32xf32> to vector<8x32xf32>
    %279 = arith.addf %277, %278 : vector<8x32xf32>
    %280 = arith.truncf %279 : vector<8x32xf32> to vector<8x32xbf16>
    %c0_99 = arith.constant 0 : index
    %c0_100 = arith.constant 0 : index
    %281 = vector.load %arg17[%c0_99, %c0_100] : memref<32x1024xbf16, #tpu.memory_space<vmem>>, vector<32x1024xbf16>
    %cst_101 = arith.constant dense<0.000000e+00> : vector<8x1024xf32>
    %282 = tpu.matmul %280, %281, %cst_101 {dimension_numbers = #tpu.dot_dimension_numbers<[1], [0], [0], [1], [0, 0, 1, 1], [], []>} : vector<8x32xbf16>, vector<32x1024xbf16>, vector<8x1024xf32> -> vector<8x1024xf32>
    %c0_102 = arith.constant 0 : index
    %c0_103 = arith.constant 0 : index
    %283 = vector.load %arg18[%c0_102, %c0_103] : memref<1x1024xf32, #tpu.memory_space<vmem>>, vector<1x1024xf32>
    %284 = vector.broadcast %283 : vector<1x1024xf32> to vector<8x1024xf32>
    %285 = arith.addf %282, %284 : vector<8x1024xf32>
    %cst_104 = arith.constant 0.000000e+00 : f32
    %286 = vector.broadcast %cst_104 : f32 to vector<8x1024xf32>
    %287 = arith.maximumf %285, %286 : vector<8x1024xf32>
    %288 = arith.truncf %287 : vector<8x1024xf32> to vector<8x1024xbf16>
    %c0_105 = arith.constant 0 : index
    %c0_106 = arith.constant 0 : index
    %289 = vector.load %arg19[%c0_105, %c0_106] : memref<1024x32xbf16, #tpu.memory_space<vmem>>, vector<1024x32xbf16>
    %cst_107 = arith.constant dense<0.000000e+00> : vector<8x32xf32>
    %290 = tpu.matmul %288, %289, %cst_107 {dimension_numbers = #tpu.dot_dimension_numbers<[1], [0], [0], [1], [0, 0, 1, 1], [], []>} : vector<8x1024xbf16>, vector<1024x32xbf16>, vector<8x32xf32> -> vector<8x32xf32>
    %c0_108 = arith.constant 0 : index
    %c0_109 = arith.constant 0 : index
    %291 = vector.load %arg20[%c0_108, %c0_109] : memref<1x32xf32, #tpu.memory_space<vmem>>, vector<1x32xf32>
    %292 = vector.broadcast %291 : vector<1x32xf32> to vector<8x32xf32>
    %293 = arith.addf %290, %292 : vector<8x32xf32>
    %c0_110 = arith.constant 0 : index
    %c0_111 = arith.constant 0 : index
    %294 = vector.load %arg21[%c0_110, %c0_111] : memref<1x32xf32, #tpu.memory_space<vmem>>, vector<1x32xf32>
    %c0_112 = arith.constant 0 : index
    %c0_113 = arith.constant 0 : index
    %295 = vector.load %arg22[%c0_112, %c0_113] : memref<1x32xf32, #tpu.memory_space<vmem>>, vector<1x32xf32>
    %296 = arith.addf %279, %293 : vector<8x32xf32>
    %cst_114 = arith.constant dense<0.000000e+00> : vector<8xf32>
    %297 = vector.multi_reduction <add>, %296, %cst_114 [1] : vector<8x32xf32> to vector<8xf32>
    %298 = vector.shape_cast %297 : vector<8xf32> to vector<8x1xf32>
    %cst_115 = arith.constant 3.200000e+01 : f32
    %299 = vector.broadcast %cst_115 : f32 to vector<8x1xf32>
    %300 = arith.divf %298, %299 : vector<8x1xf32>
    %301 = vector.broadcast %300 : vector<8x1xf32> to vector<8x32xf32>
    %302 = arith.subf %296, %301 : vector<8x32xf32>
    %303 = arith.mulf %302, %302 : vector<8x32xf32>
    %cst_116 = arith.constant dense<0.000000e+00> : vector<8xf32>
    %304 = vector.multi_reduction <add>, %303, %cst_116 [1] : vector<8x32xf32> to vector<8xf32>
    %305 = vector.shape_cast %304 : vector<8xf32> to vector<8x1xf32>
    %cst_117 = arith.constant 3.200000e+01 : f32
    %306 = vector.broadcast %cst_117 : f32 to vector<8x1xf32>
    %307 = arith.divf %305, %306 : vector<8x1xf32>
    %308 = vector.broadcast %300 : vector<8x1xf32> to vector<8x32xf32>
    %309 = arith.subf %296, %308 : vector<8x32xf32>
    %cst_118 = arith.constant 9.99999974E-6 : f32
    %310 = vector.broadcast %cst_118 : f32 to vector<8x1xf32>
    %311 = arith.addf %307, %310 : vector<8x1xf32>
    %312 = math.rsqrt %311 : vector<8x1xf32>
    %313 = vector.broadcast %312 : vector<8x1xf32> to vector<8x32xf32>
    %314 = arith.mulf %309, %313 : vector<8x32xf32>
    %315 = vector.broadcast %294 : vector<1x32xf32> to vector<8x32xf32>
    %316 = arith.mulf %314, %315 : vector<8x32xf32>
    %317 = vector.broadcast %295 : vector<1x32xf32> to vector<8x32xf32>
    %318 = arith.addf %316, %317 : vector<8x32xf32>
    %c0_119 = arith.constant 0 : index
    %c0_120 = arith.constant 0 : index
    %c0_121 = arith.constant 0 : index
    %319 = vector.load %arg23[%c0_119, %c0_120, %c0_121] : memref<1x8x32xf32, #tpu.memory_space<vmem>>, vector<1x8x32xf32>
    %320 = vector.shape_cast %319 : vector<1x8x32xf32> to vector<8x32xf32>
    %321 = vector.shape_cast %318 : vector<8x32xf32> to vector<1x8x32xf32>
    tpu.vector_store %arg23[%c0_119, %c0_120, %c0_121], %321 {strides = array<i32>} : memref<1x8x32xf32, #tpu.memory_space<vmem>>, vector<1x8x32xf32>,
    return
  }
  func.func @transform_0(%arg0: i32) -> (i32, i32, i32) {
    %c0_i32 = arith.constant 0 : i32
    %c0_i32_0 = arith.constant 0 : i32
    %c0_i32_1 = arith.constant 0 : i32
    return %arg0, %c0_i32, %c0_i32_0 : i32, i32, i32
  }
  func.func @transform_1(%arg0: i32) -> (i32, i32, i32) {
    %c0_i32 = arith.constant 0 : i32
    %c0_i32_0 = arith.constant 0 : i32
    %c0_i32_1 = arith.constant 0 : i32
    return %arg0, %c0_i32, %c0_i32_0 : i32, i32, i32
  }
  func.func @transform_2(%arg0: i32) -> (i32, i32) {
    %c0_i32 = arith.constant 0 : i32
    %c0_i32_0 = arith.constant 0 : i32
    %c0_i32_1 = arith.constant 0 : i32
    return %c0_i32, %c0_i32_0 : i32, i32
  }
  func.func @transform_3(%arg0: i32) -> (i32, i32) {
    %c0_i32 = arith.constant 0 : i32
    %c0_i32_0 = arith.constant 0 : i32
    %c0_i32_1 = arith.constant 0 : i32
    return %c0_i32, %c0_i32_0 : i32, i32
  }
  func.func @transform_4(%arg0: i32) -> (i32, i32) {
    %c0_i32 = arith.constant 0 : i32
    %c0_i32_0 = arith.constant 0 : i32
    %c0_i32_1 = arith.constant 0 : i32
    return %c0_i32, %c0_i32_0 : i32, i32
  }
  func.func @transform_5(%arg0: i32) -> (i32, i32) {
    %c0_i32 = arith.constant 0 : i32
    %c0_i32_0 = arith.constant 0 : i32
    %c0_i32_1 = arith.constant 0 : i32
    return %c0_i32, %c0_i32_0 : i32, i32
  }
  func.func @transform_6(%arg0: i32) -> (i32, i32) {
    %c0_i32 = arith.constant 0 : i32
    %c0_i32_0 = arith.constant 0 : i32
    %c0_i32_1 = arith.constant 0 : i32
    return %c0_i32, %c0_i32_0 : i32, i32
  }
  func.func @transform_7(%arg0: i32) -> (i32, i32) {
    %c0_i32 = arith.constant 0 : i32
    %c0_i32_0 = arith.constant 0 : i32
    %c0_i32_1 = arith.constant 0 : i32
    return %c0_i32, %c0_i32_0 : i32, i32
  }
  func.func @transform_8(%arg0: i32) -> (i32, i32) {
    %c0_i32 = arith.constant 0 : i32
    %c0_i32_0 = arith.constant 0 : i32
    %c0_i32_1 = arith.constant 0 : i32
    return %c0_i32, %c0_i32_0 : i32, i32
  }
  func.func @transform_9(%arg0: i32) -> (i32, i32) {
    %c0_i32 = arith.constant 0 : i32
    %c0_i32_0 = arith.constant 0 : i32
    %c0_i32_1 = arith.constant 0 : i32
    return %c0_i32, %c0_i32_0 : i32, i32
  }
  func.func @transform_10(%arg0: i32) -> (i32, i32) {
    %c0_i32 = arith.constant 0 : i32
    %c0_i32_0 = arith.constant 0 : i32
    %c0_i32_1 = arith.constant 0 : i32
    return %c0_i32, %c0_i32_0 : i32, i32
  }
  func.func @transform_11(%arg0: i32) -> (i32, i32) {
    %c0_i32 = arith.constant 0 : i32
    %c0_i32_0 = arith.constant 0 : i32
    %c0_i32_1 = arith.constant 0 : i32
    return %c0_i32, %c0_i32_0 : i32, i32
  }
  func.func @transform_12(%arg0: i32) -> (i32, i32) {
    %c0_i32 = arith.constant 0 : i32
    %c0_i32_0 = arith.constant 0 : i32
    %c0_i32_1 = arith.constant 0 : i32
    return %c0_i32, %c0_i32_0 : i32, i32
  }
  func.func @transform_13(%arg0: i32) -> (i32, i32) {
    %c0_i32 = arith.constant 0 : i32
    %c0_i32_0 = arith.constant 0 : i32
    %c0_i32_1 = arith.constant 0 : i32
    return %c0_i32, %c0_i32_0 : i32, i32
  }
  func.func @transform_14(%arg0: i32) -> (i32, i32) {
    %c0_i32 = arith.constant 0 : i32
    %c0_i32_0 = arith.constant 0 : i32
    %c0_i32_1 = arith.constant 0 : i32
    return %c0_i32, %c0_i32_0 : i32, i32
  }
  func.func @transform_15(%arg0: i32) -> (i32, i32) {
    %c0_i32 = arith.constant 0 : i32
    %c0_i32_0 = arith.constant 0 : i32
    %c0_i32_1 = arith.constant 0 : i32
    return %c0_i32, %c0_i32_0 : i32, i32
  }
  func.func @transform_16(%arg0: i32) -> (i32, i32) {
    %c0_i32 = arith.constant 0 : i32
    %c0_i32_0 = arith.constant 0 : i32
    %c0_i32_1 = arith.constant 0 : i32
    return %c0_i32, %c0_i32_0 : i32, i32
  }
  func.func @transform_17(%arg0: i32) -> (i32, i32) {
    %c0_i32 = arith.constant 0 : i32
    %c0_i32_0 = arith.constant 0 : i32
    %c0_i32_1 = arith.constant 0 : i32
    return %c0_i32, %c0_i32_0 : i32, i32
  }
  func.func @transform_18(%arg0: i32) -> (i32, i32) {
    %c0_i32 = arith.constant 0 : i32
    %c0_i32_0 = arith.constant 0 : i32
    %c0_i32_1 = arith.constant 0 : i32
    return %c0_i32, %c0_i32_0 : i32, i32
  }
  func.func @transform_19(%arg0: i32) -> (i32, i32) {
    %c0_i32 = arith.constant 0 : i32
    %c0_i32_0 = arith.constant 0 : i32
    %c0_i32_1 = arith.constant 0 : i32
    return %c0_i32, %c0_i32_0 : i32, i32
  }
  func.func @transform_20(%arg0: i32) -> (i32, i32) {
    %c0_i32 = arith.constant 0 : i32
    %c0_i32_0 = arith.constant 0 : i32
    %c0_i32_1 = arith.constant 0 : i32
    return %c0_i32, %c0_i32_0 : i32, i32
  }
  func.func @transform_21(%arg0: i32) -> (i32, i32) {
    %c0_i32 = arith.constant 0 : i32
    %c0_i32_0 = arith.constant 0 : i32
    %c0_i32_1 = arith.constant 0 : i32
    return %c0_i32, %c0_i32_0 : i32, i32
  }
  func.func @transform_22(%arg0: i32) -> (i32, i32, i32) {
    %c0_i32 = arith.constant 0 : i32
    %c0_i32_0 = arith.constant 0 : i32
    %c0_i32_1 = arith.constant 0 : i32
    return %arg0, %c0_i32, %c0_i32_0 : i32, i32, i32
  }
}

module attributes {stable_mosaic.version = 11 : i64} {
  func.func @_decoder_layer_kernel(%arg0: i32, %arg1: memref<1x8x32xf32, #tpu.memory_space<vmem>>, %arg2: memref<1x6x32xf32, #tpu.memory_space<vmem>>, %arg3: memref<32x96xbf16, #tpu.memory_space<vmem>>, %arg4: memref<1x96xf32, #tpu.memory_space<vmem>>, %arg5: memref<32x32xbf16, #tpu.memory_space<vmem>>, %arg6: memref<1x32xf32, #tpu.memory_space<vmem>>, %arg7: memref<1x32xf32, #tpu.memory_space<vmem>>, %arg8: memref<1x32xf32, #tpu.memory_space<vmem>>, %arg9: memref<32x32xbf16, #tpu.memory_space<vmem>>, %arg10: memref<1x32xf32, #tpu.memory_space<vmem>>, %arg11: memref<32x64xbf16, #tpu.memory_space<vmem>>, %arg12: memref<1x64xf32, #tpu.memory_space<vmem>>, %arg13: memref<32x32xbf16, #tpu.memory_space<vmem>>, %arg14: memref<1x32xf32, #tpu.memory_space<vmem>>, %arg15: memref<1x32xf32, #tpu.memory_space<vmem>>, %arg16: memref<1x32xf32, #tpu.memory_space<vmem>>, %arg17: memref<32x1024xbf16, #tpu.memory_space<vmem>>, %arg18: memref<1x1024xf32, #tpu.memory_space<vmem>>, %arg19: memref<1024x32xbf16, #tpu.memory_space<vmem>>, %arg20: memref<1x32xf32, #tpu.memory_space<vmem>>, %arg21: memref<1x32xf32, #tpu.memory_space<vmem>>, %arg22: memref<1x32xf32, #tpu.memory_space<vmem>>, %arg23: memref<1x8x32xf32, #tpu.memory_space<vmem>>) attributes {dimension_semantics = [#tpu.dimension_semantics<parallel>], iteration_bounds = array<i64: 2>, scalar_prefetch = 0 : i64, scratch_operands = 0 : i64, tpu.core_type = #tpu.core_type<tc>, window_params = [{transform_indices = @transform_0, window_bounds = array<i64: 1, 8, 32>}, {transform_indices = @transform_1, window_bounds = array<i64: 1, 6, 32>}, {pipeline_mode = #tpu.pipeline_mode<synchronous>, transform_indices = @transform_2, window_bounds = array<i64: 32, 96>}, {pipeline_mode = #tpu.pipeline_mode<synchronous>, transform_indices = @transform_3, window_bounds = array<i64: 1, 96>}, {pipeline_mode = #tpu.pipeline_mode<synchronous>, transform_indices = @transform_4, window_bounds = array<i64: 32, 32>}, {pipeline_mode = #tpu.pipeline_mode<synchronous>, transform_indices = @transform_5, window_bounds = array<i64: 1, 32>}, {pipeline_mode = #tpu.pipeline_mode<synchronous>, transform_indices = @transform_6, window_bounds = array<i64: 1, 32>}, {pipeline_mode = #tpu.pipeline_mode<synchronous>, transform_indices = @transform_7, window_bounds = array<i64: 1, 32>}, {pipeline_mode = #tpu.pipeline_mode<synchronous>, transform_indices = @transform_8, window_bounds = array<i64: 32, 32>}, {pipeline_mode = #tpu.pipeline_mode<synchronous>, transform_indices = @transform_9, window_bounds = array<i64: 1, 32>}, {pipeline_mode = #tpu.pipeline_mode<synchronous>, transform_indices = @transform_10, window_bounds = array<i64: 32, 64>}, {pipeline_mode = #tpu.pipeline_mode<synchronous>, transform_indices = @transform_11, window_bounds = array<i64: 1, 64>}, {pipeline_mode = #tpu.pipeline_mode<synchronous>, transform_indices = @transform_12, window_bounds = array<i64: 32, 32>}, {pipeline_mode = #tpu.pipeline_mode<synchronous>, transform_indices = @transform_13, window_bounds = array<i64: 1, 32>}, {pipeline_mode = #tpu.pipeline_mode<synchronous>, transform_indices = @transform_14, window_bounds = array<i64: 1, 32>}, {pipeline_mode = #tpu.pipeline_mode<synchronous>, transform_indices = @transform_15, window_bounds = array<i64: 1, 32>}, {pipeline_mode = #tpu.pipeline_mode<synchronous>, transform_indices = @transform_16, window_bounds = array<i64: 32, 1024>}, {pipeline_mode = #tpu.pipeline_mode<synchronous>, transform_indices = @transform_17, window_bounds = array<i64: 1, 1024>}, {pipeline_mode = #tpu.pipeline_mode<synchronous>, transform_indices = @transform_18, window_bounds = array<i64: 1024, 32>}, {pipeline_mode = #tpu.pipeline_mode<synchronous>, transform_indices = @transform_19, window_bounds = array<i64: 1, 32>}, {pipeline_mode = #tpu.pipeline_mode<synchronous>, transform_indices = @transform_20, window_bounds = array<i64: 1, 32>}, {pipeline_mode = #tpu.pipeline_mode<synchronous>, transform_indices = @transform_21, window_bounds = array<i64: 1, 32>}, {transform_indices = @transform_22, window_bounds = array<i64: 1, 8, 32>}]} {
    %c0 = arith.constant 0 : index
    %c0_0 = arith.constant 0 : index
    %c0_1 = arith.constant 0 : index
    %0 = vector.load %arg1[%c0, %c0_0, %c0_1] : memref<1x8x32xf32, #tpu.memory_space<vmem>>, vector<1x8x32xf32>
    %1 = vector.shape_cast %0 : vector<1x8x32xf32> to vector<8x32xf32>
    %c0_2 = arith.constant 0 : index
    %c0_3 = arith.constant 0 : index
    %c0_4 = arith.constant 0 : index
    %2 = vector.load %arg2[%c0_2, %c0_3, %c0_4] : memref<1x6x32xf32, #tpu.memory_space<vmem>>, vector<1x6x32xf32>
    %3 = vector.shape_cast %2 : vector<1x6x32xf32> to vector<6x32xf32>
    %4 = arith.truncf %1 : vector<8x32xf32> to vector<8x32xbf16>
    %c0_5 = arith.constant 0 : index
    %c0_6 = arith.constant 0 : index
    %5 = vector.load %arg3[%c0_5, %c0_6] : memref<32x96xbf16, #tpu.memory_space<vmem>>, vector<32x96xbf16>
    %cst = arith.constant dense<0.000000e+00> : vector<8x96xf32>
    %6 = tpu.matmul %4, %5, %cst {dimension_numbers = #tpu.dot_dimension_numbers<[1], [0], [0], [1], [0, 0, 1, 1], [], []>} : vector<8x32xbf16>, vector<32x96xbf16>, vector<8x96xf32> -> vector<8x96xf32>
    %c0_7 = arith.constant 0 : index
    %c0_8 = arith.constant 0 : index
    %7 = vector.load %arg4[%c0_7, %c0_8] : memref<1x96xf32, #tpu.memory_space<vmem>>, vector<1x96xf32>
    %8 = vector.broadcast %7 : vector<1x96xf32> to vector<8x96xf32>
    %9 = arith.addf %6, %8 : vector<8x96xf32>
    %10 = vector.extract_strided_slice %9 {offsets = [0, 0], sizes = [8, 32], strides = [1, 1]} : vector<8x96xf32> to vector<8x32xf32>
    %11 = vector.extract_strided_slice %9 {offsets = [0, 32], sizes = [8, 32], strides = [1, 1]} : vector<8x96xf32> to vector<8x32xf32>
    %12 = vector.extract_strided_slice %9 {offsets = [0, 64], sizes = [8, 32], strides = [1, 1]} : vector<8x96xf32> to vector<8x32xf32>
    %c0_9 = arith.constant 0 : index
    %c0_10 = arith.constant 0 : index
    %13 = vector.load %arg5[%c0_9, %c0_10] : memref<32x32xbf16, #tpu.memory_space<vmem>>, vector<32x32xbf16>
    %14 = arith.truncf %10 : vector<8x32xf32> to vector<8x32xbf16>
    %15 = arith.truncf %11 : vector<8x32xf32> to vector<8x32xbf16>
    %16 = arith.truncf %12 : vector<8x32xf32> to vector<8x32xbf16>
    %17 = tpu.iota {dimensions = array<i32: 0>} : vector<8x8xi32>
    %18 = tpu.iota {dimensions = array<i32: 1>} : vector<8x8xi32>
    %19 = arith.cmpi sgt, %18, %17 : vector<8x8xi32>
    %cst_11 = arith.constant 0.000000e+00 : f32
    %20 = vector.broadcast %cst_11 : f32 to vector<8x32xf32>
    %21 = vector.extract_strided_slice %14 {offsets = [0, 0], sizes = [8, 8], strides = [1, 1]} : vector<8x32xbf16> to vector<8x8xbf16>
    %22 = vector.extract_strided_slice %15 {offsets = [0, 0], sizes = [8, 8], strides = [1, 1]} : vector<8x32xbf16> to vector<8x8xbf16>
    %23 = vector.extract_strided_slice %16 {offsets = [0, 0], sizes = [8, 8], strides = [1, 1]} : vector<8x32xbf16> to vector<8x8xbf16>
    %cst_12 = arith.constant dense<0.000000e+00> : vector<8x8xf32>
    %24 = tpu.matmul %21, %22, %cst_12 {dimension_numbers = #tpu.dot_dimension_numbers<[1], [1], [0], [0], [0, 0, 1, 0], [], []>} : vector<8x8xbf16>, vector<8x8xbf16>, vector<8x8xf32> -> vector<8x8xf32>
    %cst_13 = arith.constant 0.353553385 : f32
    %25 = vector.broadcast %cst_13 : f32 to vector<8x8xf32>
    %26 = arith.mulf %24, %25 : vector<8x8xf32>
    %cst_14 = arith.constant -1.000000e+30 : f32
    %27 = vector.broadcast %cst_14 : f32 to vector<8x8xf32>
    %28 = arith.select %19, %27, %26 : vector<8x8xi1>, vector<8x8xf32>
    %cst_15 = arith.constant dense<0xFF800000> : vector<8xf32>
    %29 = vector.multi_reduction <maximumf>, %28, %cst_15 [1] : vector<8x8xf32> to vector<8xf32>
    %30 = vector.shape_cast %29 : vector<8xf32> to vector<8x1xf32>
    %31 = vector.broadcast %30 : vector<8x1xf32> to vector<8x8xf32>
    %32 = arith.subf %28, %31 : vector<8x8xf32>
    %33 = math.exp %32 : vector<8x8xf32>
    %cst_16 = arith.constant dense<0.000000e+00> : vector<8xf32>
    %34 = vector.multi_reduction <add>, %33, %cst_16 [1] : vector<8x8xf32> to vector<8xf32>
    %35 = vector.shape_cast %34 : vector<8xf32> to vector<8x1xf32>
    %36 = tpu.reciprocal %35 {approx = true} : vector<8x1xf32> -> vector<8x1xf32>
    %37 = vector.broadcast %36 : vector<8x1xf32> to vector<8x8xf32>
    %38 = arith.mulf %33, %37 : vector<8x8xf32>
    %39 = arith.truncf %38 : vector<8x8xf32> to vector<8x8xbf16>
    %cst_17 = arith.constant dense<0.000000e+00> : vector<8x8xf32>
    %40 = tpu.matmul %39, %23, %cst_17 {dimension_numbers = #tpu.dot_dimension_numbers<[1], [0], [0], [1], [0, 0, 1, 1], [], []>} : vector<8x8xbf16>, vector<8x8xbf16>, vector<8x8xf32> -> vector<8x8xf32>
    %41 = arith.truncf %40 : vector<8x8xf32> to vector<8x8xbf16>
    %42 = vector.extract_strided_slice %13 {offsets = [0, 0], sizes = [8, 32], strides = [1, 1]} : vector<32x32xbf16> to vector<8x32xbf16>
    %cst_18 = arith.constant dense<0.000000e+00> : vector<8x32xf32>
    %43 = tpu.matmul %41, %42, %cst_18 {dimension_numbers = #tpu.dot_dimension_numbers<[1], [0], [0], [1], [0, 0, 1, 1], [], []>} : vector<8x8xbf16>, vector<8x32xbf16>, vector<8x32xf32> -> vector<8x32xf32>
    %44 = arith.addf %20, %43 : vector<8x32xf32>
    %45 = vector.extract_strided_slice %14 {offsets = [0, 8], sizes = [8, 8], strides = [1, 1]} : vector<8x32xbf16> to vector<8x8xbf16>
    %46 = vector.extract_strided_slice %15 {offsets = [0, 8], sizes = [8, 8], strides = [1, 1]} : vector<8x32xbf16> to vector<8x8xbf16>
    %47 = vector.extract_strided_slice %16 {offsets = [0, 8], sizes = [8, 8], strides = [1, 1]} : vector<8x32xbf16> to vector<8x8xbf16>
    %cst_19 = arith.constant dense<0.000000e+00> : vector<8x8xf32>
    %48 = tpu.matmul %45, %46, %cst_19 {dimension_numbers = #tpu.dot_dimension_numbers<[1], [1], [0], [0], [0, 0, 1, 0], [], []>} : vector<8x8xbf16>, vector<8x8xbf16>, vector<8x8xf32> -> vector<8x8xf32>
    %cst_20 = arith.constant 0.353553385 : f32
    %49 = vector.broadcast %cst_20 : f32 to vector<8x8xf32>
    %50 = arith.mulf %48, %49 : vector<8x8xf32>
    %cst_21 = arith.constant -1.000000e+30 : f32
    %51 = vector.broadcast %cst_21 : f32 to vector<8x8xf32>
    %52 = arith.select %19, %51, %50 : vector<8x8xi1>, vector<8x8xf32>
    %cst_22 = arith.constant dense<0xFF800000> : vector<8xf32>
    %53 = vector.multi_reduction <maximumf>, %52, %cst_22 [1] : vector<8x8xf32> to vector<8xf32>
    %54 = vector.shape_cast %53 : vector<8xf32> to vector<8x1xf32>
    %55 = vector.broadcast %54 : vector<8x1xf32> to vector<8x8xf32>
    %56 = arith.subf %52, %55 : vector<8x8xf32>
    %57 = math.exp %56 : vector<8x8xf32>
    %cst_23 = arith.constant dense<0.000000e+00> : vector<8xf32>
    %58 = vector.multi_reduction <add>, %57, %cst_23 [1] : vector<8x8xf32> to vector<8xf32>
    %59 = vector.shape_cast %58 : vector<8xf32> to vector<8x1xf32>
    %60 = tpu.reciprocal %59 {approx = true} : vector<8x1xf32> -> vector<8x1xf32>
    %61 = vector.broadcast %60 : vector<8x1xf32> to vector<8x8xf32>
    %62 = arith.mulf %57, %61 : vector<8x8xf32>
    %63 = arith.truncf %62 : vector<8x8xf32> to vector<8x8xbf16>
    %cst_24 = arith.constant dense<0.000000e+00> : vector<8x8xf32>
    %64 = tpu.matmul %63, %47, %cst_24 {dimension_numbers = #tpu.dot_dimension_numbers<[1], [0], [0], [1], [0, 0, 1, 1], [], []>} : vector<8x8xbf16>, vector<8x8xbf16>, vector<8x8xf32> -> vector<8x8xf32>
    %65 = arith.truncf %64 : vector<8x8xf32> to vector<8x8xbf16>
    %66 = vector.extract_strided_slice %13 {offsets = [8, 0], sizes = [8, 32], strides = [1, 1]} : vector<32x32xbf16> to vector<8x32xbf16>
    %cst_25 = arith.constant dense<0.000000e+00> : vector<8x32xf32>
    %67 = tpu.matmul %65, %66, %cst_25 {dimension_numbers = #tpu.dot_dimension_numbers<[1], [0], [0], [1], [0, 0, 1, 1], [], []>} : vector<8x8xbf16>, vector<8x32xbf16>, vector<8x32xf32> -> vector<8x32xf32>
    %68 = arith.addf %44, %67 : vector<8x32xf32>
    %69 = vector.extract_strided_slice %14 {offsets = [0, 16], sizes = [8, 8], strides = [1, 1]} : vector<8x32xbf16> to vector<8x8xbf16>
    %70 = vector.extract_strided_slice %15 {offsets = [0, 16], sizes = [8, 8], strides = [1, 1]} : vector<8x32xbf16> to vector<8x8xbf16>
    %71 = vector.extract_strided_slice %16 {offsets = [0, 16], sizes = [8, 8], strides = [1, 1]} : vector<8x32xbf16> to vector<8x8xbf16>
    %cst_26 = arith.constant dense<0.000000e+00> : vector<8x8xf32>
    %72 = tpu.matmul %69, %70, %cst_26 {dimension_numbers = #tpu.dot_dimension_numbers<[1], [1], [0], [0], [0, 0, 1, 0], [], []>} : vector<8x8xbf16>, vector<8x8xbf16>, vector<8x8xf32> -> vector<8x8xf32>
    %cst_27 = arith.constant 0.353553385 : f32
    %73 = vector.broadcast %cst_27 : f32 to vector<8x8xf32>
    %74 = arith.mulf %72, %73 : vector<8x8xf32>
    %cst_28 = arith.constant -1.000000e+30 : f32
    %75 = vector.broadcast %cst_28 : f32 to vector<8x8xf32>
    %76 = arith.select %19, %75, %74 : vector<8x8xi1>, vector<8x8xf32>
    %cst_29 = arith.constant dense<0xFF800000> : vector<8xf32>
    %77 = vector.multi_reduction <maximumf>, %76, %cst_29 [1] : vector<8x8xf32> to vector<8xf32>
    %78 = vector.shape_cast %77 : vector<8xf32> to vector<8x1xf32>
    %79 = vector.broadcast %78 : vector<8x1xf32> to vector<8x8xf32>
    %80 = arith.subf %76, %79 : vector<8x8xf32>
    %81 = math.exp %80 : vector<8x8xf32>
    %cst_30 = arith.constant dense<0.000000e+00> : vector<8xf32>
    %82 = vector.multi_reduction <add>, %81, %cst_30 [1] : vector<8x8xf32> to vector<8xf32>
    %83 = vector.shape_cast %82 : vector<8xf32> to vector<8x1xf32>
    %84 = tpu.reciprocal %83 {approx = true} : vector<8x1xf32> -> vector<8x1xf32>
    %85 = vector.broadcast %84 : vector<8x1xf32> to vector<8x8xf32>
    %86 = arith.mulf %81, %85 : vector<8x8xf32>
    %87 = arith.truncf %86 : vector<8x8xf32> to vector<8x8xbf16>
    %cst_31 = arith.constant dense<0.000000e+00> : vector<8x8xf32>
    %88 = tpu.matmul %87, %71, %cst_31 {dimension_numbers = #tpu.dot_dimension_numbers<[1], [0], [0], [1], [0, 0, 1, 1], [], []>} : vector<8x8xbf16>, vector<8x8xbf16>, vector<8x8xf32> -> vector<8x8xf32>
    %89 = arith.truncf %88 : vector<8x8xf32> to vector<8x8xbf16>
    %90 = vector.extract_strided_slice %13 {offsets = [16, 0], sizes = [8, 32], strides = [1, 1]} : vector<32x32xbf16> to vector<8x32xbf16>
    %cst_32 = arith.constant dense<0.000000e+00> : vector<8x32xf32>
    %91 = tpu.matmul %89, %90, %cst_32 {dimension_numbers = #tpu.dot_dimension_numbers<[1], [0], [0], [1], [0, 0, 1, 1], [], []>} : vector<8x8xbf16>, vector<8x32xbf16>, vector<8x32xf32> -> vector<8x32xf32>
    %92 = arith.addf %68, %91 : vector<8x32xf32>
    %93 = vector.extract_strided_slice %14 {offsets = [0, 24], sizes = [8, 8], strides = [1, 1]} : vector<8x32xbf16> to vector<8x8xbf16>
    %94 = vector.extract_strided_slice %15 {offsets = [0, 24], sizes = [8, 8], strides = [1, 1]} : vector<8x32xbf16> to vector<8x8xbf16>
    %95 = vector.extract_strided_slice %16 {offsets = [0, 24], sizes = [8, 8], strides = [1, 1]} : vector<8x32xbf16> to vector<8x8xbf16>
    %cst_33 = arith.constant dense<0.000000e+00> : vector<8x8xf32>
    %96 = tpu.matmul %93, %94, %cst_33 {dimension_numbers = #tpu.dot_dimension_numbers<[1], [1], [0], [0], [0, 0, 1, 0], [], []>} : vector<8x8xbf16>, vector<8x8xbf16>, vector<8x8xf32> -> vector<8x8xf32>
    %cst_34 = arith.constant 0.353553385 : f32
    %97 = vector.broadcast %cst_34 : f32 to vector<8x8xf32>
    %98 = arith.mulf %96, %97 : vector<8x8xf32>
    %cst_35 = arith.constant -1.000000e+30 : f32
    %99 = vector.broadcast %cst_35 : f32 to vector<8x8xf32>
    %100 = arith.select %19, %99, %98 : vector<8x8xi1>, vector<8x8xf32>
    %cst_36 = arith.constant dense<0xFF800000> : vector<8xf32>
    %101 = vector.multi_reduction <maximumf>, %100, %cst_36 [1] : vector<8x8xf32> to vector<8xf32>
    %102 = vector.shape_cast %101 : vector<8xf32> to vector<8x1xf32>
    %103 = vector.broadcast %102 : vector<8x1xf32> to vector<8x8xf32>
    %104 = arith.subf %100, %103 : vector<8x8xf32>
    %105 = math.exp %104 : vector<8x8xf32>
    %cst_37 = arith.constant dense<0.000000e+00> : vector<8xf32>
    %106 = vector.multi_reduction <add>, %105, %cst_37 [1] : vector<8x8xf32> to vector<8xf32>
    %107 = vector.shape_cast %106 : vector<8xf32> to vector<8x1xf32>
    %108 = tpu.reciprocal %107 {approx = true} : vector<8x1xf32> -> vector<8x1xf32>
    %109 = vector.broadcast %108 : vector<8x1xf32> to vector<8x8xf32>
    %110 = arith.mulf %105, %109 : vector<8x8xf32>
    %111 = arith.truncf %110 : vector<8x8xf32> to vector<8x8xbf16>
    %cst_38 = arith.constant dense<0.000000e+00> : vector<8x8xf32>
    %112 = tpu.matmul %111, %95, %cst_38 {dimension_numbers = #tpu.dot_dimension_numbers<[1], [0], [0], [1], [0, 0, 1, 1], [], []>} : vector<8x8xbf16>, vector<8x8xbf16>, vector<8x8xf32> -> vector<8x8xf32>
    %113 = arith.truncf %112 : vector<8x8xf32> to vector<8x8xbf16>
    %114 = vector.extract_strided_slice %13 {offsets = [24, 0], sizes = [8, 32], strides = [1, 1]} : vector<32x32xbf16> to vector<8x32xbf16>
    %cst_39 = arith.constant dense<0.000000e+00> : vector<8x32xf32>
    %115 = tpu.matmul %113, %114, %cst_39 {dimension_numbers = #tpu.dot_dimension_numbers<[1], [0], [0], [1], [0, 0, 1, 1], [], []>} : vector<8x8xbf16>, vector<8x32xbf16>, vector<8x32xf32> -> vector<8x32xf32>
    %116 = arith.addf %92, %115 : vector<8x32xf32>
    %c0_40 = arith.constant 0 : index
    %c0_41 = arith.constant 0 : index
    %117 = vector.load %arg6[%c0_40, %c0_41] : memref<1x32xf32, #tpu.memory_space<vmem>>, vector<1x32xf32>
    %118 = vector.broadcast %117 : vector<1x32xf32> to vector<8x32xf32>
    %119 = arith.addf %116, %118 : vector<8x32xf32>
    %c0_42 = arith.constant 0 : index
    %c0_43 = arith.constant 0 : index
    %120 = vector.load %arg7[%c0_42, %c0_43] : memref<1x32xf32, #tpu.memory_space<vmem>>, vector<1x32xf32>
    %c0_44 = arith.constant 0 : index
    %c0_45 = arith.constant 0 : index
    %121 = vector.load %arg8[%c0_44, %c0_45] : memref<1x32xf32, #tpu.memory_space<vmem>>, vector<1x32xf32>
    %122 = arith.addf %1, %119 : vector<8x32xf32>
    %cst_46 = arith.constant dense<0.000000e+00> : vector<8xf32>
    %123 = vector.multi_reduction <add>, %122, %cst_46 [1] : vector<8x32xf32> to vector<8xf32>
    %124 = vector.shape_cast %123 : vector<8xf32> to vector<8x1xf32>
    %cst_47 = arith.constant 3.200000e+01 : f32
    %125 = vector.broadcast %cst_47 : f32 to vector<8x1xf32>
    %126 = arith.divf %124, %125 : vector<8x1xf32>
    %127 = vector.broadcast %126 : vector<8x1xf32> to vector<8x32xf32>
    %128 = arith.subf %122, %127 : vector<8x32xf32>
    %129 = arith.mulf %128, %128 : vector<8x32xf32>
    %cst_48 = arith.constant dense<0.000000e+00> : vector<8xf32>
    %130 = vector.multi_reduction <add>, %129, %cst_48 [1] : vector<8x32xf32> to vector<8xf32>
    %131 = vector.shape_cast %130 : vector<8xf32> to vector<8x1xf32>
    %cst_49 = arith.constant 3.200000e+01 : f32
    %132 = vector.broadcast %cst_49 : f32 to vector<8x1xf32>
    %133 = arith.divf %131, %132 : vector<8x1xf32>
    %134 = vector.broadcast %126 : vector<8x1xf32> to vector<8x32xf32>
    %135 = arith.subf %122, %134 : vector<8x32xf32>
    %cst_50 = arith.constant 9.99999974E-6 : f32
    %136 = vector.broadcast %cst_50 : f32 to vector<8x1xf32>
    %137 = arith.addf %133, %136 : vector<8x1xf32>
    %138 = math.rsqrt %137 : vector<8x1xf32>
    %139 = vector.broadcast %138 : vector<8x1xf32> to vector<8x32xf32>
    %140 = arith.mulf %135, %139 : vector<8x32xf32>
    %141 = vector.broadcast %120 : vector<1x32xf32> to vector<8x32xf32>
    %142 = arith.mulf %140, %141 : vector<8x32xf32>
    %143 = vector.broadcast %121 : vector<1x32xf32> to vector<8x32xf32>
    %144 = arith.addf %142, %143 : vector<8x32xf32>
    %145 = arith.truncf %144 : vector<8x32xf32> to vector<8x32xbf16>
    %c0_51 = arith.constant 0 : index
    %c0_52 = arith.constant 0 : index
    %146 = vector.load %arg9[%c0_51, %c0_52] : memref<32x32xbf16, #tpu.memory_space<vmem>>, vector<32x32xbf16>
    %cst_53 = arith.constant dense<0.000000e+00> : vector<8x32xf32>
    %147 = tpu.matmul %145, %146, %cst_53 {dimension_numbers = #tpu.dot_dimension_numbers<[1], [0], [0], [1], [0, 0, 1, 1], [], []>} : vector<8x32xbf16>, vector<32x32xbf16>, vector<8x32xf32> -> vector<8x32xf32>
    %c0_54 = arith.constant 0 : index
    %c0_55 = arith.constant 0 : index
    %148 = vector.load %arg10[%c0_54, %c0_55] : memref<1x32xf32, #tpu.memory_space<vmem>>, vector<1x32xf32>
    %149 = vector.broadcast %148 : vector<1x32xf32> to vector<8x32xf32>
    %150 = arith.addf %147, %149 : vector<8x32xf32>
    %151 = arith.truncf %3 : vector<6x32xf32> to vector<6x32xbf16>
    %c0_56 = arith.constant 0 : index
    %c0_57 = arith.constant 0 : index
    %152 = vector.load %arg11[%c0_56, %c0_57] : memref<32x64xbf16, #tpu.memory_space<vmem>>, vector<32x64xbf16>
    %cst_58 = arith.constant dense<0.000000e+00> : vector<6x64xf32>
    %153 = tpu.matmul %151, %152, %cst_58 {dimension_numbers = #tpu.dot_dimension_numbers<[1], [0], [0], [1], [0, 0, 1, 1], [], []>} : vector<6x32xbf16>, vector<32x64xbf16>, vector<6x64xf32> -> vector<6x64xf32>
    %c0_59 = arith.constant 0 : index
    %c0_60 = arith.constant 0 : index
    %154 = vector.load %arg12[%c0_59, %c0_60] : memref<1x64xf32, #tpu.memory_space<vmem>>, vector<1x64xf32>
    %155 = vector.broadcast %154 : vector<1x64xf32> to vector<6x64xf32>
    %156 = arith.addf %153, %155 : vector<6x64xf32>
    %157 = vector.extract_strided_slice %156 {offsets = [0, 0], sizes = [6, 32], strides = [1, 1]} : vector<6x64xf32> to vector<6x32xf32>
    %158 = vector.extract_strided_slice %156 {offsets = [0, 32], sizes = [6, 32], strides = [1, 1]} : vector<6x64xf32> to vector<6x32xf32>
    %c0_61 = arith.constant 0 : index
    %c0_62 = arith.constant 0 : index
    %159 = vector.load %arg13[%c0_61, %c0_62] : memref<32x32xbf16, #tpu.memory_space<vmem>>, vector<32x32xbf16>
    %160 = arith.truncf %150 : vector<8x32xf32> to vector<8x32xbf16>
    %161 = arith.truncf %157 : vector<6x32xf32> to vector<6x32xbf16>
    %162 = arith.truncf %158 : vector<6x32xf32> to vector<6x32xbf16>
    %cst_63 = arith.constant 0.000000e+00 : f32
    %163 = vector.broadcast %cst_63 : f32 to vector<8x32xf32>
    %164 = vector.extract_strided_slice %160 {offsets = [0, 0], sizes = [8, 8], strides = [1, 1]} : vector<8x32xbf16> to vector<8x8xbf16>
    %165 = vector.extract_strided_slice %161 {offsets = [0, 0], sizes = [6, 8], strides = [1, 1]} : vector<6x32xbf16> to vector<6x8xbf16>
    %166 = vector.extract_strided_slice %162 {offsets = [0, 0], sizes = [6, 8], strides = [1, 1]} : vector<6x32xbf16> to vector<6x8xbf16>
    %cst_64 = arith.constant dense<0.000000e+00> : vector<8x6xf32>
    %167 = tpu.matmul %164, %165, %cst_64 {dimension_numbers = #tpu.dot_dimension_numbers<[1], [1], [0], [0], [0, 0, 1, 0], [], []>} : vector<8x8xbf16>, vector<6x8xbf16>, vector<8x6xf32> -> vector<8x6xf32>
    %cst_65 = arith.constant 0.353553385 : f32
    %168 = vector.broadcast %cst_65 : f32 to vector<8x6xf32>
    %169 = arith.mulf %167, %168 : vector<8x6xf32>
    %cst_66 = arith.constant dense<0xFF800000> : vector<8xf32>
    %170 = vector.multi_reduction <maximumf>, %169, %cst_66 [1] : vector<8x6xf32> to vector<8xf32>
    %171 = vector.shape_cast %170 : vector<8xf32> to vector<8x1xf32>
    %172 = vector.broadcast %171 : vector<8x1xf32> to vector<8x6xf32>
    %173 = arith.subf %169, %172 : vector<8x6xf32>
    %174 = math.exp %173 : vector<8x6xf32>
    %cst_67 = arith.constant dense<0.000000e+00> : vector<8xf32>
    %175 = vector.multi_reduction <add>, %174, %cst_67 [1] : vector<8x6xf32> to vector<8xf32>
    %176 = vector.shape_cast %175 : vector<8xf32> to vector<8x1xf32>
    %177 = tpu.reciprocal %176 {approx = true} : vector<8x1xf32> -> vector<8x1xf32>
    %178 = vector.broadcast %177 : vector<8x1xf32> to vector<8x6xf32>
    %179 = arith.mulf %174, %178 : vector<8x6xf32>
    %180 = arith.truncf %179 : vector<8x6xf32> to vector<8x6xbf16>
    %cst_68 = arith.constant dense<0.000000e+00> : vector<8x8xf32>
    %181 = tpu.matmul %180, %166, %cst_68 {dimension_numbers = #tpu.dot_dimension_numbers<[1], [0], [0], [1], [0, 0, 1, 1], [], []>} : vector<8x6xbf16>, vector<6x8xbf16>, vector<8x8xf32> -> vector<8x8xf32>
    %182 = arith.truncf %181 : vector<8x8xf32> to vector<8x8xbf16>
    %183 = vector.extract_strided_slice %159 {offsets = [0, 0], sizes = [8, 32], strides = [1, 1]} : vector<32x32xbf16> to vector<8x32xbf16>
    %cst_69 = arith.constant dense<0.000000e+00> : vector<8x32xf32>
    %184 = tpu.matmul %182, %183, %cst_69 {dimension_numbers = #tpu.dot_dimension_numbers<[1], [0], [0], [1], [0, 0, 1, 1], [], []>} : vector<8x8xbf16>, vector<8x32xbf16>, vector<8x32xf32> -> vector<8x32xf32>
    %185 = arith.addf %163, %184 : vector<8x32xf32>
    %186 = vector.extract_strided_slice %160 {offsets = [0, 8], sizes = [8, 8], strides = [1, 1]} : vector<8x32xbf16> to vector<8x8xbf16>
    %187 = vector.extract_strided_slice %161 {offsets = [0, 8], sizes = [6, 8], strides = [1, 1]} : vector<6x32xbf16> to vector<6x8xbf16>
    %188 = vector.extract_strided_slice %162 {offsets = [0, 8], sizes = [6, 8], strides = [1, 1]} : vector<6x32xbf16> to vector<6x8xbf16>
    %cst_70 = arith.constant dense<0.000000e+00> : vector<8x6xf32>
    %189 = tpu.matmul %186, %187, %cst_70 {dimension_numbers = #tpu.dot_dimension_numbers<[1], [1], [0], [0], [0, 0, 1, 0], [], []>} : vector<8x8xbf16>, vector<6x8xbf16>, vector<8x6xf32> -> vector<8x6xf32>
    %cst_71 = arith.constant 0.353553385 : f32
    %190 = vector.broadcast %cst_71 : f32 to vector<8x6xf32>
    %191 = arith.mulf %189, %190 : vector<8x6xf32>
    %cst_72 = arith.constant dense<0xFF800000> : vector<8xf32>
    %192 = vector.multi_reduction <maximumf>, %191, %cst_72 [1] : vector<8x6xf32> to vector<8xf32>
    %193 = vector.shape_cast %192 : vector<8xf32> to vector<8x1xf32>
    %194 = vector.broadcast %193 : vector<8x1xf32> to vector<8x6xf32>
    %195 = arith.subf %191, %194 : vector<8x6xf32>
    %196 = math.exp %195 : vector<8x6xf32>
    %cst_73 = arith.constant dense<0.000000e+00> : vector<8xf32>
    %197 = vector.multi_reduction <add>, %196, %cst_73 [1] : vector<8x6xf32> to vector<8xf32>
    %198 = vector.shape_cast %197 : vector<8xf32> to vector<8x1xf32>
    %199 = tpu.reciprocal %198 {approx = true} : vector<8x1xf32> -> vector<8x1xf32>
    %200 = vector.broadcast %199 : vector<8x1xf32> to vector<8x6xf32>
    %201 = arith.mulf %196, %200 : vector<8x6xf32>
    %202 = arith.truncf %201 : vector<8x6xf32> to vector<8x6xbf16>
    %cst_74 = arith.constant dense<0.000000e+00> : vector<8x8xf32>
    %203 = tpu.matmul %202, %188, %cst_74 {dimension_numbers = #tpu.dot_dimension_numbers<[1], [0], [0], [1], [0, 0, 1, 1], [], []>} : vector<8x6xbf16>, vector<6x8xbf16>, vector<8x8xf32> -> vector<8x8xf32>
    %204 = arith.truncf %203 : vector<8x8xf32> to vector<8x8xbf16>
    %205 = vector.extract_strided_slice %159 {offsets = [8, 0], sizes = [8, 32], strides = [1, 1]} : vector<32x32xbf16> to vector<8x32xbf16>
    %cst_75 = arith.constant dense<0.000000e+00> : vector<8x32xf32>
    %206 = tpu.matmul %204, %205, %cst_75 {dimension_numbers = #tpu.dot_dimension_numbers<[1], [0], [0], [1], [0, 0, 1, 1], [], []>} : vector<8x8xbf16>, vector<8x32xbf16>, vector<8x32xf32> -> vector<8x32xf32>
    %207 = arith.addf %185, %206 : vector<8x32xf32>
    %208 = vector.extract_strided_slice %160 {offsets = [0, 16], sizes = [8, 8], strides = [1, 1]} : vector<8x32xbf16> to vector<8x8xbf16>
    %209 = vector.extract_strided_slice %161 {offsets = [0, 16], sizes = [6, 8], strides = [1, 1]} : vector<6x32xbf16> to vector<6x8xbf16>
    %210 = vector.extract_strided_slice %162 {offsets = [0, 16], sizes = [6, 8], strides = [1, 1]} : vector<6x32xbf16> to vector<6x8xbf16>
    %cst_76 = arith.constant dense<0.000000e+00> : vector<8x6xf32>
    %211 = tpu.matmul %208, %209, %cst_76 {dimension_numbers = #tpu.dot_dimension_numbers<[1], [1], [0], [0], [0, 0, 1, 0], [], []>} : vector<8x8xbf16>, vector<6x8xbf16>, vector<8x6xf32> -> vector<8x6xf32>
    %cst_77 = arith.constant 0.353553385 : f32
    %212 = vector.broadcast %cst_77 : f32 to vector<8x6xf32>
    %213 = arith.mulf %211, %212 : vector<8x6xf32>
    %cst_78 = arith.constant dense<0xFF800000> : vector<8xf32>
    %214 = vector.multi_reduction <maximumf>, %213, %cst_78 [1] : vector<8x6xf32> to vector<8xf32>
    %215 = vector.shape_cast %214 : vector<8xf32> to vector<8x1xf32>
    %216 = vector.broadcast %215 : vector<8x1xf32> to vector<8x6xf32>
    %217 = arith.subf %213, %216 : vector<8x6xf32>
    %218 = math.exp %217 : vector<8x6xf32>
    %cst_79 = arith.constant dense<0.000000e+00> : vector<8xf32>
    %219 = vector.multi_reduction <add>, %218, %cst_79 [1] : vector<8x6xf32> to vector<8xf32>
    %220 = vector.shape_cast %219 : vector<8xf32> to vector<8x1xf32>
    %221 = tpu.reciprocal %220 {approx = true} : vector<8x1xf32> -> vector<8x1xf32>
    %222 = vector.broadcast %221 : vector<8x1xf32> to vector<8x6xf32>
    %223 = arith.mulf %218, %222 : vector<8x6xf32>
    %224 = arith.truncf %223 : vector<8x6xf32> to vector<8x6xbf16>
    %cst_80 = arith.constant dense<0.000000e+00> : vector<8x8xf32>
    %225 = tpu.matmul %224, %210, %cst_80 {dimension_numbers = #tpu.dot_dimension_numbers<[1], [0], [0], [1], [0, 0, 1, 1], [], []>} : vector<8x6xbf16>, vector<6x8xbf16>, vector<8x8xf32> -> vector<8x8xf32>
    %226 = arith.truncf %225 : vector<8x8xf32> to vector<8x8xbf16>
    %227 = vector.extract_strided_slice %159 {offsets = [16, 0], sizes = [8, 32], strides = [1, 1]} : vector<32x32xbf16> to vector<8x32xbf16>
    %cst_81 = arith.constant dense<0.000000e+00> : vector<8x32xf32>
    %228 = tpu.matmul %226, %227, %cst_81 {dimension_numbers = #tpu.dot_dimension_numbers<[1], [0], [0], [1], [0, 0, 1, 1], [], []>} : vector<8x8xbf16>, vector<8x32xbf16>, vector<8x32xf32> -> vector<8x32xf32>
    %229 = arith.addf %207, %228 : vector<8x32xf32>
    %230 = vector.extract_strided_slice %160 {offsets = [0, 24], sizes = [8, 8], strides = [1, 1]} : vector<8x32xbf16> to vector<8x8xbf16>
    %231 = vector.extract_strided_slice %161 {offsets = [0, 24], sizes = [6, 8], strides = [1, 1]} : vector<6x32xbf16> to vector<6x8xbf16>
    %232 = vector.extract_strided_slice %162 {offsets = [0, 24], sizes = [6, 8], strides = [1, 1]} : vector<6x32xbf16> to vector<6x8xbf16>
    %cst_82 = arith.constant dense<0.000000e+00> : vector<8x6xf32>
    %233 = tpu.matmul %230, %231, %cst_82 {dimension_numbers = #tpu.dot_dimension_numbers<[1], [1], [0], [0], [0, 0, 1, 0], [], []>} : vector<8x8xbf16>, vector<6x8xbf16>, vector<8x6xf32> -> vector<8x6xf32>
    %cst_83 = arith.constant 0.353553385 : f32
    %234 = vector.broadcast %cst_83 : f32 to vector<8x6xf32>
    %235 = arith.mulf %233, %234 : vector<8x6xf32>
    %cst_84 = arith.constant dense<0xFF800000> : vector<8xf32>
    %236 = vector.multi_reduction <maximumf>, %235, %cst_84 [1] : vector<8x6xf32> to vector<8xf32>
    %237 = vector.shape_cast %236 : vector<8xf32> to vector<8x1xf32>
    %238 = vector.broadcast %237 : vector<8x1xf32> to vector<8x6xf32>
    %239 = arith.subf %235, %238 : vector<8x6xf32>
    %240 = math.exp %239 : vector<8x6xf32>
    %cst_85 = arith.constant dense<0.000000e+00> : vector<8xf32>
    %241 = vector.multi_reduction <add>, %240, %cst_85 [1] : vector<8x6xf32> to vector<8xf32>
    %242 = vector.shape_cast %241 : vector<8xf32> to vector<8x1xf32>
    %243 = tpu.reciprocal %242 {approx = true} : vector<8x1xf32> -> vector<8x1xf32>
    %244 = vector.broadcast %243 : vector<8x1xf32> to vector<8x6xf32>
    %245 = arith.mulf %240, %244 : vector<8x6xf32>
    %246 = arith.truncf %245 : vector<8x6xf32> to vector<8x6xbf16>
    %cst_86 = arith.constant dense<0.000000e+00> : vector<8x8xf32>
    %247 = tpu.matmul %246, %232, %cst_86 {dimension_numbers = #tpu.dot_dimension_numbers<[1], [0], [0], [1], [0, 0, 1, 1], [], []>} : vector<8x6xbf16>, vector<6x8xbf16>, vector<8x8xf32> -> vector<8x8xf32>
    %248 = arith.truncf %247 : vector<8x8xf32> to vector<8x8xbf16>
    %249 = vector.extract_strided_slice %159 {offsets = [24, 0], sizes = [8, 32], strides = [1, 1]} : vector<32x32xbf16> to vector<8x32xbf16>
    %cst_87 = arith.constant dense<0.000000e+00> : vector<8x32xf32>
    %250 = tpu.matmul %248, %249, %cst_87 {dimension_numbers = #tpu.dot_dimension_numbers<[1], [0], [0], [1], [0, 0, 1, 1], [], []>} : vector<8x8xbf16>, vector<8x32xbf16>, vector<8x32xf32> -> vector<8x32xf32>
    %251 = arith.addf %229, %250 : vector<8x32xf32>
    %c0_88 = arith.constant 0 : index
    %c0_89 = arith.constant 0 : index
    %252 = vector.load %arg14[%c0_88, %c0_89] : memref<1x32xf32, #tpu.memory_space<vmem>>, vector<1x32xf32>
    %253 = vector.broadcast %252 : vector<1x32xf32> to vector<8x32xf32>
    %254 = arith.addf %251, %253 : vector<8x32xf32>
    %c0_90 = arith.constant 0 : index
    %c0_91 = arith.constant 0 : index
    %255 = vector.load %arg15[%c0_90, %c0_91] : memref<1x32xf32, #tpu.memory_space<vmem>>, vector<1x32xf32>
    %c0_92 = arith.constant 0 : index
    %c0_93 = arith.constant 0 : index
    %256 = vector.load %arg16[%c0_92, %c0_93] : memref<1x32xf32, #tpu.memory_space<vmem>>, vector<1x32xf32>
    %257 = arith.addf %144, %254 : vector<8x32xf32>
    %cst_94 = arith.constant dense<0.000000e+00> : vector<8xf32>
    %258 = vector.multi_reduction <add>, %257, %cst_94 [1] : vector<8x32xf32> to vector<8xf32>
    %259 = vector.shape_cast %258 : vector<8xf32> to vector<8x1xf32>
    %cst_95 = arith.constant 3.200000e+01 : f32
    %260 = vector.broadcast %cst_95 : f32 to vector<8x1xf32>
    %261 = arith.divf %259, %260 : vector<8x1xf32>
    %262 = vector.broadcast %261 : vector<8x1xf32> to vector<8x32xf32>
    %263 = arith.subf %257, %262 : vector<8x32xf32>
    %264 = arith.mulf %263, %263 : vector<8x32xf32>
    %cst_96 = arith.constant dense<0.000000e+00> : vector<8xf32>
    %265 = vector.multi_reduction <add>, %264, %cst_96 [1] : vector<8x32xf32> to vector<8xf32>
    %266 = vector.shape_cast %265 : vector<8xf32> to vector<8x1xf32>
    %cst_97 = arith.constant 3.200000e+01 : f32
    %267 = vector.broadcast %cst_97 : f32 to vector<8x1xf32>
    %268 = arith.divf %266, %267 : vector<8x1xf32>
    %269 = vector.broadcast %261 : vector<8x1xf32> to vector<8x32xf32>
    %270 = arith.subf %257, %269 : vector<8x32xf32>
    %cst_98 = arith.constant 9.99999974E-6 : f32
    %271 = vector.broadcast %cst_98 : f32 to vector<8x1xf32>
    %272 = arith.addf %268, %271 : vector<8x1xf32>
    %273 = math.rsqrt %272 : vector<8x1xf32>
    %274 = vector.broadcast %273 : vector<8x1xf32> to vector<8x32xf32>
    %275 = arith.mulf %270, %274 : vector<8x32xf32>
    %276 = vector.broadcast %255 : vector<1x32xf32> to vector<8x32xf32>
    %277 = arith.mulf %275, %276 : vector<8x32xf32>
    %278 = vector.broadcast %256 : vector<1x32xf32> to vector<8x32xf32>
    %279 = arith.addf %277, %278 : vector<8x32xf32>
    %280 = arith.truncf %279 : vector<8x32xf32> to vector<8x32xbf16>
    %c0_99 = arith.constant 0 : index
    %c0_100 = arith.constant 0 : index
    %281 = vector.load %arg17[%c0_99, %c0_100] : memref<32x1024xbf16, #tpu.memory_space<vmem>>, vector<32x1024xbf16>
    %cst_101 = arith.constant dense<0.000000e+00> : vector<8x1024xf32>
    %282 = tpu.matmul %280, %281, %cst_101 {dimension_numbers = #tpu.dot_dimension_numbers<[1], [0], [0], [1], [0, 0, 1, 1], [], []>} : vector<8x32xbf16>, vector<32x1024xbf16>, vector<8x1024xf32> -> vector<8x1024xf32>
    %c0_102 = arith.constant 0 : index
    %c0_103 = arith.constant 0 : index
    %283 = vector.load %arg18[%c0_102, %c0_103] : memref<1x1024xf32, #tpu.memory_space<vmem>>, vector<1x1024xf32>
    %284 = vector.broadcast %283 : vector<1x1024xf32> to vector<8x1024xf32>
    %285 = arith.addf %282, %284 : vector<8x1024xf32>
    %cst_104 = arith.constant 0.000000e+00 : f32
    %286 = vector.broadcast %cst_104 : f32 to vector<8x1024xf32>
    %287 = arith.maximumf %285, %286 : vector<8x1024xf32>
    %288 = arith.truncf %287 : vector<8x1024xf32> to vector<8x1024xbf16>
    %c0_105 = arith.constant 0 : index
    %c0_106 = arith.constant 0 : index
    %289 = vector.load %arg19[%c0_105, %c0_106] : memref<1024x32xbf16, #tpu.memory_space<vmem>>, vector<1024x32xbf16>
    %cst_107 = arith.constant dense<0.000000e+00> : vector<8x32xf32>
    %290 = tpu.matmul %288, %289, %cst_107 {dimension_numbers = #tpu.dot_dimension_numbers<[1], [0], [0], [1], [0, 0, 1, 1], [], []>} : vector<8x1024xbf16>, vector<1024x32xbf16>, vector<8x32xf32> -> vector<8x32xf32>
    %c0_108 = arith.constant 0 : index
    %c0_109 = arith.constant 0 : index
    %291 = vector.load %arg20[%c0_108, %c0_109] : memref<1x32xf32, #tpu.memory_space<vmem>>, vector<1x32xf32>
    %292 = vector.broadcast %291 : vector<1x32xf32> to vector<8x32xf32>
    %293 = arith.addf %290, %292 : vector<8x32xf32>
    %c0_110 = arith.constant 0 : index
    %c0_111 = arith.constant 0 : index
    %294 = vector.load %arg21[%c0_110, %c0_111] : memref<1x32xf32, #tpu.memory_space<vmem>>, vector<1x32xf32>
    %c0_112 = arith.constant 0 : index
    %c0_113 = arith.constant 0 : index
    %295 = vector.load %arg22[%c0_112, %c0_113] : memref<1x32xf32, #tpu.memory_space<vmem>>, vector<1x32xf32>
    %296 = arith.addf %279, %293 : vector<8x32xf32>
    %cst_114 = arith.constant dense<0.000000e+00> : vector<8xf32>
    %297 = vector.multi_reduction <add>, %296, %cst_114 [1] : vector<8x32xf32> to vector<8xf32>
    %298 = vector.shape_cast %297 : vector<8xf32> to vector<8x1xf32>
    %cst_115 = arith.constant 3.200000e+01 : f32
    %299 = vector.broadcast %cst_115 : f32 to vector<8x1xf32>
    %300 = arith.divf %298, %299 : vector<8x1xf32>
    %301 = vector.broadcast %300 : vector<8x1xf32> to vector<8x32xf32>
    %302 = arith.subf %296, %301 : vector<8x32xf32>
    %303 = arith.mulf %302, %302 : vector<8x32xf32>
    %cst_116 = arith.constant dense<0.000000e+00> : vector<8xf32>
    %304 = vector.multi_reduction <add>, %303, %cst_116 [1] : vector<8x32xf32> to vector<8xf32>
    %305 = vector.shape_cast %304 : vector<8xf32> to vector<8x1xf32>
    %cst_117 = arith.constant 3.200000e+01 : f32
    %306 = vector.broadcast %cst_117 : f32 to vector<8x1xf32>
    %307 = arith.divf %305, %306 : vector<8x1xf32>
    %308 = vector.broadcast %300 : vector<8x1xf32> to vector<8x32xf32>
    %309 = arith.subf %296, %308 : vector<8x32xf32>
    %cst_118 = arith.constant 9.99999974E-6 : f32
    %310 = vector.broadcast %cst_118 : f32 to vector<8x1xf32>
    %311 = arith.addf %307, %310 : vector<8x1xf32>
    %312 = math.rsqrt %311 : vector<8x1xf32>
    %313 = vector.broadcast %312 : vector<8x1xf32> to vector<8x32xf32>
    %314 = arith.mulf %309, %313 : vector<8x32xf32>
    %315 = vector.broadcast %294 : vector<1x32xf32> to vector<8x32xf32>
    %316 = arith.mulf %314, %315 : vector<8x32xf32>
    %317 = vector.broadcast %295 : vector<1x32xf32> to vector<8x32xf32>
    %318 = arith.addf %316, %317 : vector<8x32xf32>
    %c0_119 = arith.constant 0 : index
    %c0_120 = arith.constant 0 : index
    %c0_121 = arith.constant 0 : index
    %319 = vector.load %arg23[%c0_119, %c0_120, %c0_121] : memref<1x8x32xf32, #tpu.memory_space<vmem>>, vector<1x8x32xf32>
    %320 = vector.shape_cast %319 : vector<1x8x32xf32> to vector<8x32xf32>
    %321 = vector.shape_cast %318 : vector<8x32xf32> to vector<1x8x32xf32>
    tpu.vector_store %arg23[%c0_119, %c0_120, %c0_121], %321 {strides = array<i32>} : memref<1x8x32xf32, #tpu.memory_space<vmem>>, vector<1x8x32xf32>,
    return
  }
  func.func @transform_0(%arg0: i32) -> (i32, i32, i32) {
    %c0_i32 = arith.constant 0 : i32
    %c0_i32_0 = arith.constant 0 : i32
    %c0_i32_1 = arith.constant 0 : i32
    return %arg0, %c0_i32, %c0_i32_0 : i32, i32, i32
  }
  func.func @transform_1(%arg0: i32) -> (i32, i32, i32) {
    %c0_i32 = arith.constant 0 : i32
    %c0_i32_0 = arith.constant 0 : i32
    %c0_i32_1 = arith.constant 0 : i32
    return %arg0, %c0_i32, %c0_i32_0 : i32, i32, i32
  }
  func.func @transform_2(%arg0: i32) -> (i32, i32) {
    %c0_i32 = arith.constant 0 : i32
    %c0_i32_0 = arith.constant 0 : i32
    %c0_i32_1 = arith.constant 0 : i32
    return %c0_i32, %c0_i32_0 : i32, i32
  }
  func.func @transform_3(%arg0: i32) -> (i32, i32) {
    %c0_i32 = arith.constant 0 : i32
    %c0_i32_0 = arith.constant 0 : i32
    %c0_i32_1 = arith.constant 0 : i32
    return %c0_i32, %c0_i32_0 : i32, i32
  }
  func.func @transform_4(%arg0: i32) -> (i32, i32) {
    %c0_i32 = arith.constant 0 : i32
    %c0_i32_0 = arith.constant 0 : i32
    %c0_i32_1 = arith.constant 0 : i32
    return %c0_i32, %c0_i32_0 : i32, i32
  }
  func.func @transform_5(%arg0: i32) -> (i32, i32) {
    %c0_i32 = arith.constant 0 : i32
    %c0_i32_0 = arith.constant 0 : i32
    %c0_i32_1 = arith.constant 0 : i32
    return %c0_i32, %c0_i32_0 : i32, i32
  }
  func.func @transform_6(%arg0: i32) -> (i32, i32) {
    %c0_i32 = arith.constant 0 : i32
    %c0_i32_0 = arith.constant 0 : i32
    %c0_i32_1 = arith.constant 0 : i32
    return %c0_i32, %c0_i32_0 : i32, i32
  }
  func.func @transform_7(%arg0: i32) -> (i32, i32) {
    %c0_i32 = arith.constant 0 : i32
    %c0_i32_0 = arith.constant 0 : i32
    %c0_i32_1 = arith.constant 0 : i32
    return %c0_i32, %c0_i32_0 : i32, i32
  }
  func.func @transform_8(%arg0: i32) -> (i32, i32) {
    %c0_i32 = arith.constant 0 : i32
    %c0_i32_0 = arith.constant 0 : i32
    %c0_i32_1 = arith.constant 0 : i32
    return %c0_i32, %c0_i32_0 : i32, i32
  }
  func.func @transform_9(%arg0: i32) -> (i32, i32) {
    %c0_i32 = arith.constant 0 : i32
    %c0_i32_0 = arith.constant 0 : i32
    %c0_i32_1 = arith.constant 0 : i32
    return %c0_i32, %c0_i32_0 : i32, i32
  }
  func.func @transform_10(%arg0: i32) -> (i32, i32) {
    %c0_i32 = arith.constant 0 : i32
    %c0_i32_0 = arith.constant 0 : i32
    %c0_i32_1 = arith.constant 0 : i32
    return %c0_i32, %c0_i32_0 : i32, i32
  }
  func.func @transform_11(%arg0: i32) -> (i32, i32) {
    %c0_i32 = arith.constant 0 : i32
    %c0_i32_0 = arith.constant 0 : i32
    %c0_i32_1 = arith.constant 0 : i32
    return %c0_i32, %c0_i32_0 : i32, i32
  }
  func.func @transform_12(%arg0: i32) -> (i32, i32) {
    %c0_i32 = arith.constant 0 : i32
    %c0_i32_0 = arith.constant 0 : i32
    %c0_i32_1 = arith.constant 0 : i32
    return %c0_i32, %c0_i32_0 : i32, i32
  }
  func.func @transform_13(%arg0: i32) -> (i32, i32) {
    %c0_i32 = arith.constant 0 : i32
    %c0_i32_0 = arith.constant 0 : i32
    %c0_i32_1 = arith.constant 0 : i32
    return %c0_i32, %c0_i32_0 : i32, i32
  }
  func.func @transform_14(%arg0: i32) -> (i32, i32) {
    %c0_i32 = arith.constant 0 : i32
    %c0_i32_0 = arith.constant 0 : i32
    %c0_i32_1 = arith.constant 0 : i32
    return %c0_i32, %c0_i32_0 : i32, i32
  }
  func.func @transform_15(%arg0: i32) -> (i32, i32) {
    %c0_i32 = arith.constant 0 : i32
    %c0_i32_0 = arith.constant 0 : i32
    %c0_i32_1 = arith.constant 0 : i32
    return %c0_i32, %c0_i32_0 : i32, i32
  }
  func.func @transform_16(%arg0: i32) -> (i32, i32) {
    %c0_i32 = arith.constant 0 : i32
    %c0_i32_0 = arith.constant 0 : i32
    %c0_i32_1 = arith.constant 0 : i32
    return %c0_i32, %c0_i32_0 : i32, i32
  }
  func.func @transform_17(%arg0: i32) -> (i32, i32) {
    %c0_i32 = arith.constant 0 : i32
    %c0_i32_0 = arith.constant 0 : i32
    %c0_i32_1 = arith.constant 0 : i32
    return %c0_i32, %c0_i32_0 : i32, i32
  }
  func.func @transform_18(%arg0: i32) -> (i32, i32) {
    %c0_i32 = arith.constant 0 : i32
    %c0_i32_0 = arith.constant 0 : i32
    %c0_i32_1 = arith.constant 0 : i32
    return %c0_i32, %c0_i32_0 : i32, i32
  }
  func.func @transform_19(%arg0: i32) -> (i32, i32) {
    %c0_i32 = arith.constant 0 : i32
    %c0_i32_0 = arith.constant 0 : i32
    %c0_i32_1 = arith.constant 0 : i32
    return %c0_i32, %c0_i32_0 : i32, i32
  }
  func.func @transform_20(%arg0: i32) -> (i32, i32) {
    %c0_i32 = arith.constant 0 : i32
    %c0_i32_0 = arith.constant 0 : i32
    %c0_i32_1 = arith.constant 0 : i32
    return %c0_i32, %c0_i32_0 : i32, i32
  }
  func.func @transform_21(%arg0: i32) -> (i32, i32) {
    %c0_i32 = arith.constant 0 : i32
    %c0_i32_0 = arith.constant 0 : i32
    %c0_i32_1 = arith.constant 0 : i32
    return %c0_i32, %c0_i32_0 : i32, i32
  }
  func.func @transform_22(%arg0: i32) -> (i32, i32, i32) {
    %c0_i32 = arith.constant 0 : i32
    %c0_i32_0 = arith.constant 0 : i32
    %c0_i32_1 = arith.constant 0 : i32
    return %arg0, %c0_i32, %c0_i32_0 : i32, i32, i32
  }
}

module attributes {stable_mosaic.version = 11 : i64} {
  func.func @_out_proj_kernel(%arg0: i32, %arg1: i32, %arg2: memref<1x8x32xf32, #tpu.memory_space<vmem>>, %arg3: memref<32x128xbf16, #tpu.memory_space<vmem>>, %arg4: memref<1x128xf32, #tpu.memory_space<vmem>>, %arg5: memref<1x8x128xf32, #tpu.memory_space<vmem>>) attributes {dimension_semantics = [#tpu.dimension_semantics<parallel>, #tpu.dimension_semantics<parallel>], iteration_bounds = array<i64: 2, 1>, scalar_prefetch = 0 : i64, scratch_operands = 0 : i64, tpu.core_type = #tpu.core_type<tc>, window_params = [{transform_indices = @transform_0, window_bounds = array<i64: 1, 8, 32>}, {transform_indices = @transform_1, window_bounds = array<i64: 32, 128>}, {transform_indices = @transform_2, window_bounds = array<i64: 1, 128>}, {transform_indices = @transform_3, window_bounds = array<i64: 1, 8, 128>}]} {
    %c0 = arith.constant 0 : index
    %c0_0 = arith.constant 0 : index
    %c0_1 = arith.constant 0 : index
    %0 = vector.load %arg2[%c0, %c0_0, %c0_1] : memref<1x8x32xf32, #tpu.memory_space<vmem>>, vector<1x8x32xf32>
    %1 = vector.shape_cast %0 : vector<1x8x32xf32> to vector<8x32xf32>
    %2 = arith.truncf %1 : vector<8x32xf32> to vector<8x32xbf16>
    %c0_2 = arith.constant 0 : index
    %c0_3 = arith.constant 0 : index
    %3 = vector.load %arg3[%c0_2, %c0_3] : memref<32x128xbf16, #tpu.memory_space<vmem>>, vector<32x128xbf16>
    %cst = arith.constant dense<0.000000e+00> : vector<8x128xf32>
    %4 = tpu.matmul %2, %3, %cst {dimension_numbers = #tpu.dot_dimension_numbers<[1], [0], [0], [1], [0, 0, 1, 1], [], []>} : vector<8x32xbf16>, vector<32x128xbf16>, vector<8x128xf32> -> vector<8x128xf32>
    %c0_4 = arith.constant 0 : index
    %c0_5 = arith.constant 0 : index
    %5 = vector.load %arg4[%c0_4, %c0_5] : memref<1x128xf32, #tpu.memory_space<vmem>>, vector<1x128xf32>
    %6 = vector.broadcast %5 : vector<1x128xf32> to vector<8x128xf32>
    %7 = arith.addf %4, %6 : vector<8x128xf32>
    %c0_6 = arith.constant 0 : index
    %c0_7 = arith.constant 0 : index
    %c0_8 = arith.constant 0 : index
    %8 = vector.load %arg5[%c0_6, %c0_7, %c0_8] : memref<1x8x128xf32, #tpu.memory_space<vmem>>, vector<1x8x128xf32>
    %9 = vector.shape_cast %8 : vector<1x8x128xf32> to vector<8x128xf32>
    %10 = vector.shape_cast %7 : vector<8x128xf32> to vector<1x8x128xf32>
    tpu.vector_store %arg5[%c0_6, %c0_7, %c0_8], %10 {strides = array<i32>} : memref<1x8x128xf32, #tpu.memory_space<vmem>>, vector<1x8x128xf32>,
    return
  }
  func.func @transform_0(%arg0: i32, %arg1: i32) -> (i32, i32, i32) {
    %c0_i32 = arith.constant 0 : i32
    %c0_i32_0 = arith.constant 0 : i32
    %c0_i32_1 = arith.constant 0 : i32
    return %arg0, %c0_i32, %c0_i32_0 : i32, i32, i32
  }
  func.func @transform_1(%arg0: i32, %arg1: i32) -> (i32, i32) {
    %c0_i32 = arith.constant 0 : i32
    %c0_i32_0 = arith.constant 0 : i32
    return %c0_i32, %arg1 : i32, i32
  }
  func.func @transform_2(%arg0: i32, %arg1: i32) -> (i32, i32) {
    %c0_i32 = arith.constant 0 : i32
    %c0_i32_0 = arith.constant 0 : i32
    return %c0_i32, %arg1 : i32, i32
  }
  func.func @transform_3(%arg0: i32, %arg1: i32) -> (i32, i32, i32) {
    %c0_i32 = arith.constant 0 : i32
    %c0_i32_0 = arith.constant 0 : i32
    return %arg0, %c0_i32, %arg1 : i32, i32, i32
  }
}

</mosaic_0001>

<bundles_post_ra>
// kernel: audio_decoder_forward.5
= control target key start
LH: loop header
LB: loop body
LE: loop exit
PB: predicated region body
PF: predicated region fallthrough
CT: control target
= control target key end

     0   :  { %8 = vsyncpa [#allocation3], 0  ;;  %s700_s0 = inlined_call_operand.vmem [shape: f32[2,8,32], index: 0, kind: input, shape index: {}]   ;;  %s701_s1 = inlined_call_operand.vmem [shape: bf16[32,128], index: 1, kind: input, shape index: {}]   ;;  %s702_s2 = inlined_call_operand.vmem [shape: f32[1,128], index: 2, kind: input, shape index: {}]   ;;  %s703_s3 = inlined_call_operand.hbm [shape: f32[2,8,128], index: 3, kind: output, shape index: {}]  }
   0x1   :  { %10 = vsyncpa [#allocation3 + $0x1], 0  ;;  %s580_s12 = smov 0   ;;  %s582_s13 = smov 0  }
   0x2   :  { %s584_s14 = smov 0   ;;  %s586_s15 = smov 0  }
   0x3   :  { %s588_s16 = smov 0   ;;  %s590_s17 = smov 0  }
   0x4 LB: > { %s392_s18 = sadd.s32 4294967295, %s555_s17   ;;  %s393_s19 = sadd.s32 4294967294, %s555_s17   ;;  %s555_s17 = sphi %s590_s17, %s16_s17   ;;  %s551_s16 = sphi %s588_s16, %s710_s16   ;;  %s547_s15 = sphi %s586_s15, %s709_s15   ;;  %s543_s14 = sphi %s584_s14, %s708_s14   ;;  %s539_s13 = sphi %s582_s13, %s707_s13   ;;  %s535_s12 = sphi %s580_s12, %s706_s12  }
   0x5   : > { %s28_s20 = sadd.s32 1, %s551_s16  ;;  %s115_s21 = sadd.s32 1, %s543_s14 }
   0x6   : > { %p30_p0 = scmp.ge.s32.totalorder %s28_s20, 2  ;;  %p125_p1 = scmp.ne.s32.totalorder %s543_s14, %s539_s13 }
   0x7   : > { %p126_p2 = scmp.eq.s32.totalorder %s392_s18, 1  ;;  %p131_p3 = scmp.ne.s32.totalorder %s539_s13, %s535_s12 }
   0x8   : > { %s712_s20 = smov (%p30_p0, %s28_s20), 0  ;;  %p132_p5 = scmp.eq.s32.totalorder %s393_s19, 1 }
   0x9   : > { %p620_p4 = por %p126_p2, %p125_p1  ;;  %s110_s23 = ssub.s32 %s551_s16, %s712_s20 }
   0xa   : > { %p398_p6 = scmp.ge.s32.totalorder %s555_s17, 1  ;;  %p113_p7 = scmp.eq.s32.totalorder %s110_s23, 0 }
   0xb   : > { %p627_p8 = por %p132_p5, %p131_p3  ;;  %p170_p9 = scmp.lt.s32.totalorder %s555_s17, 3 }
   0xc   : > { %s633_s25 = scalar_select %p113_p7, %s543_s14, %s115_s21  }
   0xd   : > { %p171_p10 = pnand %p398_p6, %p170_p9 }
   0xe   : > { %p200_p11 = scmp.lt.s32.totalorder (!%p171_p10), %s547_s15, 1  ;;  %s197_s8 = sand.u32 (!%p171_p10), 1, %s539_s13  }
   0xf   : > { %174 = sbr.rel (%p171_p10) target bundleno = 238 (0xee), region = 32  ;;  %s399_s9 = sshll.u32 (!%p171_p10), %s197_s8, 3 }
  0x10   : > { %s406_s18 = sshll.u32 (!%p171_p10), %s547_s15, 7  ;;  %s199_s19 = scalar_lea.vmem (!%p171_p10), [#allocation2], %s399_s9 }
  0x11   : > { %s297_s21 = sshll.u32 (!%p171_p10), %s199_s19, 4  ;;  %s654_s27 = scalar_lea.hbm (!%p171_p10), %s703_s3, %s406_s18  ;;  %s656_s21 = int_to_ptr.vmem [resolvable:$true] %s297_s21 }
  0x12   : > { %s283_s28 = scalar_lea.sflag (!%p171_p10), [#allocation3], %s197_s8  ;;  %s479_s29 = scalar_lea.vmem (!%p171_p10), %s656_s21, 128 }
  0x13   : > { %p480_p12 = scmp.ne.s32.totalorder (!%p171_p10), %s656_s21, %s479_s29 }
  0x14   : > { %v477_v0 = vld [vmem:[%s701_s1 + $0x8] sm:$0xff]   ;;  %v557_v1 = vmov 0.0   ;;  %v478_v2 = vld [vmem:[%s701_s1] sm:$0xff]   ;;  %vm558_vm0 = vmmov 0   ;;  %s201_s30 = scalar_select %p200_p11, %s547_s15, 1  ;;  %vm237_vm1 = vcmask 261120  }
  0x15   : > { %412 = vmatprep.subr.bf16.mxu0 %v557_v1  ;;  %416 = vmatprep.mubr.msk.bf16.mxu0 %vm558_vm0, %v557_v1  ;;  %v401_v5 = vld [vmem:[%s702_s2] ss:$0 sm:$0xff]  ;;  %p481_p13 = pnand %p480_p12, %p620_p4  ;;  %s559_s15 = smov [#allocation2]  }
  0x16   : > { %413 = vmatpush3.bf16.msra.mxu0 %v477_v0  ;;  %s400_s4 = sshll.u32 %s201_s30, 3  ;;  %s483_s30 = sshll.u32 %s559_s15, 4  ;;  %s484_s30 = int_to_ptr.vmem [resolvable:$false] %s483_s30 }
  0x17   : > { %414 = vmatprep.subr.bf16.mxu0 %v557_v1  ;;  %s203_s7 = scalar_lea.vmem %s700_s0, %s400_s4  ;;  %p482_p0 = pneg %p481_p13 }
  0x18   : > { %v212_v3 = vld [vmem:[%s203_s7] sm:$0xff]  ;;  %s485_s4 = scalar_lea.vmem %s484_s30, 256  ;;  %p486_p1 = scmp.lt.s32.totalorder %s656_s21, %s484_s30 }
  0x19   : > { %v213_v4 = vpack.c.bf16 %v212_v3, %v212_v3  ;;  %p487_p2 = scmp.lt.s32.totalorder %s485_s4, %s479_s29 }
  0x1a   : > { %415 = vmatpush3.bf16.msra.mxu0 %v478_v2 }
  0x1b   : > { %p488_p3 = por %p487_p2, %p486_p1 }
  0x1d   : > { %417 = vmatmul.mubr.msk.bf16.vlgmr.msra.gmra.mxu0 %vm237_vm1, %v213_v4  ;;  %p489_p5 = pnand %p488_p3, %p482_p0 }
  0xdd   : > { %v275_v6 = vpop.f32.mrf.mxu0 }
  0xde   : > { %v276_v7 = vadd.f32 %v401_v5, %v275_v6 }
  0xdf   : > { %v418_v8 = vpop.f32.mrf.mxu0 }
  0xe0   : > { %281 = vst [vmem:[%s199_s19] sm:$0xff] %v276_v7 }
  0xe1   : > { %v278_v9 = vpop.f32.mrf.mxu0 }
  0xe2   : > { %492 = shalt.err (!%p489_p5)
}
  0xe3   : > { %s493_s5 = scalar_lea.hbm %s654_s27, 128  ;;  %s497_s8 = scalar_lea.hbm %s703_s3, 256 }
  0xe4   : > { %p494_p6 = scmp.ne.s32.totalorder %s654_s27, %s493_s5  ;;  %p498_p10 = scmp.lt.s32.totalorder %s654_s27, %s703_s3 }
  0xe5   : > { %p499_p11 = scmp.lt.s32.totalorder %s497_s8, %s493_s5 }
  0xe6   : > { %p495_p7 = pnand %p494_p6, %p620_p4 }
  0xe7   : > { %p500_p12 = por %p499_p11, %p498_p10 }
  0xe8   : > { %p496_p9 = pneg %p495_p7 }
  0xea   : > { %p501_p13 = pnand %p500_p12, %p496_p9 }
  0xec   : > { %504 = shalt.err (!%p501_p13)
}
  0xed   : > { %420 = dma.vmem_to_hbm [thread:$0]  (%p620_p4), %s656_s21, 128, %s654_s27, %s283_s28   ;;  %v419_v10 = vpop.f32.mrf.mxu0 }
  0xee PF: > { %p426_p0 = scmp.ge.s32.totalorder %s555_s17, 2  ;;  %s309_s11 = sand.u32 1, %s535_s12  }
  0xef   : > { %s310_s18 = scalar_lea.sflag [#allocation3], %s309_s11 }
  0xf0   : > { %p423_p1 = pnand %p426_p0, %p627_p8 }
  0xf2   : > { %p424_p2 = pneg %p423_p1 }
  0xf4   : > { %530 = dma.done.wait (%p424_p2), %s310_s18, 128  }
  0xf5   : > { %532 = vsyncadd (%p424_p2), %s310_s18, 4294967168  ;;  %s16_s17 = sadd.s32 1, %s555_s17   ;;  %s706_s12 = smov %s539_s13 }
  0xf6   : > { %p13_p3 = scmp.ge.s32.totalorder %s16_s17, 4   ;;  %s707_s13 = smov %s543_s14 }
  0xf7   : > { %s708_s14 = smov %s633_s25  ;;  %s709_s15 = smov %s551_s16 }
  0xf8   : > { %s710_s16 = smov %s712_s20  ;;  %15 = sbr.rel (!%p13_p3) target bundleno = 4 (0x4), region = 73 }
  0xfd   :  { %315 = vsyncpa [#allocation3], 1 }
  0xfe   :  { %317 = vsyncpa [#allocation3 + $0x1], 1 }

// kernel: audio_decoder_forward.4
= control target key start
LH: loop header
LB: loop body
LE: loop exit
PB: predicated region body
PF: predicated region fallthrough
CT: control target
= control target key end

     0   :  { %s4789_s0 = inlined_call_operand.vmem [shape: f32[2,8,32], index: 0, kind: input, shape index: {}]   ;;  %s4790_s1 = inlined_call_operand.vmem [shape: f32[2,6,32], index: 1, kind: input, shape index: {}]   ;;  %s4791_s2 = inlined_call_operand.vmem [shape: bf16[32,96], index: 2, kind: input, shape index: {}]   ;;  %s4792_s3 = inlined_call_operand.vmem [shape: f32[1,96], index: 3, kind: input, shape index: {}]   ;;  %s4793_s4 = inlined_call_operand.vmem [shape: bf16[32,32], index: 4, kind: input, shape index: {}]   ;;  %s4794_s5 = inlined_call_operand.vmem [shape: f32[1,32], index: 5, kind: input, shape index: {}]   ;;  %s4795_s6 = inlined_call_operand.vmem [shape: f32[1,32], index: 6, kind: input, shape index: {}]   ;;  %s4796_s7 = inlined_call_operand.vmem [shape: f32[1,32], index: 7, kind: input, shape index: {}]   ;;  %s4797_s8 = inlined_call_operand.vmem [shape: bf16[32,32], index: 8, kind: input, shape index: {}]   ;;  %s4798_s9 = inlined_call_operand.vmem [shape: f32[1,32], index: 9, kind: input, shape index: {}]   ;;  %s4799_s10 = inlined_call_operand.vmem [shape: bf16[32,64], index: 10, kind: input, shape index: {}]   ;;  %s4800_s11 = inlined_call_operand.vmem [shape: f32[1,64], index: 11, kind: input, shape index: {}]   ;;  %s4801_s12 = inlined_call_operand.vmem [shape: bf16[32,32], index: 12, kind: input, shape index: {}]   ;;  %s4802_s13 = inlined_call_operand.vmem [shape: f32[1,32], index: 13, kind: input, shape index: {}]   ;;  %s4803_s14 = inlined_call_operand.vmem [shape: f32[1,32], index: 14, kind: input, shape index: {}]   ;;  %s4804_s15 = inlined_call_operand.vmem [shape: f32[1,32], index: 15, kind: input, shape index: {}]   ;;  %s4805_s16 = inlined_call_operand.vmem [shape: bf16[32,1024], index: 16, kind: input, shape index: {}]   ;;  %s4806_s17 = inlined_call_operand.vmem [shape: f32[1,1024], index: 17, kind: input, shape index: {}]   ;;  %s4807_s18 = inlined_call_operand.vmem [shape: bf16[1024,32], index: 18, kind: input, shape index: {}]   ;;  %s4808_s19 = inlined_call_operand.vmem [shape: f32[1,32], index: 19, kind: input, shape index: {}]   ;;  %s4809_s20 = inlined_call_operand.vmem [shape: f32[1,32], index: 20, kind: input, shape index: {}]   ;;  %s4810_s21 = inlined_call_operand.hbm [shape: f32[1,32], index: 21, kind: input, shape index: {}]   ;;  %s4811_s22 = inlined_call_operand.vmem [shape: f32[2,8,32], index: 22, kind: output, shape index: {}]  }
   0x1   :  { %4819 = sst [smem:[#allocation5_spill]] %s4789_s0 }
   0x2   :  { %4820 = sst [smem:[#allocation6_spill]] %s4790_s1 }
   0x3   :  { %4821 = sst [smem:[#allocation7_spill]] %s4791_s2 }
   0x4   :  { %4822 = sst [smem:[#allocation8_spill]] %s4792_s3 }
   0x5   :  { %4823 = sst [smem:[#allocation9_spill]] %s4793_s4 }
   0x6   :  { %4824 = sst [smem:[#allocation10_spill]] %s4794_s5 }
   0x7   :  { %4825 = sst [smem:[#allocation11_spill]] %s4795_s6 }
   0x8   :  { %27 = vsyncpa [#allocation3], 0  ;;  %s4152_s3 = smov 0  }
   0x9 LB: > { %s4158_s28 = sadd.s32 4294967295, %s4020_s3   ;;  %p3391_p0 = scmp.ge.s32.totalorder %s4020_s3, 1  ;;  %s4020_s3 = sphi %s4152_s3, %s33_s3  }
   0xa   : > { %p536_p1 = scmp.lt.s32.totalorder %s4020_s3, 3  ;;  %p3851_p3 = scmp.eq.s32.totalorder %s4158_s28, 0 }
   0xb   : > { %s4022_s30 = smov [#allocation2]  }
   0xc   : > { %p4162_p2 = pnand %p3391_p0, %p536_p1  ;;  %s606_s4 = sshll.u32 %s4022_s30, 4  ;;  %s607_s4 = int_to_ptr.vmem [resolvable:$true] %s606_s4 }
   0xd   : > { %s3995_s0 = scalar_lea.vmem %s607_s4, 16  ;;  %s4002_s23 = scalar_lea.vmem %s607_s4, 32 }
   0xe   : > { %p3847_p4 = pneg %p4162_p2  ;;  %p3996_p7 = scmp.ne.s32.totalorder %s607_s4, %s3995_s0 }
   0xf   : > { %p4003_p10 = scmp.lt.s32.totalorder %s607_s4, %s607_s4  ;;  %p4004_p11 = scmp.lt.s32.totalorder %s4002_s23, %s3995_s0 }
  0x10   : > { %p3848_p5 = pnand %p3851_p3, %p3847_p4 }
  0x11   : > { %p4005_p12 = por %p4004_p11, %p4003_p10 }
  0x12   : > { %p3986_p6 = pneg %p3848_p5 }
  0x14   : > { %p3998_p8 = pnand %p3996_p7, %p3986_p6 }
  0x16   : > { %p3999_p9 = pneg %p3998_p8 }
  0x18   : > { %p4006_p13 = pnand %p4005_p12, %p3999_p9 }
  0x1a   : > { %4009 = shalt.err (!%p4006_p13)
}
  0x1b   : > { %3850 = dma.hbm_to_vmem [thread:$0]  (!%p3848_p5), %s4810_s21, 16, %s607_s4, [#allocation3]  }
  0x1c   : > { %633 = sbr.rel (%p4162_p2) target bundleno = 6322 (0x18b2), region = 108 }
  0x21   : > { %4015 = dma.done.wait (%p3851_p3), [#allocation3], 16  }
  0x22   : > { %4017 = vsyncadd (%p3851_p3), [#allocation3], 4294967280  ;;  %p697_p0 = scmp.lt.s32.totalorder %s4158_s28, 1  ;;  %v4023_v0 = vmov 0.0   ;;  %vm4024_vm0 = vmmov 0   ;;  %s4827_s26 = sld [smem:[#allocation5_spill]]  ;;  %v785_v17 = vlaneseq }
  0x23   : > { %3675 = vmatprep.subr.bf16.mxu0 %v4023_v0  ;;  %3679 = vmatprep.mubr.msk.bf16.mxu0 %vm4024_vm0, %v4023_v0  ;;  %s4828_s30 = sld [smem:[#allocation7_spill]]  ;;  %vm736_vm1 = vcmask 261120   ;;  %s4025_s5 = smov 120   ;;  %vm793_vm2 = vcmask 64512   ;;  %vm859_vm4 = vcmask 1043456   ;;  %vm1655_vm5 = vcmask 48128  }
  0x24   : > { %s4839_s28 = smov (!%p697_p0, %s4158_s28), 1  ;;  %3683 = vmatprep.subr.bf16.mxu1 %v4023_v0  ;;  %3685 = vmatprep.mubr.msk.bf16.mxu1 %vm4024_vm0, %v4023_v0  ;;  %s4829_s1 = sld [smem:[#allocation8_spill]]  ;;  %v4231_v18 = vshrl.u32 %v785_v17, 7  ;;  %v4233_v19 = vand.u32 127, %v785_v17  ;;  %vm1674_vm6 = vcmask 1042432  }
  0x25   : > { %s4188_s24 = sshll.u32 %s4839_s28, 3  ;;  %s4818_s6 = smov 96  }
  0x26   : > { %s4027_s25 = smov 88   ;;  %vm789_vm3 = vcmp.gt.s32.totalorder %v4233_v19, %v4231_v18  ;;  %s4030_s27 = smov 112  }
  0x27   : > { %s4815_s29 = smov 80   ;;  %s4830_s28 = sld [smem:[#allocation9_spill]] }
  0x28   : > { %s700_s2 = scalar_lea.vmem %s4827_s26, %s4188_s24  ;;  %s4028_s26 = smov 64  }
  0x29   : > { %v3876_v1 = vld [vmem:[%s4828_s30 + $0x8] sm:$0xff]   ;;  %v3877_v2 = vld [vmem:[%s4828_s30] sm:$0xff]   ;;  %s4034_s4 = smov 48   ;;  %s4836_s0 = smov 80  }
  0x2a   : > { %3676 = vmatpush3.bf16.msra.mxu0 %v3876_v1  ;;  %v4200_v3 = vld [vmem:[%s700_s2] sm:$0xff]  ;;  %s4029_s2 = smov 56  }
  0x2b   : > { %3677 = vmatprep.subr.bf16.mxu0 %v4023_v0  ;;  %v712_v4 = vpack.c.bf16 %v4200_v3, %v4200_v3  ;;  %v3399_v5 = vld [vmem:[%s4829_s1] ss:$0 sm:$0xff]  ;;  %s4035_s1 = smov 40  }
  0x2d   : > { %v780_v56 = vld [vmem:[%s4830_s28] sm:$0xf]  ;;  %v781_v58 = vld [vmem:[%s4830_s28 + $0x4] sm:$0xf] }
  0x2e   : > { %3678 = vmatpush3.bf16.msra.mxu0 %v3877_v2  ;;  %v1067_v57 = vsel %vm859_vm4, %v780_v56, 0  ;;  %v1021_v59 = vsel %vm859_vm4, %v781_v58, 0 }
  0x2f   : > { %3689 = vmatprep.subr.bf16.mxu0 %v4023_v0 }
  0x31   : > { %3680 = vmatmul.mubr.msk.bf16.vlgmr.msra.gmra.mxu0 %vm736_vm1, %v712_v4 }
  0x32   : > { %3691 = vmatprep.mubr.msk.bf16.mxu0 %vm4024_vm0, %v4023_v0 }
  0xf1   : > { %v774_v6 = vpop.f32.mrf.mxu0 }
  0xf2   : > { %v775_v7 = vadd.f32 %v3399_v5, %v774_v6 }
  0xf3   : > { %v3681_v8 = vpop.f32.mrf.mxu0 }
  0xf4   : > { %v4212_v9 = vpack.c.bf16 %v775_v7, %v775_v7 }
  0xf5   : > { %v777_v10 = vpop.f32.mrf.mxu0 }
  0xf6   : > { %904 = vrot.lane.b32.xlu1 %v4212_v9, %s4025_s5  ;;  %791 = vrot.lane.b32.xlu0 %v4212_v9, %s4818_s6 }
  0xf7   : > { %v3682_v11 = vpop.f32.mrf.mxu0 }
  0xfa   : > { %906 = vrot.lane.b32.xlu0 %v4212_v9, %s4027_s25 }
 0x168   : > { %v792_v12 = vpop.permute.xlu0 %791  ;;  %v905_v16 = vpop.permute.xlu1 %904 }
 0x169   : > { %v798_v13 = vsel %vm793_vm2, %v792_v12, 0 }
 0x16a   : > { %3684 = vmatpush3.bf16.xpose.msra.mxu1 %v798_v13 }
 0x16b   : > { %3695 = vmatprep.subr.bf16.mxu1 %v4023_v0 }
 0x16c   : > { %v907_v14 = vpop.permute.xlu0 %906 }
 0x16d   : > { %v912_v15 = vsel %vm793_vm2, %v907_v14, 0 }
 0x171   : > { %3686 = vmatmul.mubr.msk.bf16.vlgmr.msra.gmra.mxu1 %vm793_vm2, %v4212_v9 }
 0x172   : > { %3696 = vmatpush3.bf16.xpose.msra.mxu1 %v912_v15  ;;  %3697 = vmatprep.mubr.msk.bf16.mxu1 %vm4024_vm0, %v4023_v0 }
 0x173   : > { %3707 = vmatprep.subr.bf16.mxu1 %v4023_v0 }
 0x179   : > { %3698 = vmatmul.mubr.msk.bf16.vlgmr.msra.gmra.mxu1 %vm793_vm2, %v905_v16 }
 0x17a   : > { %3709 = vmatprep.mubr.msk.bf16.mxu1 %vm4024_vm0, %v4023_v0  ;;  %3708 = vmatpush3.bf16.msra.mxu1 %v1021_v59 }
 0x17b   : > { %3719 = vmatprep.subr.bf16.mxu1 %v4023_v0 }
 0x231   : > { %v834_v20 = vpop.f32.mrf.mxu1 }
 0x232   : > { %v840_v21 = vmul.f32 0.35355338, %v834_v20 }
 0x233   : > { %v3687_v22 = vpop.f32.mrf.mxu1 }
 0x234   : > { %v841_v23 = vsel %vm789_vm3, -1e+30, %v840_v21 }
 0x235   : > { %v837_v24 = vpop.f32.mrf.mxu1  ;;  %v842_v25 = vsel %vm793_vm2, %v841_v23, -inf }
 0x236   : > { %843 = vmax.xlane.f32.xlu1 %v842_v25 }
 0x237   : > { %v3688_v26 = vpop.f32.mrf.mxu1 }
 0x239   : > { %v948_v27 = vpop.f32.mrf.mxu1 }
 0x23a   : > { %v954_v28 = vmul.f32 0.35355338, %v948_v27 }
 0x23b   : > { %v3699_v29 = vpop.f32.mrf.mxu1 }
 0x23c   : > { %v955_v30 = vsel %vm789_vm3, -1e+30, %v954_v28 }
 0x23d   : > { %v951_v31 = vpop.f32.mrf.mxu1  ;;  %v956_v32 = vsel %vm793_vm2, %v955_v30, -inf }
 0x23e   : > { %957 = vmax.xlane.f32.xlu0 %v956_v32 }
 0x23f   : > { %v3700_v33 = vpop.f32.mrf.mxu1 }
 0x2bf   : > { %v844_v34 = vpop.xlane.xlu1 %843 }
 0x2c0   : > { %v845_v35 = vsub.f32 %v841_v23, %v844_v34 }
 0x2c2   : > { %v846_v36 = vmul.f32 1.442695, %v845_v35 }
 0x2c4   : > { %3946 = vpow2.f32 %v846_v36 }
 0x2c7   : > { %v958_v37 = vpop.xlane.xlu0 %957 }
 0x2c8   : > { %v959_v38 = vsub.f32 %v955_v30, %v958_v37 }
 0x2ca   : > { %v960_v39 = vmul.f32 1.442695, %v959_v38 }
 0x2cc   : > { %3948 = vpow2.f32 %v960_v39 }
 0x2d1   : > { %v3947_v40 = vpop.eup %3946 }
 0x2d2   : > { %v848_v41 = vsel %vm793_vm2, %v3947_v40, 0.0 }
 0x2d3   : > { %849 = vadd.xlane.f32.xlu0 %v848_v41 }
 0x2d9   : > { %v3949_v42 = vpop.eup %3948 }
 0x2da   : > { %v962_v43 = vsel %vm793_vm2, %v3949_v42, 0.0 }
 0x2db   : > { %963 = vadd.xlane.f32.xlu1 %v962_v43 }
 0x2e9   : > { %854 = vrot.lane.b32.xlu0 %v4212_v9, %s4028_s26  ;;  %s4814_s26 = smov 72  }
 0x2ec   : > { %968 = vrot.lane.b32.xlu1 %v4212_v9, %s4029_s2  ;;  %s4816_s2 = smov 104  }
 0x2ed   : > { %1109 = vrot.lane.b32.xlu0 %v4212_v9, %s4030_s27 }
 0x2f0   : > { %1111 = vrot.lane.b32.xlu1 %v4212_v9, %s4815_s29 }
 0x35c   : > { %v850_v44 = vpop.xlane.xlu0 %849 }
 0x35d   : > { %3950 = vrcp.f32 %v850_v44  ;;  %v782_v44 = vld [vmem:[%s4830_s28 + $0x8] sm:$0xf] }
 0x360   : > { %v855_v45 = vpop.permute.xlu0 %854 }
 0x361   : > { %v861_v46 = vsel %vm859_vm4, %v855_v45, 0  ;;  %v1226_v45 = vsel %vm859_vm4, %v782_v44, 0 }
 0x362   : > { %3690 = vmatpush3.bf16.msra.mxu0 %v861_v46 }
 0x363   : > { %3701 = vmatprep.subr.bf16.mxu0 %v4023_v0 }
 0x364   : > { %v964_v47 = vpop.xlane.xlu1 %963  ;;  %v1110_v11 = vpop.permute.xlu0 %1109 }
 0x365   : > { %3952 = vrcp.f32 %v964_v47 }
 0x368   : > { %v969_v50 = vpop.permute.xlu1 %968 }
 0x369   : > { %v974_v52 = vsel %vm859_vm4, %v969_v50, 0 }
 0x36a   : > { %v3951_v48 = vpop.eup %3950 }
 0x36b   : > { %v852_v49 = vmul.f32 %v3951_v48, %v3947_v40 }
 0x36c   : > { %v1112_v2 = vpop.permute.xlu1 %1111 }
 0x36d   : > { %v853_v51 = vpack.c.bf16 %v852_v49, %v852_v49  ;;  %v1117_v7 = vsel %vm793_vm2, %v1112_v2, 0 }
 0x36f   : > { %3692 = vmatmul.mubr.msk.bf16.vlgmr.msra.gmra.mxu0 %vm793_vm2, %v853_v51 }
 0x370   : > { %3702 = vmatpush3.bf16.msra.mxu0 %v974_v52  ;;  %3703 = vmatprep.mubr.msk.bf16.mxu0 %vm4024_vm0, %v4023_v0 }
 0x371   : > { %3713 = vmatprep.subr.bf16.mxu0 %v4023_v0 }
 0x372   : > { %v3953_v53 = vpop.eup %3952 }
 0x373   : > { %v966_v54 = vmul.f32 %v3953_v53, %v3949_v42 }
 0x375   : > { %v967_v55 = vpack.c.bf16 %v966_v54, %v966_v54 }
 0x377   : > { %3704 = vmatmul.mubr.msk.bf16.vlgmr.msra.gmra.mxu0 %vm793_vm2, %v967_v55 }
 0x378   : > { %3715 = vmatprep.mubr.msk.bf16.mxu0 %vm4024_vm0, %v4023_v0  ;;  %3714 = vmatpush3.bf16.msra.mxu0 %v1067_v57 }
 0x379   : > { %3725 = vmatprep.subr.bf16.mxu0 %v4023_v0 }
 0x42f   : > { %v897_v60 = vpop.f32.mrf.mxu0 }
 0x430   : > { %v903_v61 = vpack.c.bf16 %v897_v60, %v897_v60 }
 0x431   : > { %v3693_v62 = vpop.f32.mrf.mxu0 }
 0x432   : > { %3716 = vmatmul.mubr.msk.bf16.vlgmr.msra.gmra.mxu0 %vm793_vm2, %v903_v61 }
 0x433   : > { %v900_v63 = vpop.f32.mrf.mxu0  ;;  %3727 = vmatprep.mubr.msk.bf16.mxu0 %vm4024_vm0, %v4023_v0 }
 0x435   : > { %v3694_v1 = vpop.f32.mrf.mxu0 }
 0x437   : > { %v1010_v4 = vpop.f32.mrf.mxu0 }
 0x438   : > { %v1016_v5 = vpack.c.bf16 %v1010_v4, %v1010_v4 }
 0x439   : > { %v3705_v6 = vpop.f32.mrf.mxu0 }
 0x43a   : > { %3710 = vmatmul.mubr.msk.bf16.vlgmr.msra.gmra.mxu1 %vm793_vm2, %v1016_v5 }
 0x43b   : > { %3720 = vmatpush3.bf16.xpose.msra.mxu1 %v1117_v7  ;;  %v1013_v8 = vpop.f32.mrf.mxu0  ;;  %3721 = vmatprep.mubr.msk.bf16.mxu1 %vm4024_vm0, %v4023_v0 }
 0x43c   : > { %3731 = vmatprep.subr.bf16.mxu1 %v4023_v0 }
 0x43d   : > { %v3706_v10 = vpop.f32.mrf.mxu0 }
 0x442   : > { %3722 = vmatmul.mubr.msk.bf16.vlgmr.msra.gmra.mxu1 %vm793_vm2, %v1110_v11 }
 0x443   : > { %3733 = vmatprep.mubr.msk.bf16.mxu1 %vm4024_vm0, %v4023_v0  ;;  %3732 = vmatpush3.bf16.msra.mxu1 %v1226_v45  ;;  %v3417_v45 = vld [vmem:[%s4796_s7] ss:$0 sm:$0xff] }
 0x444   : > { %3743 = vmatprep.subr.bf16.mxu1 %v4023_v0 }
 0x4f2   : > { %v1103_v12 = vpop.f32.mrf.mxu0 }
 0x4f4   : > { %v3717_v13 = vpop.f32.mrf.mxu0 }
 0x4f6   : > { %v1106_v14 = vpop.f32.mrf.mxu0 }
 0x4f8   : > { %v3718_v15 = vpop.f32.mrf.mxu0 }
 0x4fa   : > { %v1057_v16 = vpop.f32.mrf.mxu1 }
 0x4fb   : > { %v4284_v17 = vadd.f32 %v1103_v12, %v1057_v16 }
 0x4fc   : > { %v3711_v20 = vpop.f32.mrf.mxu1 }
 0x4fe   : > { %v1060_v21 = vpop.f32.mrf.mxu1 }
 0x500   : > { %v3712_v22 = vpop.f32.mrf.mxu1 }
 0x502   : > { %v1153_v23 = vpop.f32.mrf.mxu1 }
 0x503   : > { %v1159_v24 = vmul.f32 0.35355338, %v1153_v23 }
 0x504   : > { %v3723_v25 = vpop.f32.mrf.mxu1 }
 0x505   : > { %v1160_v26 = vsel %vm789_vm3, -1e+30, %v1159_v24 }
 0x506   : > { %v1156_v27 = vpop.f32.mrf.mxu1  ;;  %v1161_v28 = vsel %vm793_vm2, %v1160_v26, -inf }
 0x507   : > { %1162 = vmax.xlane.f32.xlu1 %v1161_v28 }
 0x508   : > { %v3724_v29 = vpop.f32.mrf.mxu1 }
 0x518   : > { %1271 = vrot.lane.b32.xlu1 %v4212_v9, %s4814_s26  ;;  %s4833_s26 = sld [smem:[#allocation11_spill]] }
 0x51c   : > { %1269 = vrot.lane.b32.xlu1 %v4212_v9, %s4816_s2  ;;  %s4832_s2 = sld [smem:[#allocation6_spill]] }
 0x522   : > { %s704_s6 = scalar_lea.vmem %s4832_s2, %s4188_s24  ;;  %s4835_s2 = smov 104  }
 0x590   : > { %v1163_v30 = vpop.xlane.xlu1 %1162 }
 0x591   : > { %v1164_v31 = vsub.f32 %v1160_v26, %v1163_v30 }
 0x593   : > { %v1165_v32 = vmul.f32 1.442695, %v1164_v31 }
 0x594   : > { %v1272_v40 = vpop.permute.xlu1 %1271 }
 0x595   : > { %3954 = vpow2.f32 %v1165_v32  ;;  %v1277_v42 = vsel %vm793_vm2, %v1272_v40, 0 }
 0x598   : > { %v1270_v43 = vpop.permute.xlu1 %1269 }
 0x5a2   : > { %v3955_v33 = vpop.eup %3954 }
 0x5a3   : > { %v1167_v34 = vsel %vm793_vm2, %v3955_v33, 0.0 }
 0x5a4   : > { %1168 = vadd.xlane.f32.xlu0 %v1167_v34  ;;  %v3878_v34 = vld [vmem:[%s4799_s10 + $0x8] sm:$0xff]  }
 0x5ba   : > { %1173 = vrot.lane.b32.xlu0 %v4212_v9, %s4034_s4  ;;  %s4831_s4 = sld [smem:[#allocation10_spill]] }
 0x5c0   : > { %v3415_v21 = vld [vmem:[%s4831_s4] ss:$0 sm:$0xff]  ;;  %s4837_s4 = smov 72  }
 0x62d   : > { %v1169_v35 = vpop.xlane.xlu0 %1168 }
 0x62e   : > { %3956 = vrcp.f32 %v1169_v35  ;;  %v711_v35 = vld [vmem:[%s704_s6] sm:$0x3f]  ;;  %s708_s6 = scalar_lea.vmem %s4811_s22, %s4188_s24 }
 0x631   : > { %v1174_v36 = vpop.permute.xlu0 %1173 }
 0x632   : > { %v1179_v37 = vsel %vm859_vm4, %v1174_v36, 0  ;;  %v1535_v36 = vpack.c.bf16 %v711_v35, %v711_v35 }
 0x633   : > { %3726 = vmatpush3.bf16.msra.mxu0 %v1179_v37  ;;  %v3880_v37 = vld [vmem:[%s4797_s8 + $0x8] sm:$0xff]  }
 0x634   : > { %3737 = vmatprep.subr.bf16.mxu0 %v4023_v0 }
 0x63b   : > { %v3957_v38 = vpop.eup %3956 }
 0x63c   : > { %v1171_v39 = vmul.f32 %v3957_v38, %v3955_v33  ;;  %v3881_v38 = vld [vmem:[%s4797_s8] sm:$0xff]  }
 0x63e   : > { %v1172_v41 = vpack.c.bf16 %v1171_v39, %v1171_v39 }
 0x640   : > { %3728 = vmatmul.mubr.msk.bf16.vlgmr.msra.gmra.mxu0 %vm793_vm2, %v1172_v41 }
 0x641   : > { %3738 = vmatpush3.bf16.xpose.msra.mxu0 %v1277_v42  ;;  %3739 = vmatprep.mubr.msk.bf16.mxu0 %vm4024_vm0, %v4023_v0 }
 0x642   : > { %3749 = vmatprep.subr.bf16.mxu0 %v4023_v0 }
 0x648   : > { %3740 = vmatmul.mubr.msk.bf16.vlgmr.msra.gmra.mxu0 %vm793_vm2, %v1270_v43  ;;  %v3416_v43 = vld [vmem:[%s4833_s26] ss:$0 sm:$0xff] }
 0x649   : > { %3751 = vmatprep.mubr.msk.bf16.mxu0 %vm4024_vm0, %v4023_v0 }
 0x700   : > { %v1215_v46 = vpop.f32.mrf.mxu0 }
 0x701   : > { %v1221_v47 = vpack.c.bf16 %v1215_v46, %v1215_v46 }
 0x702   : > { %v3729_v48 = vpop.f32.mrf.mxu0 }
 0x703   : > { %3734 = vmatmul.mubr.msk.bf16.vlgmr.msra.gmra.mxu1 %vm793_vm2, %v1221_v47 }
 0x704   : > { %v1218_v49 = vpop.f32.mrf.mxu0  ;;  %3745 = vmatprep.mubr.msk.bf16.mxu1 %vm4024_vm0, %v4023_v0 }
 0x705   : > { %v3422_v49 = vld [vmem:[%s4800_s11] ss:$0 sm:$0xff] }
 0x706   : > { %v3730_v50 = vpop.f32.mrf.mxu0 }
 0x708   : > { %v1313_v51 = vpop.f32.mrf.mxu0 }
 0x709   : > { %v1319_v52 = vmul.f32 0.35355338, %v1313_v51 }
 0x70a   : > { %v3741_v53 = vpop.f32.mrf.mxu0 }
 0x70b   : > { %v1320_v54 = vsel %vm789_vm3, -1e+30, %v1319_v52 }
 0x70c   : > { %v1316_v55 = vpop.f32.mrf.mxu0  ;;  %v1321_v56 = vsel %vm793_vm2, %v1320_v54, -inf }
 0x70d   : > { %1322 = vmax.xlane.f32.xlu0 %v1321_v56 }
 0x70e   : > { %v3742_v57 = vpop.f32.mrf.mxu0 }
 0x70f   : > { %v3418_v57 = vld [vmem:[%s4798_s9] ss:$0 sm:$0xff] }
 0x723   : > { %1333 = vrot.lane.b32.xlu0 %v4212_v9, %s4035_s1  ;;  %v783_v9 = vld [vmem:[%s4830_s28 + $0xc] sm:$0xf] }
 0x724   : > { %v1386_v6 = vsel %vm859_vm4, %v783_v9, 0 }
 0x725   : > { %3750 = vmatpush3.bf16.msra.mxu0 %v1386_v6 }
 0x726   : > { %3763 = vmatprep.subr.bf16.mxu0 %v4023_v0 }
 0x796   : > { %v1323_v58 = vpop.xlane.xlu0 %1322 }
 0x797   : > { %v1324_v59 = vsub.f32 %v1320_v54, %v1323_v58 }
 0x799   : > { %v1325_v60 = vmul.f32 1.442695, %v1324_v59 }
 0x79a   : > { %v1334_v61 = vpop.permute.xlu0 %1333 }
 0x79b   : > { %3958 = vpow2.f32 %v1325_v60  ;;  %v1339_v62 = vsel %vm859_vm4, %v1334_v61, 0 }
 0x79c   : > { %3744 = vmatpush3.bf16.msra.mxu1 %v1339_v62 }
 0x79d   : > { %3755 = vmatprep.subr.bf16.mxu1 %v4023_v0 }
 0x7a8   : > { %v3959_v19 = vpop.eup %3958 }
 0x7a9   : > { %v1327_v63 = vsel %vm793_vm2, %v3959_v19, 0.0 }
 0x7aa   : > { %1328 = vadd.xlane.f32.xlu1 %v1327_v63 }
 0x7c3   : > { %v1262_v1 = vpop.f32.mrf.mxu1 }
 0x7c4   : > { %v1268_v2 = vadd.f32 %v1262_v1, %v4284_v17 }
 0x7c5   : > { %v3735_v4 = vpop.f32.mrf.mxu1 }
 0x7c7   : > { %v1265_v5 = vpop.f32.mrf.mxu1 }
 0x7c9   : > { %v3736_v7 = vpop.f32.mrf.mxu1 }
 0x833   : > { %v1329_v8 = vpop.xlane.xlu1 %1328 }
 0x834   : > { %3960 = vrcp.f32 %v1329_v8 }
 0x841   : > { %v3961_v10 = vpop.eup %3960 }
 0x842   : > { %v1331_v11 = vmul.f32 %v3961_v10, %v3959_v19 }
 0x844   : > { %v1332_v12 = vpack.c.bf16 %v1331_v11, %v1331_v11 }
 0x846   : > { %3746 = vmatmul.mubr.msk.bf16.vlgmr.msra.gmra.mxu1 %vm793_vm2, %v1332_v12 }
 0x847   : > { %3759 = vmatprep.mubr.msk.bf16.mxu1 %vm4024_vm0, %v4023_v0  ;;  %3756 = vmatpush3.bf16.msra.mxu1 %v3880_v37 }
 0x848   : > { %3757 = vmatprep.subr.bf16.mxu1 %v4023_v0 }
 0x84b   : > { %3758 = vmatpush3.bf16.msra.mxu1 %v3881_v38 }
 0x84c   : > { %3771 = vmatprep.subr.bf16.mxu1 %v4023_v0 }
 0x906   : > { %v1375_v13 = vpop.f32.mrf.mxu1 }
 0x907   : > { %v1381_v14 = vpack.c.bf16 %v1375_v13, %v1375_v13 }
 0x908   : > { %v3747_v15 = vpop.f32.mrf.mxu1 }
 0x909   : > { %3752 = vmatmul.mubr.msk.bf16.vlgmr.msra.gmra.mxu0 %vm793_vm2, %v1381_v14 }
 0x90a   : > { %v1378_v16 = vpop.f32.mrf.mxu1  ;;  %3767 = vmatprep.mubr.msk.bf16.mxu0 %vm4024_vm0, %v4023_v0  ;;  %3764 = vmatpush3.bf16.msra.mxu0 %v3878_v34 }
 0x90b   : > { %3765 = vmatprep.subr.bf16.mxu0 %v4023_v0 }
 0x90c   : > { %v3748_v17 = vpop.f32.mrf.mxu1 }
 0x9c9   : > { %v1422_v20 = vpop.f32.mrf.mxu0 }
 0x9ca   : > { %v1428_v22 = vadd.f32 %v1422_v20, %v1268_v2 }
 0x9cb   : > { %v3753_v23 = vpop.f32.mrf.mxu0 }
 0x9cc   : > { %v1436_v24 = vadd.f32 %v3415_v21, %v1428_v22 }
 0x9cd   : > { %v1425_v25 = vpop.f32.mrf.mxu0 }
 0x9ce   : > { %v1439_v26 = vadd.f32 %v1436_v24, %v4200_v3  ;;  %v3879_v3 = vld [vmem:[%s4799_s10] sm:$0xff]  }
 0x9cf   : > { %v3754_v27 = vpop.f32.mrf.mxu0  ;;  %3766 = vmatpush3.bf16.msra.mxu0 %v3879_v3 }
 0x9d0   : > { %v1440_v28 = vsel %vm736_vm1, %v1439_v26, 0.0  ;;  %3777 = vmatprep.subr.bf16.mxu0 %v4023_v0 }
 0x9d1   : > { %1441 = vadd.xlane.f32.xlu1 %v1440_v28 }
 0x9d2   : > { %3768 = vmatmul.mubr.msk.bf16.vlgmr.msra.gmra.mxu0 %vm736_vm1, %v1535_v36 }
 0x9d3   : > { %3779 = vmatprep.mubr.msk.bf16.mxu0 %vm4024_vm0, %v4023_v0 }
 0xa5a   : > { %v1442_v29 = vpop.xlane.xlu1 %1441 }
 0xa5b   : > { %v1444_v30 = vmul.f32 0.03125, %v1442_v29 }
 0xa5d   : > { %v1445_v31 = vsub.f32 %v1439_v26, %v1444_v30 }
 0xa5f   : > { %v1446_v32 = vmul.f32 %v1445_v31, %v1445_v31 }
 0xa61   : > { %v1447_v33 = vsel %vm736_vm1, %v1446_v32, 0.0 }
 0xa62   : > { %1448 = vadd.xlane.f32.xlu1 %v1447_v33 }
 0xa92   : > { %v1596_v50 = vpop.f32.mrf.mxu0 }
 0xa93   : > { %v1597_v51 = vadd.f32 %v3422_v49, %v1596_v50 }
 0xa94   : > { %v3769_v52 = vpop.f32.mrf.mxu0 }
 0xa95   : > { %v4379_v53 = vpack.c.bf16 %v1597_v51, %v1597_v51 }
 0xa96   : > { %v1599_v54 = vpop.f32.mrf.mxu0 }
 0xa97   : > { %1722 = vrot.lane.b32.xlu1 %v4379_v53, %s4025_s5  ;;  %v1612_v55 = vsel %vm793_vm2, %v4379_v53, 0 }
 0xa98   : > { %v3770_v56 = vpop.f32.mrf.mxu0 }
 0xaeb   : > { %v1449_v39 = vpop.xlane.xlu1 %1448 }
 0xaec   : > { %v1450_v40 = vmul.f32 0.03125, %v1449_v39  ;;  %v1602_v39 = vld [vmem:[%s4801_s12] sm:$0xf] }
 0xaee   : > { %v1451_v41 = vadd.f32 1e-05, %v1450_v40  ;;  %v1882_v40 = vsel %vm859_vm4, %v1602_v39, 0 }
 0xaf0   : > { %3962 = vrsqrt.f32 %v1451_v41  ;;  %v1603_v41 = vld [vmem:[%s4801_s12 + $0x4] sm:$0xf] }
 0xafd   : > { %v3963_v42 = vpop.eup %3962 }
 0xafe   : > { %v1453_v44 = vmul.f32 %v3963_v42, %v1445_v31  ;;  %v1836_v42 = vsel %vm859_vm4, %v1603_v41, 0 }
 0xb00   : > { %v1460_v46 = vmul.f32 %v3416_v43, %v1453_v44 }
 0xb02   : > { %v4369_v47 = vadd.f32 %v3417_v45, %v1460_v46 }
 0xb04   : > { %v1468_v48 = vpack.c.bf16 %v4369_v47, %v4369_v47 }
 0xb06   : > { %3760 = vmatmul.mubr.msk.bf16.vlgmr.msra.gmra.mxu1 %vm736_vm1, %v1468_v48 }
 0xb07   : > { %3773 = vmatprep.mubr.msk.bf16.mxu1 %vm4024_vm0, %v4023_v0  ;;  %3772 = vmatpush3.bf16.xpose.msra.mxu1 %v1612_v55 }
 0xb08   : > { %3783 = vmatprep.subr.bf16.mxu1 %v4023_v0 }
 0xb09   : > { %v1723_v59 = vpop.permute.xlu1 %1722 }
 0xb0a   : > { %v1728_v19 = vsel %vm793_vm2, %v1723_v59, 0 }
 0xbc6   : > { %v1529_v58 = vpop.f32.mrf.mxu1 }
 0xbc7   : > { %v1530_v60 = vadd.f32 %v3418_v57, %v1529_v58 }
 0xbc8   : > { %v3761_v61 = vpop.f32.mrf.mxu1 }
 0xbc9   : > { %v4389_v62 = vpack.c.bf16 %v1530_v60, %v1530_v60 }
 0xbca   : > { %v1532_v63 = vpop.f32.mrf.mxu1 }
 0xbcb   : > { %1720 = vrot.lane.b32.xlu0 %v4389_v62, %s4025_s5  ;;  %3774 = vmatmul.mubr.msk.bf16.vlgmr.msra.gmra.mxu1 %vm793_vm2, %v4389_v62  ;;  %s4834_s5 = smov 96  }
 0xbcc   : > { %v3762_v1 = vpop.f32.mrf.mxu1  ;;  %3784 = vmatpush3.bf16.xpose.msra.mxu1 %v1728_v19  ;;  %3785 = vmatprep.mubr.msk.bf16.mxu1 %vm4024_vm0, %v4023_v0 }
 0xbcd   : > { %3795 = vmatprep.subr.bf16.mxu1 %v4023_v0 }
 0xc3d   : > { %v1721_v2 = vpop.permute.xlu0 %1720 }
 0xc3e   : > { %3786 = vmatmul.mubr.msk.bf16.vlgmr.msra.gmra.mxu1 %vm793_vm2, %v1721_v2 }
 0xc3f   : > { %3797 = vmatprep.mubr.msk.bf16.mxu1 %vm4024_vm0, %v4023_v0  ;;  %3796 = vmatpush3.bf16.msra.mxu1 %v1836_v42 }
 0xc40   : > { %3807 = vmatprep.subr.bf16.mxu1 %v4023_v0 }
 0xc8b   : > { %v1648_v4 = vpop.f32.mrf.mxu1 }
 0xc8c   : > { %v1654_v9 = vmul.f32 0.35355338, %v1648_v4 }
 0xc8d   : > { %v3775_v5 = vpop.f32.mrf.mxu1 }
 0xc8e   : > { %v1656_v6 = vsel %vm1655_vm5, %v1654_v9, -inf }
 0xc8f   : > { %1657 = vmax.xlane.f32.xlu0 %v1656_v6  ;;  %v1651_v7 = vpop.f32.mrf.mxu1 }
 0xc91   : > { %v3776_v8 = vpop.f32.mrf.mxu1 }
 0xcfe   : > { %v1764_v10 = vpop.f32.mrf.mxu1 }
 0xcff   : > { %v1770_v11 = vmul.f32 0.35355338, %v1764_v10 }
 0xd00   : > { %v3787_v12 = vpop.f32.mrf.mxu1 }
 0xd01   : > { %v1771_v13 = vsel %vm1655_vm5, %v1770_v11, -inf }
 0xd02   : > { %1772 = vmax.xlane.f32.xlu1 %v1771_v13  ;;  %v1767_v14 = vpop.f32.mrf.mxu1 }
 0xd04   : > { %v3788_v15 = vpop.f32.mrf.mxu1 }
 0xd13   : > { %1783 = vrot.lane.b32.xlu1 %v4379_v53, %s4027_s25 }
 0xd17   : > { %1926 = vrot.lane.b32.xlu1 %v4379_v53, %s4030_s27 }
 0xd18   : > { %v1658_v16 = vpop.xlane.xlu0 %1657 }
 0xd19   : > { %v1659_v17 = vsub.f32 %v1654_v9, %v1658_v16 }
 0xd1b   : > { %v1660_v20 = vmul.f32 1.442695, %v1659_v17 }
 0xd1d   : > { %3964 = vpow2.f32 %v1660_v20 }
 0xd2a   : > { %v3965_v21 = vpop.eup %3964 }
 0xd2b   : > { %v1662_v22 = vsel %vm1655_vm5, %v3965_v21, 0.0 }
 0xd2c   : > { %1663 = vadd.xlane.f32.xlu0 %v1662_v22 }
 0xd8b   : > { %v1773_v23 = vpop.xlane.xlu1 %1772 }
 0xd8c   : > { %v1774_v24 = vsub.f32 %v1770_v11, %v1773_v23 }
 0xd8e   : > { %v1775_v25 = vmul.f32 1.442695, %v1774_v24 }
 0xd8f   : > { %v1784_v34 = vpop.permute.xlu1 %1783 }
 0xd90   : > { %3966 = vpow2.f32 %v1775_v25  ;;  %v1789_v35 = vsel %vm1674_vm6, %v1784_v34, 0 }
 0xd93   : > { %v1927_v49 = vpop.permute.xlu1 %1926 }
 0xd94   : > { %v1932_v54 = vsel %vm793_vm2, %v1927_v49, 0 }
 0xd9d   : > { %v3967_v26 = vpop.eup %3966 }
 0xd9e   : > { %v1777_v27 = vsel %vm1655_vm5, %v3967_v26, 0.0 }
 0xd9f   : > { %1778 = vadd.xlane.f32.xlu0 %v1777_v27 }
 0xdb5   : > { %1669 = vrot.lane.b32.xlu0 %v4379_v53, %s4834_s5  ;;  %v1664_v28 = vpop.xlane.xlu0 %1663 }
 0xdb6   : > { %3968 = vrcp.f32 %v1664_v28 }
 0xdb9   : > { %1924 = vrot.lane.b32.xlu0 %v4389_v62, %s4030_s27 }
 0xdc3   : > { %v3969_v29 = vpop.eup %3968 }
 0xdc4   : > { %v1666_v31 = vmul.f32 %v3969_v29, %v3965_v21 }
 0xdc6   : > { %v1667_v3 = vpack.c.bf16 %v1666_v31, %v1666_v31 }
 0xe28   : > { %v1779_v30 = vpop.xlane.xlu0 %1778 }
 0xe29   : > { %3970 = vrcp.f32 %v1779_v30 }
 0xe2c   : > { %v1670_v32 = vpop.permute.xlu0 %1669 }
 0xe2d   : > { %v1676_v33 = vsel %vm1674_vm6, %v1670_v32, 0 }
 0xe2e   : > { %3778 = vmatpush3.bf16.msra.mxu0 %v1676_v33 }
 0xe2f   : > { %3789 = vmatprep.subr.bf16.mxu0 %v4023_v0 }
 0xe30   : > { %v1925_v57 = vpop.permute.xlu0 %1924 }
 0xe31   : > { %3780 = vmatmul.mubr.msk.bf16.vlgmr.msra.gmra.mxu0 %vm1655_vm5, %v1667_v3 }
 0xe32   : > { %3790 = vmatpush3.bf16.msra.mxu0 %v1789_v35  ;;  %3791 = vmatprep.mubr.msk.bf16.mxu0 %vm4024_vm0, %v4023_v0 }
 0xe33   : > { %3801 = vmatprep.subr.bf16.mxu0 %v4023_v0 }
 0xe36   : > { %v3971_v36 = vpop.eup %3970 }
 0xe37   : > { %v1781_v37 = vmul.f32 %v3971_v36, %v3967_v26  ;;  %v1604_v26 = vld [vmem:[%s4801_s12 + $0x8] sm:$0xf] }
 0xe38   : > { %v2040_v27 = vsel %vm859_vm4, %v1604_v26, 0  ;;  %v4036_v26 = vmov 0  }
 0xe39   : > { %v1782_v38 = vpack.c.bf16 %v1781_v37, %v1781_v37 }
 0xe3b   : > { %3792 = vmatmul.mubr.msk.bf16.vlgmr.msra.gmra.mxu0 %vm1655_vm5, %v1782_v38 }
 0xe3c   : > { %3803 = vmatprep.mubr.msk.bf16.mxu0 %vm4024_vm0, %v4023_v0  ;;  %3802 = vmatpush3.bf16.msra.mxu0 %v1882_v40 }
 0xe3d   : > { %3813 = vmatprep.subr.bf16.mxu0 %v4023_v0 }
 0xef1   : > { %v1712_v43 = vpop.f32.mrf.mxu0 }
 0xef2   : > { %v1718_v44 = vpack.c.bf16 %v1712_v43, %v1712_v43 }
 0xef3   : > { %v3781_v45 = vpop.f32.mrf.mxu0 }
 0xef4   : > { %3804 = vmatmul.mubr.msk.bf16.vlgmr.msra.gmra.mxu0 %vm793_vm2, %v1718_v44 }
 0xef5   : > { %v1715_v46 = vpop.f32.mrf.mxu0  ;;  %3815 = vmatprep.mubr.msk.bf16.mxu0 %vm4024_vm0, %v4023_v0 }
 0xef7   : > { %v3782_v48 = vpop.f32.mrf.mxu0 }
 0xefb   : > { %v1825_v50 = vpop.f32.mrf.mxu0 }
 0xefc   : > { %v1831_v51 = vpack.c.bf16 %v1825_v50, %v1825_v50 }
 0xefd   : > { %v3793_v52 = vpop.f32.mrf.mxu0 }
 0xefe   : > { %3798 = vmatmul.mubr.msk.bf16.vlgmr.msra.gmra.mxu1 %vm793_vm2, %v1831_v51 }
 0xeff   : > { %3808 = vmatpush3.bf16.xpose.msra.mxu1 %v1932_v54  ;;  %v1828_v55 = vpop.f32.mrf.mxu0  ;;  %3809 = vmatprep.mubr.msk.bf16.mxu1 %vm4024_vm0, %v4023_v0 }
 0xf00   : > { %3819 = vmatprep.subr.bf16.mxu1 %v4023_v0 }
 0xf01   : > { %v3794_v56 = vpop.f32.mrf.mxu0 }
 0xf06   : > { %3810 = vmatmul.mubr.msk.bf16.vlgmr.msra.gmra.mxu1 %vm793_vm2, %v1925_v57 }
 0xf07   : > { %3821 = vmatprep.mubr.msk.bf16.mxu1 %vm4024_vm0, %v4023_v0  ;;  %3820 = vmatpush3.bf16.msra.mxu1 %v2040_v27 }
 0xf08   : > { %3831 = vmatprep.subr.bf16.mxu1 %v4023_v0 }
 0xfb4   : > { %v1918_v58 = vpop.f32.mrf.mxu0 }
 0xfb6   : > { %v3805_v59 = vpop.f32.mrf.mxu0 }
 0xfb8   : > { %v1921_v60 = vpop.f32.mrf.mxu0 }
 0xfba   : > { %v3806_v61 = vpop.f32.mrf.mxu0 }
 0xfbe   : > { %v1872_v19 = vpop.f32.mrf.mxu1 }
 0xfbf   : > { %v4445_v63 = vadd.f32 %v1918_v58, %v1872_v19  ;;  %v3438_v19 = vld [vmem:[%s4802_s13] ss:$0 sm:$0xff] }
 0xfc0   : > { %v3799_v1 = vpop.f32.mrf.mxu1 }
 0xfc2   : > { %v1875_v2 = vpop.f32.mrf.mxu1 }
 0xfc4   : > { %v3800_v4 = vpop.f32.mrf.mxu1 }
 0xfc6   : > { %v1968_v9 = vpop.f32.mrf.mxu1 }
 0xfc7   : > { %v1974_v5 = vmul.f32 0.35355338, %v1968_v9 }
 0xfc8   : > { %v3811_v6 = vpop.f32.mrf.mxu1 }
 0xfc9   : > { %v1975_v7 = vsel %vm1655_vm5, %v1974_v5, -inf }
 0xfca   : > { %1976 = vmax.xlane.f32.xlu1 %v1975_v7  ;;  %v1971_v8 = vpop.f32.mrf.mxu1 }
 0xfcc   : > { %v3812_v10 = vpop.f32.mrf.mxu1 }
 0xfdb   : > { %2085 = vrot.lane.b32.xlu1 %v4379_v53, %s4835_s2 }
 0xfdf   : > { %2083 = vrot.lane.b32.xlu1 %v4389_v62, %s4835_s2 }
0x1053   : > { %v1977_v11 = vpop.xlane.xlu1 %1976 }
0x1054   : > { %v1978_v12 = vsub.f32 %v1974_v5, %v1977_v11 }
0x1056   : > { %v1979_v13 = vmul.f32 1.442695, %v1978_v12 }
0x1057   : > { %v2086_v22 = vpop.permute.xlu1 %2085 }
0x1058   : > { %3972 = vpow2.f32 %v1979_v13  ;;  %v2091_v24 = vsel %vm793_vm2, %v2086_v22, 0  ;;  %v2289_v13 = vld [vmem:[%s4805_s16 + $0x40] sm:$0xff] }
0x1059   : > { %v2285_v22 = vld [vmem:[%s4805_s16 + $0x20] sm:$0xff] }
0x105b   : > { %v2084_v25 = vpop.permute.xlu1 %2083 }
0x1065   : > { %v3973_v14 = vpop.eup %3972 }
0x1066   : > { %v1981_v15 = vsel %vm1655_vm5, %v3973_v14, 0.0 }
0x1067   : > { %1982 = vadd.xlane.f32.xlu0 %v1981_v15 }
0x107d   : > { %1987 = vrot.lane.b32.xlu0 %v4379_v53, %s4836_s0 }
0x10f0   : > { %v1983_v16 = vpop.xlane.xlu0 %1982 }
0x10f1   : > { %3974 = vrcp.f32 %v1983_v16  ;;  %v2294_v16 = vld [vmem:[%s4805_s16 + $0x68] sm:$0xff] }
0x10f4   : > { %v1988_v17 = vpop.permute.xlu0 %1987 }
0x10f5   : > { %v1993_v20 = vsel %vm1674_vm6, %v1988_v17, 0 }
0x10f6   : > { %3814 = vmatpush3.bf16.msra.mxu0 %v1993_v20 }
0x10f7   : > { %3825 = vmatprep.subr.bf16.mxu0 %v4023_v0 }
0x10fe   : > { %v3975_v62 = vpop.eup %3974 }
0x10ff   : > { %v1985_v21 = vmul.f32 %v3975_v62, %v3973_v14  ;;  %v2293_v14 = vld [vmem:[%s4805_s16 + $0x60] sm:$0xff] }
0x1100   : > { %v3450_v15 = vcombine.high %v2289_v13, %v2293_v14  ;;  %v3449_v17 = vcombine.low %v2289_v13, %v2293_v14  ;;  %v3902_v13 = vld [vmem:[%s4807_s18 + $0x50] sm:$0xff]  }
0x1101   : > { %v1986_v23 = vpack.c.bf16 %v1985_v21, %v1985_v21  ;;  %v2281_v21 = vld [vmem:[%s4805_s16] sm:$0xff]  ;;  %v3903_v14 = vld [vmem:[%s4807_s18 + $0xd0] sm:$0xff]  }
0x1102   : > { %v3441_v27 = vcombine.low %v2281_v21, %v2285_v22 }
0x1103   : > { %3816 = vmatmul.mubr.msk.bf16.vlgmr.msra.gmra.mxu0 %vm1655_vm5, %v1986_v23  ;;  %v2282_v23 = vld [vmem:[%s4805_s16 + $0x8] sm:$0xff] }
0x1104   : > { %3826 = vmatpush3.bf16.xpose.msra.mxu0 %v2091_v24  ;;  %3827 = vmatprep.mubr.msk.bf16.mxu0 %vm4024_vm0, %v4023_v0  ;;  %v3442_v24 = vcombine.high %v2281_v21, %v2285_v22  ;;  %v3910_v21 = vld [vmem:[%s4807_s18 + $0x40] sm:$0xff]  }
0x1105   : > { %3837 = vmatprep.subr.bf16.mxu0 %v4023_v0  ;;  %v3911_v22 = vld [vmem:[%s4807_s18 + $0xc0] sm:$0xff]  }
0x110b   : > { %3828 = vmatmul.mubr.msk.bf16.vlgmr.msra.gmra.mxu0 %vm793_vm2, %v2084_v25  ;;  %v2286_v25 = vld [vmem:[%s4805_s16 + $0x28] sm:$0xff] }
0x110c   : > { %3839 = vmatprep.mubr.msk.bf16.mxu0 %vm4024_vm0, %v4023_v0 }
0x11c3   : > { %v2029_v28 = vpop.f32.mrf.mxu0 }
0x11c4   : > { %v2035_v29 = vpack.c.bf16 %v2029_v28, %v2029_v28  ;;  %v3444_v28 = vcombine.high %v2282_v23, %v2286_v25 }
0x11c5   : > { %v3817_v30 = vpop.f32.mrf.mxu0 }
0x11c6   : > { %3822 = vmatmul.mubr.msk.bf16.vlgmr.msra.gmra.mxu1 %vm793_vm2, %v2035_v29  ;;  %v3443_v29 = vcombine.low %v2282_v23, %v2286_v25  ;;  %v2291_v30 = vld [vmem:[%s4805_s16 + $0x50] sm:$0xff]  ;;  %v3912_v23 = vld [vmem:[%s4807_s18] sm:$0xff]   ;;  %v3914_v25 = vld [vmem:[%s4807_s18 + $0x178] sm:$0xff]  }
0x11c7   : > { %v2032_v31 = vpop.f32.mrf.mxu0  ;;  %3833 = vmatprep.mubr.msk.bf16.mxu1 %vm4024_vm0, %v4023_v0 }
0x11c8   : > { %v2295_v31 = vld [vmem:[%s4805_s16 + $0x70] sm:$0xff] }
0x11c9   : > { %v3818_v32 = vpop.f32.mrf.mxu0 }
0x11ca   : > { %v2292_v32 = vld [vmem:[%s4805_s16 + $0x58] sm:$0xff] }
0x11cb   : > { %v2127_v33 = vpop.f32.mrf.mxu0 }
0x11cc   : > { %v2133_v34 = vmul.f32 0.35355338, %v2127_v33  ;;  %v3454_v33 = vcombine.high %v2291_v30, %v2295_v31 }
0x11cd   : > { %v3829_v3 = vpop.f32.mrf.mxu0 }
0x11ce   : > { %v2134_v35 = vsel %vm1655_vm5, %v2133_v34, -inf  ;;  %v3453_v3 = vcombine.low %v2291_v30, %v2295_v31  ;;  %v2305_v30 = vsub.s32 1, %v4231_v18  ;;  %v2313_v31 = vsub.s32 3, %v4231_v18 }
0x11cf   : > { %2135 = vmax.xlane.f32.xlu0 %v2134_v35  ;;  %v2130_v36 = vpop.f32.mrf.mxu0 }
0x11d1   : > { %v3830_v37 = vpop.f32.mrf.mxu0 }
0x11e5   : > { %2146 = vrot.lane.b32.xlu0 %v4379_v53, %s4837_s4  ;;  %v1605_v53 = vld [vmem:[%s4801_s12 + $0xc] sm:$0xf] }
0x11e6   : > { %v2199_v48 = vsel %vm859_vm4, %v1605_v53, 0  ;;  %v2288_v53 = vld [vmem:[%s4805_s16 + $0x38] sm:$0xff] }
0x11e7   : > { %3838 = vmatpush3.bf16.msra.mxu0 %v2199_v48 }
0x1258   : > { %v2136_v38 = vpop.xlane.xlu0 %2135 }
0x1259   : > { %v2137_v39 = vsub.f32 %v2133_v34, %v2136_v38  ;;  %v2296_v34 = vld [vmem:[%s4805_s16 + $0x78] sm:$0xff] }
0x125a   : > { %v3455_v35 = vcombine.low %v2292_v32, %v2296_v34  ;;  %v3456_v36 = vcombine.high %v2292_v32, %v2296_v34 }
0x125b   : > { %v2138_v40 = vmul.f32 1.442695, %v2137_v39 }
0x125c   : > { %v2147_v41 = vpop.permute.xlu0 %2146 }
0x125d   : > { %3976 = vpow2.f32 %v2138_v40  ;;  %v2152_v42 = vsel %vm1674_vm6, %v2147_v41, 0  ;;  %v3439_v41 = vld [vmem:[%s4803_s14] ss:$0 sm:$0xff] }
0x125e   : > { %3832 = vmatpush3.bf16.msra.mxu1 %v2152_v42 }
0x125f   : > { %2434 = vmatprep.subr.bf16.mxu1 %v3450_v15  ;;  %v3905_v15 = vld [vmem:[%s4807_s18 + $0x90] sm:$0xff]  }
0x126a   : > { %v3977_v0 = vpop.eup %3976 }
0x126b   : > { %v2140_v43 = vsel %vm1655_vm5, %v3977_v0, 0.0 }
0x126c   : > { %2141 = vadd.xlane.f32.xlu1 %v2140_v43 }
0x1286   : > { %v2076_v44 = vpop.f32.mrf.mxu1 }
0x1287   : > { %v2082_v45 = vadd.f32 %v2076_v44, %v4445_v63  ;;  %v2283_v44 = vld [vmem:[%s4805_s16 + $0x10] sm:$0xff] }
0x1288   : > { %v3823_v46 = vpop.f32.mrf.mxu1 }
0x1289   : > { %v2284_v46 = vld [vmem:[%s4805_s16 + $0x18] sm:$0xff] }
0x128a   : > { %v2079_v49 = vpop.f32.mrf.mxu1 }
0x128c   : > { %v3824_v50 = vpop.f32.mrf.mxu1 }
0x12f5   : > { %v2142_v51 = vpop.xlane.xlu1 %2141 }
0x12f6   : > { %3978 = vrcp.f32 %v2142_v51  ;;  %v3448_v51 = vcombine.high %v2284_v46, %v2288_v53 }
0x1303   : > { %v3979_v52 = vpop.eup %3978 }
0x1304   : > { %v2144_v54 = vmul.f32 %v3979_v52, %v3977_v0  ;;  %v3440_v0 = vld [vmem:[%s4804_s15] ss:$0 sm:$0xff] }
0x1306   : > { %v2145_v55 = vpack.c.bf16 %v2144_v54, %v2144_v54  ;;  %v3447_v54 = vcombine.low %v2284_v46, %v2288_v53 }
0x1308   : > { %3834 = vmatmul.mubr.msk.bf16.vlgmr.msra.gmra.mxu1 %vm1655_vm5, %v2145_v55  ;;  %v3882_v55 = vld [vmem:[%s4807_s18 + $0x78] sm:$0xff]  }
0x1309   : > { %2454 = vmatprep.mubr.bf16.mxu1 %v4036_v26  ;;  %2435 = vmatpush1.bf16.msra.mxu1 %v3449_v17  ;;  %v3907_v17 = vld [vmem:[%s4807_s18 + $0xc8] sm:$0xff]  }
0x130a   : > { %2436 = vmatprep.subr.bf16.mxu1 %v3442_v24  ;;  %v3913_v24 = vld [vmem:[%s4807_s18 + $0x80] sm:$0xff]  }
0x130d   : > { %2437 = vmatpush1.bf16.msra.mxu1 %v3441_v27  ;;  %v2301_v27 = vsub.s32 0, %v4231_v18 }
0x130e   : > { %2516 = vmatprep.subr.bf16.mxu1 %v3454_v33 }
0x13c8   : > { %v2188_v56 = vpop.f32.mrf.mxu1 }
0x13c9   : > { %v2194_v57 = vpack.c.bf16 %v2188_v56, %v2188_v56  ;;  %v3883_v56 = vld [vmem:[%s4807_s18 + $0xf8] sm:$0xff]  }
0x13ca   : > { %v3835_v58 = vpop.f32.mrf.mxu1 }
0x13cb   : > { %3840 = vmatmul.mubr.msk.bf16.vlgmr.msra.gmra.mxu0 %vm793_vm2, %v2194_v57  ;;  %v3884_v57 = vld [vmem:[%s4807_s18 + $0x38] sm:$0xff]  }
0x13cc   : > { %v2191_v59 = vpop.f32.mrf.mxu1  ;;  %2495 = vmatprep.mubr.bf16.mxu0 %v4036_v26  ;;  %v3885_v58 = vld [vmem:[%s4807_s18 + $0xb8] sm:$0xff]  }
0x13cd   : > { %v3886_v59 = vld [vmem:[%s4807_s18 + $0x70] sm:$0xff]  }
0x13ce   : > { %v3836_v60 = vpop.f32.mrf.mxu1 }
0x13cf   : > { %v3887_v60 = vld [vmem:[%s4807_s18 + $0xf0] sm:$0xff]  }
0x148b   : > { %v2235_v61 = vpop.f32.mrf.mxu0 }
0x148c   : > { %v2241_v63 = vadd.f32 %v2235_v61, %v2082_v45  ;;  %v2287_v45 = vld [vmem:[%s4805_s16 + $0x30] sm:$0xff] }
0x148d   : > { %v3841_v1 = vpop.f32.mrf.mxu0  ;;  %v3446_v50 = vcombine.high %v2283_v44, %v2287_v45  ;;  %v3445_v52 = vcombine.low %v2283_v44, %v2287_v45  ;;  %v3888_v61 = vld [vmem:[%s4807_s18 + $0x30] sm:$0xff]  }
0x148e   : > { %v2249_v2 = vadd.f32 %v3438_v19, %v2241_v63  ;;  %v3889_v19 = vld [vmem:[%s4807_s18 + $0xb0] sm:$0xff]   ;;  %v3890_v63 = vld [vmem:[%s4807_s18 + $0x68] sm:$0xff]  }
0x148f   : > { %v2238_v4 = vpop.f32.mrf.mxu0  ;;  %v3891_v1 = vld [vmem:[%s4807_s18 + $0xe8] sm:$0xff]  }
0x1490   : > { %v2252_v9 = vadd.f32 %v2249_v2, %v4369_v47  ;;  %v2290_v47 = vld [vmem:[%s4805_s16 + $0x48] sm:$0xff] }
0x1491   : > { %v3842_v5 = vpop.f32.mrf.mxu0  ;;  %v3451_v20 = vcombine.low %v2290_v47, %v2294_v16  ;;  %v3452_v62 = vcombine.high %v2290_v47, %v2294_v16  ;;  %v3892_v2 = vld [vmem:[%s4807_s18 + $0x28] sm:$0xff]   ;;  %v3904_v47 = vld [vmem:[%s4807_s18 + $0x10] sm:$0xff]  }
0x1492   : > { %v2253_v6 = vsel %vm736_vm1, %v2252_v9, 0.0  ;;  %v3893_v4 = vld [vmem:[%s4807_s18 + $0xa8] sm:$0xff]   ;;  %v3895_v5 = vld [vmem:[%s4807_s18 + $0xe0] sm:$0xff]  }
0x1493   : > { %2254 = vadd.xlane.f32.xlu1 %v2253_v6  ;;  %2475 = vmatprep.subr.bf16.mxu0 %v3452_v62  ;;  %v3896_v6 = vld [vmem:[%s4807_s18 + $0x20] sm:$0xff]   ;;  %v3906_v16 = vld [vmem:[%s4807_s18 + $0x48] sm:$0xff]  }
0x1494   : > { %2476 = vmatpush1.bf16.msra.mxu0 %v3451_v20  ;;  %v3908_v20 = vld [vmem:[%s4807_s18 + $0x8] sm:$0xff]  }
0x1495   : > { %2477 = vmatprep.subr.bf16.mxu0 %v3444_v28  ;;  %v3909_v62 = vld [vmem:[%s4807_s18 + $0x88] sm:$0xff]   ;;  %v2309_v28 = vsub.s32 2, %v4231_v18 }
0x1498   : > { %2478 = vmatpush1.bf16.msra.mxu0 %v3443_v29  ;;  %v4660_v29 = vld [vmem:[%s4806_s17] sm:$0xff] }
0x1499   : > { %2557 = vmatprep.subr.bf16.mxu0 %v3456_v36  ;;  %v2302_v32 = vrot.slane %v4660_v29, %v2301_v27  ;;  %v2310_v33 = vrot.slane %v4660_v29, %v2309_v28  ;;  %v2306_v34 = vrot.slane %v4660_v29, %v2305_v30  ;;  %v3931_v27 = vld [vmem:[%s4807_s18 + $0x1d8] sm:$0xff]  }
0x149a   : > { %v3932_v28 = vld [vmem:[%s4807_s18 + $0x118] sm:$0xff]  }
0x149b   : > { %v3933_v30 = vld [vmem:[%s4807_s18 + $0x198] sm:$0xff]  }
0x151c   : > { %v2255_v7 = vpop.xlane.xlu1 %2254 }
0x151d   : > { %v2256_v8 = vmul.f32 0.03125, %v2255_v7  ;;  %v3897_v7 = vld [vmem:[%s4807_s18 + $0xa0] sm:$0xff]  }
0x151f   : > { %v2257_v10 = vsub.f32 %v2252_v9, %v2256_v8  ;;  %v3894_v9 = vld [vmem:[%s4807_s18 + $0x60] sm:$0xff]   ;;  %v3898_v8 = vld [vmem:[%s4807_s18 + $0x58] sm:$0xff]  }
0x1521   : > { %v2258_v11 = vmul.f32 %v2257_v10, %v2257_v10 }
0x1523   : > { %v2259_v12 = vsel %vm736_vm1, %v2258_v11, 0.0  ;;  %v3900_v11 = vld [vmem:[%s4807_s18 + $0x18] sm:$0xff]  }
0x1524   : > { %2260 = vadd.xlane.f32.xlu1 %v2259_v12  ;;  %v3901_v12 = vld [vmem:[%s4807_s18 + $0x98] sm:$0xff]  }
0x15ad   : > { %v2261_v37 = vpop.xlane.xlu1 %2260 }
0x15ae   : > { %v2262_v38 = vmul.f32 0.03125, %v2261_v37 }
0x15b0   : > { %v2263_v39 = vadd.f32 1e-05, %v2262_v38 }
0x15b2   : > { %3980 = vrsqrt.f32 %v2263_v39 }
0x15bf   : > { %v3981_v40 = vpop.eup %3980 }
0x15c0   : > { %v2265_v42 = vmul.f32 %v3981_v40, %v2257_v10  ;;  %v3899_v10 = vld [vmem:[%s4807_s18 + $0xd8] sm:$0xff]  }
0x15c2   : > { %v2272_v43 = vmul.f32 %v3439_v41, %v2265_v42 }
0x15c4   : > { %v4545_v48 = vadd.f32 %v3440_v0, %v2272_v43  ;;  %v2321_v0 = vsub.s32 5, %v4231_v18  ;;  %v2329_v43 = vsub.s32 7, %v4231_v18 }
0x15c6   : > { %v2280_v49 = vpack.c.bf16 %v4545_v48, %v4545_v48 }
0x15c8   : > { %3457 = vmatmul.mubr.msk.bf16.vlgmr.msra.gmra.mxu1 %vm736_vm1, %v2280_v49  ;;  %3458 = vmatmul.mubr.msk.bf16.vlgmr.msra.gmra.mxu0 %vm736_vm1, %v2280_v49 }
0x15c9   : > { %2517 = vmatpush1.bf16.msra.mxu1 %v3453_v3  ;;  %2558 = vmatpush1.bf16.msra.mxu0 %v3455_v35  ;;  %v2314_v3 = vrot.slane %v4660_v29, %v2313_v31  ;;  %v2317_v31 = vsub.s32 4, %v4231_v18 }
0x15ca   : > { %2518 = vmatprep.subr.bf16.mxu1 %v3446_v50  ;;  %2559 = vmatprep.subr.bf16.mxu0 %v3448_v51 }
0x15cb   : > { %2536 = vmatprep.mubr.bf16.mxu1 %v4036_v26  ;;  %2577 = vmatprep.mubr.bf16.mxu0 %v4036_v26  ;;  %v3915_v26 = vld [vmem:[%s4807_s18 + $0x1f8] sm:$0xff]  }
0x15cd   : > { %2519 = vmatpush1.bf16.msra.mxu1 %v3445_v52  ;;  %2560 = vmatpush1.bf16.msra.mxu0 %v3447_v54 }
0x15ce   : > { %3587 = vmatprep.subr.bf16.mxu1 %v3882_v55  ;;  %3609 = vmatprep.subr.bf16.mxu0 %v3883_v56  ;;  %v2322_v56 = vrot.slane %v4660_v29, %v2321_v0  ;;  %v3943_v0 = vld [vmem:[%s4807_s18 + $0x1c0] sm:$0xff]  }
0x15d0   : > { %3459 = vmatmul.mubr.msk.bf16.vlgmr.msra.gmra.mxu1 %vm736_vm1, %v2280_v49  ;;  %3460 = vmatmul.mubr.msk.bf16.vlgmr.msra.gmra.mxu0 %vm736_vm1, %v2280_v49 }
0x15d1   : > { %3588 = vmatpush3.bf16.msra.mxu1 %v3884_v57  ;;  %3610 = vmatpush3.bf16.msra.mxu0 %v3885_v58  ;;  %v2330_v57 = vrot.slane %v4660_v29, %v2329_v43  ;;  %v3916_v58 = vld [vmem:[%s4807_s18 + $0x138] sm:$0xff]   ;;  %v3944_v43 = vld [vmem:[%s4807_s18 + $0x100] sm:$0xff]  }
0x15d2   : > { %3589 = vmatprep.subr.bf16.mxu1 %v3886_v59  ;;  %3611 = vmatprep.subr.bf16.mxu0 %v3887_v60  ;;  %v3917_v59 = vld [vmem:[%s4807_s18 + $0x1b8] sm:$0xff]  }
0x15d5   : > { %3590 = vmatpush3.bf16.msra.mxu1 %v3888_v61  ;;  %3612 = vmatpush3.bf16.msra.mxu0 %v3889_v19 }
0x15d6   : > { %3591 = vmatprep.subr.bf16.mxu1 %v3890_v63  ;;  %3613 = vmatprep.subr.bf16.mxu0 %v3891_v1  ;;  %v3918_v1 = vld [vmem:[%s4807_s18 + $0x170] sm:$0xff]  }
0x15d9   : > { %3592 = vmatpush3.bf16.msra.mxu1 %v3892_v2  ;;  %3614 = vmatpush3.bf16.msra.mxu0 %v3893_v4  ;;  %v3919_v2 = vld [vmem:[%s4807_s18 + $0x1f0] sm:$0xff]  }
0x15da   : > { %3593 = vmatprep.subr.bf16.mxu1 %v3894_v9  ;;  %3615 = vmatprep.subr.bf16.mxu0 %v3895_v5 }
0x15dd   : > { %3594 = vmatpush3.bf16.msra.mxu1 %v3896_v6  ;;  %3616 = vmatpush3.bf16.msra.mxu0 %v3897_v7  ;;  %v3920_v7 = vld [vmem:[%s4807_s18 + $0x130] sm:$0xff]  }
0x15de   : > { %3595 = vmatprep.subr.bf16.mxu1 %v3898_v8  ;;  %3617 = vmatprep.subr.bf16.mxu0 %v3899_v10  ;;  %v3921_v8 = vld [vmem:[%s4807_s18 + $0x1b0] sm:$0xff]  }
0x15e1   : > { %3596 = vmatpush3.bf16.msra.mxu1 %v3900_v11  ;;  %3618 = vmatpush3.bf16.msra.mxu0 %v3901_v12  ;;  %v3922_v12 = vld [vmem:[%s4807_s18 + $0x168] sm:$0xff]  }
0x15e2   : > { %3597 = vmatprep.subr.bf16.mxu1 %v3902_v13  ;;  %3619 = vmatprep.subr.bf16.mxu0 %v3903_v14  ;;  %v3923_v13 = vld [vmem:[%s4807_s18 + $0x1e8] sm:$0xff]  }
0x15e5   : > { %3598 = vmatpush3.bf16.msra.mxu1 %v3904_v47  ;;  %3620 = vmatpush3.bf16.msra.mxu0 %v3905_v15 }
0x15e6   : > { %3599 = vmatprep.subr.bf16.mxu1 %v3906_v16  ;;  %3621 = vmatprep.subr.bf16.mxu0 %v3907_v17 }
0x15e9   : > { %3600 = vmatpush3.bf16.msra.mxu1 %v3908_v20  ;;  %3622 = vmatpush3.bf16.msra.mxu0 %v3909_v62  ;;  %v3924_v62 = vld [vmem:[%s4807_s18 + $0x128] sm:$0xff]  }
0x15ea   : > { %3601 = vmatprep.subr.bf16.mxu1 %v3910_v21  ;;  %3623 = vmatprep.subr.bf16.mxu0 %v3911_v22  ;;  %v3925_v21 = vld [vmem:[%s4807_s18 + $0x1a8] sm:$0xff]   ;;  %v3926_v22 = vld [vmem:[%s4807_s18 + $0x160] sm:$0xff]  }
0x15ed   : > { %3602 = vmatpush3.bf16.msra.mxu1 %v3912_v23  ;;  %3624 = vmatpush3.bf16.msra.mxu0 %v3913_v24  ;;  %v3927_v23 = vld [vmem:[%s4807_s18 + $0x1e0] sm:$0xff]  }
0x15ee   : > { %3631 = vmatprep.subr.bf16.mxu1 %v3914_v25  ;;  %3653 = vmatprep.subr.bf16.mxu0 %v3915_v26  ;;  %v3928_v24 = vld [vmem:[%s4807_s18 + $0x120] sm:$0xff]   ;;  %v3930_v26 = vld [vmem:[%s4807_s18 + $0x158] sm:$0xff]  }
0x15ef   : > { %v3929_v25 = vld [vmem:[%s4807_s18 + $0x1a0] sm:$0xff]  }
0x1688   : > { %v2456_v35 = vpop.f32.mrf.mxu1  ;;  %v2497_v36 = vpop.f32.mrf.mxu0 }
0x1689   : > { %v2457_v37 = vadd.f32 %v2456_v35, %v2302_v32  ;;  %v2498_v38 = vadd.f32 %v2497_v36, %v2310_v33  ;;  %v2325_v32 = vsub.s32 6, %v4231_v18  ;;  %v3934_v33 = vld [vmem:[%s4807_s18 + $0x150] sm:$0xff]   ;;  %v2318_v35 = vrot.slane %v4660_v29, %v2317_v31 }
0x168a   : > { %v2458_v39 = vpop.f32.mrf.mxu1  ;;  %v2499_v40 = vpop.f32.mrf.mxu0  ;;  %v3937_v18 = vld [vmem:[%s4807_s18 + $0x190] sm:$0xff]  }
0x168b   : > { %v2459_v41 = vadd.f32 %v2458_v39, %v2306_v34  ;;  %v2500_v42 = vadd.f32 %v2499_v40, %v2314_v3  ;;  %v2586_v44 = vmax.f32 %v2457_v37, 0.0  ;;  %v2588_v45 = vmax.f32 %v2498_v38, 0.0  ;;  %v3935_v34 = vld [vmem:[%s4807_s18 + $0x1d0] sm:$0xff]   ;;  %v3938_v37 = vld [vmem:[%s4807_s18 + $0x148] sm:$0xff]  }
0x168c   : > { %v2460_v46 = vpop.f32.mrf.mxu1  ;;  %v2501_v53 = vpop.f32.mrf.mxu0  ;;  %v3936_v3 = vld [vmem:[%s4807_s18 + $0x110] sm:$0xff]   ;;  %v2326_v36 = vrot.slane %v4660_v29, %v2325_v32  ;;  %v3939_v38 = vld [vmem:[%s4807_s18 + $0x1c8] sm:$0xff]  }
0x168d   : > { %v2587_v49 = vmax.f32 %v2459_v41, 0.0  ;;  %v2589_v50 = vmax.f32 %v2500_v42, 0.0  ;;  %v2594_v60 = vpack.c.bf16 %v2586_v44, %v2586_v44  ;;  %v2596_v61 = vpack.c.bf16 %v2588_v45, %v2588_v45  ;;  %v3940_v39 = vld [vmem:[%s4807_s18 + $0x108] sm:$0xff]   ;;  %v3942_v42 = vld [vmem:[%s4807_s18 + $0x140] sm:$0xff]  }
0x168e   : > { %v2461_v51 = vpop.f32.mrf.mxu1  ;;  %v2502_v52 = vpop.f32.mrf.mxu0  ;;  %v3941_v29 = vld [vmem:[%s4807_s18 + $0x188] sm:$0xff]   ;;  %v3945_v44 = vld [vmem:[%s4807_s18 + $0x180] sm:$0xff]  }
0x168f   : > { %v2595_v54 = vpack.c.bf16 %v2587_v49, %v2587_v49  ;;  %v2597_v55 = vpack.c.bf16 %v2589_v50, %v2589_v50 }
0x1690   : > { %v4678_v19 = vpop.f32.mrf.mxu1  ;;  %v4680_v63 = vpop.f32.mrf.mxu0 }
0x1691   : > { %3153 = vmatprep.mubr.bf16.mxu1 %v2595_v54  ;;  %3193 = vmatprep.mubr.bf16.mxu0 %v2597_v55  ;;  %v2539_v40 = vadd.f32 %v4678_v19, %v2318_v35  ;;  %v2580_v41 = vadd.f32 %v4680_v63, %v2326_v36 }
0x1692   : > { %v2540_v4 = vpop.f32.mrf.mxu1  ;;  %v2581_v9 = vpop.f32.mrf.mxu0  ;;  %3154 = vmatmul.mubr.bf16.vlgmr.msra.gmra.mxu1 %v2594_v60  ;;  %3194 = vmatmul.mubr.bf16.vlgmr.msra.gmra.mxu0 %v2596_v61  ;;  %v3461_v60 = vld [vmem:[%s4808_s19] ss:$0 sm:$0xff] }
0x1693   : > { %v2541_v5 = vadd.f32 %v2540_v4, %v2322_v56  ;;  %v2582_v6 = vadd.f32 %v2581_v9, %v2330_v57  ;;  %3632 = vmatpush3.bf16.msra.mxu1 %v3916_v58  ;;  %3654 = vmatpush3.bf16.msra.mxu0 %v3917_v59  ;;  %v2590_v45 = vmax.f32 %v2539_v40, 0.0  ;;  %v2592_v46 = vmax.f32 %v2580_v41, 0.0 }
0x1694   : > { %v2542_v10 = vpop.f32.mrf.mxu1  ;;  %v2583_v11 = vpop.f32.mrf.mxu0  ;;  %3633 = vmatprep.subr.bf16.mxu1 %v3918_v1  ;;  %3655 = vmatprep.subr.bf16.mxu0 %v3919_v2 }
0x1695   : > { %v2591_v14 = vmax.f32 %v2541_v5, 0.0  ;;  %v2593_v47 = vmax.f32 %v2582_v6, 0.0  ;;  %v2598_v53 = vpack.c.bf16 %v2590_v45, %v2590_v45  ;;  %v2600_v49 = vpack.c.bf16 %v2592_v46, %v2592_v46 }
0x1696   : > { %v2543_v15 = vpop.f32.mrf.mxu1  ;;  %v2584_v16 = vpop.f32.mrf.mxu0 }
0x1697   : > { %v2599_v17 = vpack.c.bf16 %v2591_v14, %v2591_v14  ;;  %v2601_v20 = vpack.c.bf16 %v2593_v47, %v2593_v47  ;;  %3634 = vmatpush3.bf16.msra.mxu1 %v3920_v7  ;;  %3656 = vmatpush3.bf16.msra.mxu0 %v3921_v8 }
0x1698   : > { %3635 = vmatprep.subr.bf16.mxu1 %v3922_v12  ;;  %3657 = vmatprep.subr.bf16.mxu0 %v3923_v13 }
0x1699   : > { %3233 = vmatprep.mubr.bf16.mxu1 %v2599_v17  ;;  %3273 = vmatprep.mubr.bf16.mxu0 %v2601_v20 }
0x169b   : > { %3636 = vmatpush3.bf16.msra.mxu1 %v3924_v62  ;;  %3658 = vmatpush3.bf16.msra.mxu0 %v3925_v21 }
0x169c   : > { %3637 = vmatprep.subr.bf16.mxu1 %v3926_v22  ;;  %3659 = vmatprep.subr.bf16.mxu0 %v3927_v23 }
0x169f   : > { %3638 = vmatpush3.bf16.msra.mxu1 %v3928_v24  ;;  %3660 = vmatpush3.bf16.msra.mxu0 %v3929_v25 }
0x16a0   : > { %3639 = vmatprep.subr.bf16.mxu1 %v3930_v26  ;;  %3661 = vmatprep.subr.bf16.mxu0 %v3931_v27  ;;  %v3527_v26 = vld [vmem:[#allocation2] ss:$0 sm:$0xff] }
0x16a3   : > { %3640 = vmatpush3.bf16.msra.mxu1 %v3932_v28  ;;  %3662 = vmatpush3.bf16.msra.mxu0 %v3933_v30 }
0x16a4   : > { %3641 = vmatprep.subr.bf16.mxu1 %v3934_v33  ;;  %3663 = vmatprep.subr.bf16.mxu0 %v3935_v34 }
0x16a7   : > { %3642 = vmatpush3.bf16.msra.mxu1 %v3936_v3  ;;  %3664 = vmatpush3.bf16.msra.mxu0 %v3937_v18 }
0x16a8   : > { %3643 = vmatprep.subr.bf16.mxu1 %v3938_v37  ;;  %3665 = vmatprep.subr.bf16.mxu0 %v3939_v38 }
0x16ab   : > { %3644 = vmatpush3.bf16.msra.mxu1 %v3940_v39  ;;  %3666 = vmatpush3.bf16.msra.mxu0 %v3941_v29 }
0x16ac   : > { %3645 = vmatprep.subr.bf16.mxu1 %v3942_v42  ;;  %3667 = vmatprep.subr.bf16.mxu0 %v3943_v0 }
0x16af   : > { %3646 = vmatpush3.bf16.msra.mxu1 %v3944_v43  ;;  %3668 = vmatpush3.bf16.msra.mxu0 %v3945_v44 }
0x16b2   : > { %3234 = vmatmul.mubr.bf16.vlgmr.msra.gmra.mxu1 %v2598_v53  ;;  %3274 = vmatmul.mubr.bf16.vlgmr.msra.gmra.mxu0 %v2600_v49 }
0x1752   : > { %v3603_v50 = vpop.f32.mrf.mxu1  ;;  %v3625_v51 = vpop.f32.mrf.mxu0 }
0x1754   : > { %v3604_v52 = vpop.f32.mrf.mxu1  ;;  %v3626_v54 = vpop.f32.mrf.mxu0 }
0x1755   : > { %v3605_v59 = vadd.f32 %v3604_v52, %v3603_v50  ;;  %v3627_v1 = vadd.f32 %v3626_v54, %v3625_v51 }
0x1756   : > { %v3606_v55 = vpop.f32.mrf.mxu1  ;;  %v3628_v56 = vpop.f32.mrf.mxu0 }
0x1757   : > { %v3156_v61 = vadd.f32 %v3605_v59, %v3461_v60 }
0x1758   : > { %v3607_v57 = vpop.f32.mrf.mxu1  ;;  %v3629_v58 = vpop.f32.mrf.mxu0 }
0x1759   : > { %v3196_v9 = vadd.f32 %v3627_v1, %v3156_v61 }
0x1772   : > { %v3647_v19 = vpop.f32.mrf.mxu1  ;;  %v3669_v63 = vpop.f32.mrf.mxu0 }
0x1774   : > { %v3648_v2 = vpop.f32.mrf.mxu1  ;;  %v3670_v4 = vpop.f32.mrf.mxu0 }
0x1775   : > { %v3649_v5 = vadd.f32 %v3648_v2, %v3647_v19  ;;  %v3671_v10 = vadd.f32 %v3670_v4, %v3669_v63 }
0x1776   : > { %v3650_v6 = vpop.f32.mrf.mxu1  ;;  %v3672_v7 = vpop.f32.mrf.mxu0 }
0x1777   : > { %v3236_v8 = vadd.f32 %v3649_v5, %v3196_v9 }
0x1778   : > { %v3651_v11 = vpop.f32.mrf.mxu1  ;;  %v3673_v12 = vpop.f32.mrf.mxu0 }
0x1779   : > { %v3276_v13 = vadd.f32 %v3671_v10, %v3236_v8 }
0x177b   : > { %v3283_v14 = vadd.f32 %v3276_v13, %v4545_v48  ;;  %v3526_v48 = vld [vmem:[%s4809_s20] ss:$0 sm:$0xff] }
0x177d   : > { %v3284_v47 = vsel %vm736_vm1, %v3283_v14, 0.0 }
0x177e   : > { %3285 = vadd.xlane.f32.xlu1 %v3284_v47 }
0x1807   : > { %v3286_v15 = vpop.xlane.xlu1 %3285 }
0x1808   : > { %v3287_v16 = vmul.f32 0.03125, %v3286_v15 }
0x180a   : > { %v3288_v17 = vsub.f32 %v3283_v14, %v3287_v16 }
0x180c   : > { %v3289_v20 = vmul.f32 %v3288_v17, %v3288_v17 }
0x180e   : > { %v3290_v62 = vsel %vm736_vm1, %v3289_v20, 0.0 }
0x180f   : > { %3291 = vadd.xlane.f32.xlu1 %v3290_v62 }
0x1898   : > { %v3292_v21 = vpop.xlane.xlu1 %3291 }
0x1899   : > { %v3293_v22 = vmul.f32 0.03125, %v3292_v21 }
0x189b   : > { %v3294_v23 = vadd.f32 1e-05, %v3293_v22 }
0x189d   : > { %3982 = vrsqrt.f32 %v3294_v23 }
0x18aa   : > { %v3983_v24 = vpop.eup %3982 }
0x18ab   : > { %v3296_v25 = vmul.f32 %v3983_v24, %v3288_v17 }
0x18ad   : > { %v3303_v27 = vmul.f32 %v3526_v48, %v3296_v25 }
0x18af   : > { %v3310_v28 = vadd.f32 %v3527_v26, %v3303_v27 }
0x18b1   : > { %3311 = vst.msk [vmem:[%s708_s6] sm:$0xff] %vm736_vm1, %v3310_v28 }
0x18b2 PF: > { %s33_s3 = sadd.s32 1, %s4020_s3  }
0x18b3   : > { %p30_p1 = scmp.ge.s32.totalorder %s33_s3, 4  }
0x18b5   :  { %32 = sbr.rel (!%p30_p1) target bundleno = 9 (0x9), region = 146 }
0x18ba   :  { %3331 = vsyncpa [#allocation3], 1 }
0x18bb   :  { %3333 = vsyncpa [#allocation3 + $0x1], 1 }

// kernel: audio_decoder_forward.3
= control target key start
LH: loop header
LB: loop body
LE: loop exit
PB: predicated region body
PF: predicated region fallthrough
CT: control target
= control target key end

     0   :  { %s4701_s0 = inlined_call_operand.vmem [shape: f32[2,8,32], index: 0, kind: input, shape index: {}]   ;;  %s4702_s1 = inlined_call_operand.vmem [shape: f32[2,6,32], index: 1, kind: input, shape index: {}]   ;;  %s4703_s2 = inlined_call_operand.vmem [shape: bf16[32,96], index: 2, kind: input, shape index: {}]   ;;  %s4704_s3 = inlined_call_operand.vmem [shape: f32[1,96], index: 3, kind: input, shape index: {}]   ;;  %s4705_s4 = inlined_call_operand.vmem [shape: bf16[32,32], index: 4, kind: input, shape index: {}]   ;;  %s4706_s5 = inlined_call_operand.vmem [shape: f32[1,32], index: 5, kind: input, shape index: {}]   ;;  %s4707_s6 = inlined_call_operand.vmem [shape: f32[1,32], index: 6, kind: input, shape index: {}]   ;;  %s4708_s7 = inlined_call_operand.vmem [shape: f32[1,32], index: 7, kind: input, shape index: {}]   ;;  %s4709_s8 = inlined_call_operand.vmem [shape: bf16[32,32], index: 8, kind: input, shape index: {}]   ;;  %s4710_s9 = inlined_call_operand.vmem [shape: f32[1,32], index: 9, kind: input, shape index: {}]   ;;  %s4711_s10 = inlined_call_operand.vmem [shape: bf16[32,64], index: 10, kind: input, shape index: {}]   ;;  %s4712_s11 = inlined_call_operand.vmem [shape: f32[1,64], index: 11, kind: input, shape index: {}]   ;;  %s4713_s12 = inlined_call_operand.vmem [shape: bf16[32,32], index: 12, kind: input, shape index: {}]   ;;  %s4714_s13 = inlined_call_operand.vmem [shape: f32[1,32], index: 13, kind: input, shape index: {}]   ;;  %s4715_s14 = inlined_call_operand.vmem [shape: f32[1,32], index: 14, kind: input, shape index: {}]   ;;  %s4716_s15 = inlined_call_operand.vmem [shape: f32[1,32], index: 15, kind: input, shape index: {}]   ;;  %s4717_s16 = inlined_call_operand.vmem [shape: bf16[32,1024], index: 16, kind: input, shape index: {}]   ;;  %s4718_s17 = inlined_call_operand.vmem [shape: f32[1,1024], index: 17, kind: input, shape index: {}]   ;;  %s4719_s18 = inlined_call_operand.vmem [shape: bf16[1024,32], index: 18, kind: input, shape index: {}]   ;;  %s4720_s19 = inlined_call_operand.vmem [shape: f32[1,32], index: 19, kind: input, shape index: {}]   ;;  %s4721_s20 = inlined_call_operand.vmem [shape: f32[1,32], index: 20, kind: input, shape index: {}]   ;;  %s4722_s21 = inlined_call_operand.vmem [shape: f32[1,32], index: 21, kind: input, shape index: {}]   ;;  %s4723_s22 = inlined_call_operand.vmem [shape: f32[2,8,32], index: 22, kind: output, shape index: {}]  }
   0x1   :  { %4731 = sst [smem:[#allocation2_spill]] %s4701_s0 }
   0x2   :  { %4732 = sst [smem:[#allocation3_spill]] %s4702_s1 }
   0x3   :  { %4733 = sst [smem:[#allocation4_spill]] %s4703_s2 }
   0x4   :  { %4734 = sst [smem:[#allocation5_spill]] %s4704_s3  ;;  %s4083_s3 = smov 0  }
   0x5   :  { %4735 = sst [smem:[#allocation6_spill]] %s4705_s4 }
   0x6   :  { %4736 = sst [smem:[#allocation7_spill]] %s4706_s5 }
   0x7   :  { %4737 = sst [smem:[#allocation8_spill]] %s4707_s6 }
   0x8 LB: > { %s3364_s28 = sadd.s32 4294967295, %s3952_s3   ;;  %p3368_p0 = scmp.ge.s32.totalorder %s3952_s3, 1  ;;  %s3952_s3 = sphi %s4083_s3, %s32_s3  }
   0x9   : > { %p620_p1 = scmp.lt.s32.totalorder %s3952_s3, 3 }
   0xb   : > { %p621_p2 = pnand %p3368_p0, %p620_p1 }
   0xc   : > { %s4738_s4 = sld [smem:[#allocation4_spill]] (!%p621_p2)  ;;  %p684_p3 = scmp.lt.s32.totalorder (!%p621_p2), %s3364_s28, 1 }
   0xd   : > { %624 = sbr.rel (%p621_p2) target bundleno = 6300 (0x189c), region = 108  ;;  %s4739_s6 = sld [smem:[#allocation2_spill]] (!%p621_p2) }
   0xe   : > { %s4740_s27 = sld [smem:[#allocation5_spill]] (!%p621_p2)  ;;  %s4730_s29 = smov (!%p621_p2), 96  }
   0xf   : > { %s3958_s30 = smov (!%p621_p2), 88   ;;  %s3959_s0 = smov (!%p621_p2), 64  }
  0x10   : > { %s3960_s23 = smov (!%p621_p2), 56   ;;  %s3961_s5 = smov (!%p621_p2), 112  }
  0x11   : > { %s4727_s24 = smov (!%p621_p2), 80   ;;  %s4741_s26 = sld [smem:[#allocation6_spill]] (!%p621_p2) }
  0x12   : > { %v3838_v0 = vld [vmem:[%s4738_s4 + $0x8] sm:$0xff]   ;;  %v3954_v1 = vmov 0.0   ;;  %v3839_v2 = vld [vmem:[%s4738_s4] sm:$0xff]   ;;  %vm3955_vm0 = vmmov 0   ;;  %s4750_s28 = smov (!%p684_p3, %s3364_s28), 1  ;;  %vm723_vm1 = vcmask 261120   ;;  %v772_v17 = vlaneseq }
  0x13   : > { %3648 = vmatprep.subr.bf16.mxu0 %v3954_v1  ;;  %3656 = vmatprep.subr.bf16.mxu1 %v3954_v1  ;;  %s4104_s1 = sshll.u32 %s4750_s28, 3  ;;  %s3956_s28 = smov 120   ;;  %vm780_vm2 = vcmask 64512   ;;  %vm846_vm4 = vcmask 1043456   ;;  %vm1642_vm5 = vcmask 48128   ;;  %vm1661_vm6 = vcmask 1042432  }
  0x14   : > { %3649 = vmatpush3.bf16.msra.mxu0 %v3838_v0  ;;  %3652 = vmatprep.mubr.msk.bf16.mxu0 %vm3955_vm0, %v3954_v1  ;;  %s687_s25 = scalar_lea.vmem %s4739_s6, %s4104_s1  ;;  %v3372_v5 = vld [vmem:[%s4740_s27] ss:$0 sm:$0xff]  ;;  %v4140_v18 = vshrl.u32 %v772_v17, 7  ;;  %v4142_v19 = vand.u32 127, %v772_v17  ;;  %s3965_s6 = smov 48  }
  0x15   : > { %3650 = vmatprep.subr.bf16.mxu0 %v3954_v1  ;;  %3658 = vmatprep.mubr.msk.bf16.mxu1 %vm3955_vm0, %v3954_v1  ;;  %v4111_v3 = vld [vmem:[%s687_s25] sm:$0xff]  ;;  %s3966_s27 = smov 40   ;;  %s4747_s25 = smov 80  }
  0x16   : > { %v699_v4 = vpack.c.bf16 %v4111_v3, %v4111_v3  ;;  %vm776_vm3 = vcmp.gt.s32.totalorder %v4142_v19, %v4140_v18 }
  0x17   : > { %v767_v56 = vld [vmem:[%s4741_s26] sm:$0xf]  ;;  %v768_v58 = vld [vmem:[%s4741_s26 + $0x4] sm:$0xf] }
  0x18   : > { %3651 = vmatpush3.bf16.msra.mxu0 %v3839_v2  ;;  %v1054_v57 = vsel %vm846_vm4, %v767_v56, 0  ;;  %v1008_v59 = vsel %vm846_vm4, %v768_v58, 0 }
  0x19   : > { %3662 = vmatprep.subr.bf16.mxu0 %v3954_v1 }
  0x1b   : > { %3653 = vmatmul.mubr.msk.bf16.vlgmr.msra.gmra.mxu0 %vm723_vm1, %v699_v4 }
  0x1c   : > { %3664 = vmatprep.mubr.msk.bf16.mxu0 %vm3955_vm0, %v3954_v1 }
  0xdb   : > { %v761_v6 = vpop.f32.mrf.mxu0 }
  0xdc   : > { %v762_v7 = vadd.f32 %v3372_v5, %v761_v6 }
  0xdd   : > { %v3654_v8 = vpop.f32.mrf.mxu0 }
  0xde   : > { %v4121_v9 = vpack.c.bf16 %v762_v7, %v762_v7 }
  0xdf   : > { %v764_v10 = vpop.f32.mrf.mxu0 }
  0xe0   : > { %891 = vrot.lane.b32.xlu1 %v4121_v9, %s3956_s28  ;;  %778 = vrot.lane.b32.xlu0 %v4121_v9, %s4730_s29 }
  0xe1   : > { %v3655_v11 = vpop.f32.mrf.mxu0 }
  0xe4   : > { %893 = vrot.lane.b32.xlu0 %v4121_v9, %s3958_s30 }
 0x152   : > { %v779_v12 = vpop.permute.xlu0 %778  ;;  %v892_v16 = vpop.permute.xlu1 %891 }
 0x153   : > { %v785_v13 = vsel %vm780_vm2, %v779_v12, 0 }
 0x154   : > { %3657 = vmatpush3.bf16.xpose.msra.mxu1 %v785_v13 }
 0x155   : > { %3668 = vmatprep.subr.bf16.mxu1 %v3954_v1 }
 0x156   : > { %v894_v14 = vpop.permute.xlu0 %893 }
 0x157   : > { %v899_v15 = vsel %vm780_vm2, %v894_v14, 0 }
 0x15b   : > { %3659 = vmatmul.mubr.msk.bf16.vlgmr.msra.gmra.mxu1 %vm780_vm2, %v4121_v9 }
 0x15c   : > { %3669 = vmatpush3.bf16.xpose.msra.mxu1 %v899_v15  ;;  %3670 = vmatprep.mubr.msk.bf16.mxu1 %vm3955_vm0, %v3954_v1 }
 0x15d   : > { %3680 = vmatprep.subr.bf16.mxu1 %v3954_v1 }
 0x163   : > { %3671 = vmatmul.mubr.msk.bf16.vlgmr.msra.gmra.mxu1 %vm780_vm2, %v892_v16 }
 0x164   : > { %3682 = vmatprep.mubr.msk.bf16.mxu1 %vm3955_vm0, %v3954_v1  ;;  %3681 = vmatpush3.bf16.msra.mxu1 %v1008_v59 }
 0x165   : > { %3692 = vmatprep.subr.bf16.mxu1 %v3954_v1 }
 0x21b   : > { %v821_v20 = vpop.f32.mrf.mxu1 }
 0x21c   : > { %v827_v21 = vmul.f32 0.35355338, %v821_v20 }
 0x21d   : > { %v3660_v22 = vpop.f32.mrf.mxu1 }
 0x21e   : > { %v828_v23 = vsel %vm776_vm3, -1e+30, %v827_v21 }
 0x21f   : > { %v824_v24 = vpop.f32.mrf.mxu1  ;;  %v829_v25 = vsel %vm780_vm2, %v828_v23, -inf }
 0x220   : > { %830 = vmax.xlane.f32.xlu1 %v829_v25 }
 0x221   : > { %v3661_v26 = vpop.f32.mrf.mxu1 }
 0x223   : > { %v935_v27 = vpop.f32.mrf.mxu1 }
 0x224   : > { %v941_v28 = vmul.f32 0.35355338, %v935_v27 }
 0x225   : > { %v3672_v29 = vpop.f32.mrf.mxu1 }
 0x226   : > { %v942_v30 = vsel %vm776_vm3, -1e+30, %v941_v28 }
 0x227   : > { %v938_v31 = vpop.f32.mrf.mxu1  ;;  %v943_v32 = vsel %vm780_vm2, %v942_v30, -inf }
 0x228   : > { %944 = vmax.xlane.f32.xlu0 %v943_v32 }
 0x229   : > { %v3673_v33 = vpop.f32.mrf.mxu1 }
 0x2a9   : > { %v831_v34 = vpop.xlane.xlu1 %830 }
 0x2aa   : > { %v832_v35 = vsub.f32 %v828_v23, %v831_v34 }
 0x2ac   : > { %v833_v36 = vmul.f32 1.442695, %v832_v35 }
 0x2ae   : > { %3908 = vpow2.f32 %v833_v36 }
 0x2b1   : > { %v945_v37 = vpop.xlane.xlu0 %944 }
 0x2b2   : > { %v946_v38 = vsub.f32 %v942_v30, %v945_v37 }
 0x2b4   : > { %v947_v39 = vmul.f32 1.442695, %v946_v38 }
 0x2b6   : > { %3910 = vpow2.f32 %v947_v39 }
 0x2bb   : > { %v3909_v40 = vpop.eup %3908 }
 0x2bc   : > { %v835_v41 = vsel %vm780_vm2, %v3909_v40, 0.0 }
 0x2bd   : > { %836 = vadd.xlane.f32.xlu0 %v835_v41 }
 0x2c3   : > { %v3911_v42 = vpop.eup %3910 }
 0x2c4   : > { %v949_v43 = vsel %vm780_vm2, %v3911_v42, 0.0 }
 0x2c5   : > { %950 = vadd.xlane.f32.xlu1 %v949_v43 }
 0x2d3   : > { %841 = vrot.lane.b32.xlu0 %v4121_v9, %s3959_s0  ;;  %s4726_s0 = smov 72  }
 0x2d6   : > { %955 = vrot.lane.b32.xlu1 %v4121_v9, %s3960_s23  ;;  %s4728_s23 = smov 104  }
 0x2d7   : > { %1096 = vrot.lane.b32.xlu0 %v4121_v9, %s3961_s5 }
 0x2da   : > { %1098 = vrot.lane.b32.xlu1 %v4121_v9, %s4727_s24 }
 0x346   : > { %v837_v44 = vpop.xlane.xlu0 %836 }
 0x347   : > { %3912 = vrcp.f32 %v837_v44  ;;  %v769_v44 = vld [vmem:[%s4741_s26 + $0x8] sm:$0xf] }
 0x34a   : > { %v842_v45 = vpop.permute.xlu0 %841 }
 0x34b   : > { %v848_v46 = vsel %vm846_vm4, %v842_v45, 0  ;;  %v1213_v45 = vsel %vm846_vm4, %v769_v44, 0 }
 0x34c   : > { %3663 = vmatpush3.bf16.msra.mxu0 %v848_v46 }
 0x34d   : > { %3674 = vmatprep.subr.bf16.mxu0 %v3954_v1 }
 0x34e   : > { %v951_v47 = vpop.xlane.xlu1 %950  ;;  %v1097_v11 = vpop.permute.xlu0 %1096 }
 0x34f   : > { %3914 = vrcp.f32 %v951_v47 }
 0x352   : > { %v956_v50 = vpop.permute.xlu1 %955 }
 0x353   : > { %v961_v52 = vsel %vm846_vm4, %v956_v50, 0 }
 0x354   : > { %v3913_v48 = vpop.eup %3912 }
 0x355   : > { %v839_v49 = vmul.f32 %v3913_v48, %v3909_v40 }
 0x356   : > { %v1099_v2 = vpop.permute.xlu1 %1098 }
 0x357   : > { %v840_v51 = vpack.c.bf16 %v839_v49, %v839_v49  ;;  %v1104_v7 = vsel %vm780_vm2, %v1099_v2, 0 }
 0x359   : > { %3665 = vmatmul.mubr.msk.bf16.vlgmr.msra.gmra.mxu0 %vm780_vm2, %v840_v51 }
 0x35a   : > { %3675 = vmatpush3.bf16.msra.mxu0 %v961_v52  ;;  %3676 = vmatprep.mubr.msk.bf16.mxu0 %vm3955_vm0, %v3954_v1 }
 0x35b   : > { %3686 = vmatprep.subr.bf16.mxu0 %v3954_v1 }
 0x35c   : > { %v3915_v53 = vpop.eup %3914 }
 0x35d   : > { %v953_v54 = vmul.f32 %v3915_v53, %v3911_v42 }
 0x35f   : > { %v954_v55 = vpack.c.bf16 %v953_v54, %v953_v54 }
 0x361   : > { %3677 = vmatmul.mubr.msk.bf16.vlgmr.msra.gmra.mxu0 %vm780_vm2, %v954_v55 }
 0x362   : > { %3688 = vmatprep.mubr.msk.bf16.mxu0 %vm3955_vm0, %v3954_v1  ;;  %3687 = vmatpush3.bf16.msra.mxu0 %v1054_v57 }
 0x363   : > { %3698 = vmatprep.subr.bf16.mxu0 %v3954_v1 }
 0x419   : > { %v884_v60 = vpop.f32.mrf.mxu0 }
 0x41a   : > { %v890_v61 = vpack.c.bf16 %v884_v60, %v884_v60 }
 0x41b   : > { %v3666_v62 = vpop.f32.mrf.mxu0 }
 0x41c   : > { %3689 = vmatmul.mubr.msk.bf16.vlgmr.msra.gmra.mxu0 %vm780_vm2, %v890_v61 }
 0x41d   : > { %v887_v63 = vpop.f32.mrf.mxu0  ;;  %3700 = vmatprep.mubr.msk.bf16.mxu0 %vm3955_vm0, %v3954_v1 }
 0x41f   : > { %v3667_v0 = vpop.f32.mrf.mxu0 }
 0x421   : > { %v997_v4 = vpop.f32.mrf.mxu0 }
 0x422   : > { %v1003_v5 = vpack.c.bf16 %v997_v4, %v997_v4 }
 0x423   : > { %v3678_v6 = vpop.f32.mrf.mxu0 }
 0x424   : > { %3683 = vmatmul.mubr.msk.bf16.vlgmr.msra.gmra.mxu1 %vm780_vm2, %v1003_v5 }
 0x425   : > { %3693 = vmatpush3.bf16.xpose.msra.mxu1 %v1104_v7  ;;  %v1000_v8 = vpop.f32.mrf.mxu0  ;;  %3694 = vmatprep.mubr.msk.bf16.mxu1 %vm3955_vm0, %v3954_v1 }
 0x426   : > { %3704 = vmatprep.subr.bf16.mxu1 %v3954_v1 }
 0x427   : > { %v3679_v10 = vpop.f32.mrf.mxu0 }
 0x42c   : > { %3695 = vmatmul.mubr.msk.bf16.vlgmr.msra.gmra.mxu1 %vm780_vm2, %v1097_v11 }
 0x42d   : > { %3706 = vmatprep.mubr.msk.bf16.mxu1 %vm3955_vm0, %v3954_v1  ;;  %3705 = vmatpush3.bf16.msra.mxu1 %v1213_v45  ;;  %v3390_v45 = vld [vmem:[%s4708_s7] ss:$0 sm:$0xff] }
 0x42e   : > { %3716 = vmatprep.subr.bf16.mxu1 %v3954_v1 }
 0x4dc   : > { %v1090_v12 = vpop.f32.mrf.mxu0 }
 0x4de   : > { %v3690_v13 = vpop.f32.mrf.mxu0 }
 0x4e0   : > { %v1093_v14 = vpop.f32.mrf.mxu0 }
 0x4e2   : > { %v3691_v15 = vpop.f32.mrf.mxu0 }
 0x4e4   : > { %v1044_v16 = vpop.f32.mrf.mxu1 }
 0x4e5   : > { %v4193_v17 = vadd.f32 %v1090_v12, %v1044_v16 }
 0x4e6   : > { %v3684_v20 = vpop.f32.mrf.mxu1 }
 0x4e8   : > { %v1047_v21 = vpop.f32.mrf.mxu1 }
 0x4ea   : > { %v3685_v22 = vpop.f32.mrf.mxu1 }
 0x4ec   : > { %v1140_v23 = vpop.f32.mrf.mxu1 }
 0x4ed   : > { %v1146_v24 = vmul.f32 0.35355338, %v1140_v23 }
 0x4ee   : > { %v3696_v25 = vpop.f32.mrf.mxu1 }
 0x4ef   : > { %v1147_v26 = vsel %vm776_vm3, -1e+30, %v1146_v24 }
 0x4f0   : > { %v1143_v27 = vpop.f32.mrf.mxu1  ;;  %v1148_v28 = vsel %vm780_vm2, %v1147_v26, -inf }
 0x4f1   : > { %1149 = vmax.xlane.f32.xlu1 %v1148_v28 }
 0x4f2   : > { %v3697_v29 = vpop.f32.mrf.mxu1 }
 0x502   : > { %1258 = vrot.lane.b32.xlu1 %v4121_v9, %s4726_s0  ;;  %s4744_s0 = sld [smem:[#allocation8_spill]] }
 0x506   : > { %1256 = vrot.lane.b32.xlu1 %v4121_v9, %s4728_s23  ;;  %s4743_s23 = sld [smem:[#allocation3_spill]] }
 0x50c   : > { %s691_s29 = scalar_lea.vmem %s4743_s23, %s4104_s1  ;;  %s4746_s23 = smov 104  }
 0x57a   : > { %v1150_v30 = vpop.xlane.xlu1 %1149 }
 0x57b   : > { %v1151_v31 = vsub.f32 %v1147_v26, %v1150_v30 }
 0x57d   : > { %v1152_v32 = vmul.f32 1.442695, %v1151_v31 }
 0x57e   : > { %v1259_v40 = vpop.permute.xlu1 %1258 }
 0x57f   : > { %3916 = vpow2.f32 %v1152_v32  ;;  %v1264_v42 = vsel %vm780_vm2, %v1259_v40, 0 }
 0x582   : > { %v1257_v43 = vpop.permute.xlu1 %1256 }
 0x58c   : > { %v3917_v33 = vpop.eup %3916 }
 0x58d   : > { %v1154_v34 = vsel %vm780_vm2, %v3917_v33, 0.0 }
 0x58e   : > { %1155 = vadd.xlane.f32.xlu0 %v1154_v34  ;;  %v3840_v34 = vld [vmem:[%s4711_s10 + $0x8] sm:$0xff]  }
 0x5a4   : > { %1160 = vrot.lane.b32.xlu0 %v4121_v9, %s3965_s6  ;;  %s4742_s6 = sld [smem:[#allocation7_spill]] }
 0x5aa   : > { %v3388_v21 = vld [vmem:[%s4742_s6] ss:$0 sm:$0xff]  ;;  %s4748_s6 = smov 72  }
 0x617   : > { %v1156_v35 = vpop.xlane.xlu0 %1155 }
 0x618   : > { %3918 = vrcp.f32 %v1156_v35  ;;  %v698_v35 = vld [vmem:[%s691_s29] sm:$0x3f] }
 0x61b   : > { %v1161_v36 = vpop.permute.xlu0 %1160 }
 0x61c   : > { %v1166_v37 = vsel %vm846_vm4, %v1161_v36, 0  ;;  %v1522_v36 = vpack.c.bf16 %v698_v35, %v698_v35 }
 0x61d   : > { %3699 = vmatpush3.bf16.msra.mxu0 %v1166_v37  ;;  %v3842_v37 = vld [vmem:[%s4709_s8 + $0x8] sm:$0xff]  }
 0x61e   : > { %3710 = vmatprep.subr.bf16.mxu0 %v3954_v1 }
 0x625   : > { %v3919_v38 = vpop.eup %3918 }
 0x626   : > { %v1158_v39 = vmul.f32 %v3919_v38, %v3917_v33  ;;  %v3843_v38 = vld [vmem:[%s4709_s8] sm:$0xff]  }
 0x628   : > { %v1159_v41 = vpack.c.bf16 %v1158_v39, %v1158_v39 }
 0x62a   : > { %3701 = vmatmul.mubr.msk.bf16.vlgmr.msra.gmra.mxu0 %vm780_vm2, %v1159_v41 }
 0x62b   : > { %3711 = vmatpush3.bf16.xpose.msra.mxu0 %v1264_v42  ;;  %3712 = vmatprep.mubr.msk.bf16.mxu0 %vm3955_vm0, %v3954_v1 }
 0x62c   : > { %3722 = vmatprep.subr.bf16.mxu0 %v3954_v1 }
 0x632   : > { %3713 = vmatmul.mubr.msk.bf16.vlgmr.msra.gmra.mxu0 %vm780_vm2, %v1257_v43  ;;  %v3389_v43 = vld [vmem:[%s4744_s0] ss:$0 sm:$0xff] }
 0x633   : > { %3724 = vmatprep.mubr.msk.bf16.mxu0 %vm3955_vm0, %v3954_v1 }
 0x6ea   : > { %v1202_v46 = vpop.f32.mrf.mxu0 }
 0x6eb   : > { %v1208_v47 = vpack.c.bf16 %v1202_v46, %v1202_v46 }
 0x6ec   : > { %v3702_v48 = vpop.f32.mrf.mxu0 }
 0x6ed   : > { %3707 = vmatmul.mubr.msk.bf16.vlgmr.msra.gmra.mxu1 %vm780_vm2, %v1208_v47 }
 0x6ee   : > { %v1205_v49 = vpop.f32.mrf.mxu0  ;;  %3718 = vmatprep.mubr.msk.bf16.mxu1 %vm3955_vm0, %v3954_v1 }
 0x6ef   : > { %v3395_v49 = vld [vmem:[%s4712_s11] ss:$0 sm:$0xff] }
 0x6f0   : > { %v3703_v50 = vpop.f32.mrf.mxu0 }
 0x6f2   : > { %v1300_v51 = vpop.f32.mrf.mxu0 }
 0x6f3   : > { %v1306_v52 = vmul.f32 0.35355338, %v1300_v51 }
 0x6f4   : > { %v3714_v53 = vpop.f32.mrf.mxu0 }
 0x6f5   : > { %v1307_v54 = vsel %vm776_vm3, -1e+30, %v1306_v52 }
 0x6f6   : > { %v1303_v55 = vpop.f32.mrf.mxu0  ;;  %v1308_v56 = vsel %vm780_vm2, %v1307_v54, -inf }
 0x6f7   : > { %1309 = vmax.xlane.f32.xlu0 %v1308_v56 }
 0x6f8   : > { %v3715_v57 = vpop.f32.mrf.mxu0 }
 0x6f9   : > { %v3391_v57 = vld [vmem:[%s4710_s9] ss:$0 sm:$0xff] }
 0x70d   : > { %1320 = vrot.lane.b32.xlu0 %v4121_v9, %s3966_s27  ;;  %v770_v9 = vld [vmem:[%s4741_s26 + $0xc] sm:$0xf] }
 0x70e   : > { %v1373_v6 = vsel %vm846_vm4, %v770_v9, 0 }
 0x70f   : > { %3723 = vmatpush3.bf16.msra.mxu0 %v1373_v6 }
 0x710   : > { %3736 = vmatprep.subr.bf16.mxu0 %v3954_v1 }
 0x780   : > { %v1310_v58 = vpop.xlane.xlu0 %1309 }
 0x781   : > { %v1311_v59 = vsub.f32 %v1307_v54, %v1310_v58 }
 0x783   : > { %v1312_v60 = vmul.f32 1.442695, %v1311_v59 }
 0x784   : > { %v1321_v61 = vpop.permute.xlu0 %1320 }
 0x785   : > { %3920 = vpow2.f32 %v1312_v60  ;;  %v1326_v62 = vsel %vm846_vm4, %v1321_v61, 0 }
 0x786   : > { %3717 = vmatpush3.bf16.msra.mxu1 %v1326_v62 }
 0x787   : > { %3728 = vmatprep.subr.bf16.mxu1 %v3954_v1 }
 0x792   : > { %v3921_v19 = vpop.eup %3920 }
 0x793   : > { %v1314_v63 = vsel %vm780_vm2, %v3921_v19, 0.0 }
 0x794   : > { %1315 = vadd.xlane.f32.xlu1 %v1314_v63 }
 0x7ad   : > { %v1249_v0 = vpop.f32.mrf.mxu1 }
 0x7ae   : > { %v1255_v2 = vadd.f32 %v1249_v0, %v4193_v17 }
 0x7af   : > { %v3708_v4 = vpop.f32.mrf.mxu1 }
 0x7b1   : > { %v1252_v5 = vpop.f32.mrf.mxu1 }
 0x7b3   : > { %v3709_v7 = vpop.f32.mrf.mxu1 }
 0x81d   : > { %v1316_v8 = vpop.xlane.xlu1 %1315 }
 0x81e   : > { %3922 = vrcp.f32 %v1316_v8 }
 0x82b   : > { %v3923_v10 = vpop.eup %3922 }
 0x82c   : > { %v1318_v11 = vmul.f32 %v3923_v10, %v3921_v19 }
 0x82e   : > { %v1319_v12 = vpack.c.bf16 %v1318_v11, %v1318_v11 }
 0x830   : > { %3719 = vmatmul.mubr.msk.bf16.vlgmr.msra.gmra.mxu1 %vm780_vm2, %v1319_v12 }
 0x831   : > { %3732 = vmatprep.mubr.msk.bf16.mxu1 %vm3955_vm0, %v3954_v1  ;;  %3729 = vmatpush3.bf16.msra.mxu1 %v3842_v37 }
 0x832   : > { %3730 = vmatprep.subr.bf16.mxu1 %v3954_v1 }
 0x835   : > { %3731 = vmatpush3.bf16.msra.mxu1 %v3843_v38 }
 0x836   : > { %3744 = vmatprep.subr.bf16.mxu1 %v3954_v1 }
 0x8f0   : > { %v1362_v13 = vpop.f32.mrf.mxu1 }
 0x8f1   : > { %v1368_v14 = vpack.c.bf16 %v1362_v13, %v1362_v13 }
 0x8f2   : > { %v3720_v15 = vpop.f32.mrf.mxu1 }
 0x8f3   : > { %3725 = vmatmul.mubr.msk.bf16.vlgmr.msra.gmra.mxu0 %vm780_vm2, %v1368_v14 }
 0x8f4   : > { %v1365_v16 = vpop.f32.mrf.mxu1  ;;  %3740 = vmatprep.mubr.msk.bf16.mxu0 %vm3955_vm0, %v3954_v1  ;;  %3737 = vmatpush3.bf16.msra.mxu0 %v3840_v34 }
 0x8f5   : > { %3738 = vmatprep.subr.bf16.mxu0 %v3954_v1 }
 0x8f6   : > { %v3721_v17 = vpop.f32.mrf.mxu1 }
 0x9b3   : > { %v1409_v20 = vpop.f32.mrf.mxu0 }
 0x9b4   : > { %v1415_v22 = vadd.f32 %v1409_v20, %v1255_v2 }
 0x9b5   : > { %v3726_v23 = vpop.f32.mrf.mxu0 }
 0x9b6   : > { %v1423_v24 = vadd.f32 %v3388_v21, %v1415_v22 }
 0x9b7   : > { %v1412_v25 = vpop.f32.mrf.mxu0 }
 0x9b8   : > { %v1426_v26 = vadd.f32 %v1423_v24, %v4111_v3  ;;  %v3841_v3 = vld [vmem:[%s4711_s10] sm:$0xff]  }
 0x9b9   : > { %v3727_v27 = vpop.f32.mrf.mxu0  ;;  %3739 = vmatpush3.bf16.msra.mxu0 %v3841_v3 }
 0x9ba   : > { %v1427_v28 = vsel %vm723_vm1, %v1426_v26, 0.0  ;;  %3750 = vmatprep.subr.bf16.mxu0 %v3954_v1 }
 0x9bb   : > { %1428 = vadd.xlane.f32.xlu1 %v1427_v28 }
 0x9bc   : > { %3741 = vmatmul.mubr.msk.bf16.vlgmr.msra.gmra.mxu0 %vm723_vm1, %v1522_v36 }
 0x9bd   : > { %3752 = vmatprep.mubr.msk.bf16.mxu0 %vm3955_vm0, %v3954_v1 }
 0xa44   : > { %v1429_v29 = vpop.xlane.xlu1 %1428 }
 0xa45   : > { %v1431_v30 = vmul.f32 0.03125, %v1429_v29 }
 0xa47   : > { %v1432_v31 = vsub.f32 %v1426_v26, %v1431_v30 }
 0xa49   : > { %v1433_v32 = vmul.f32 %v1432_v31, %v1432_v31 }
 0xa4b   : > { %v1434_v33 = vsel %vm723_vm1, %v1433_v32, 0.0 }
 0xa4c   : > { %1435 = vadd.xlane.f32.xlu1 %v1434_v33 }
 0xa7c   : > { %v1583_v50 = vpop.f32.mrf.mxu0 }
 0xa7d   : > { %v1584_v51 = vadd.f32 %v3395_v49, %v1583_v50 }
 0xa7e   : > { %v3742_v52 = vpop.f32.mrf.mxu0 }
 0xa7f   : > { %v4288_v53 = vpack.c.bf16 %v1584_v51, %v1584_v51 }
 0xa80   : > { %v1586_v54 = vpop.f32.mrf.mxu0 }
 0xa81   : > { %1709 = vrot.lane.b32.xlu1 %v4288_v53, %s3956_s28  ;;  %v1599_v55 = vsel %vm780_vm2, %v4288_v53, 0 }
 0xa82   : > { %v3743_v56 = vpop.f32.mrf.mxu0 }
 0xad5   : > { %v1436_v39 = vpop.xlane.xlu1 %1435 }
 0xad6   : > { %v1437_v40 = vmul.f32 0.03125, %v1436_v39  ;;  %v1589_v39 = vld [vmem:[%s4713_s12] sm:$0xf] }
 0xad8   : > { %v1438_v41 = vadd.f32 1e-05, %v1437_v40  ;;  %v1869_v40 = vsel %vm846_vm4, %v1589_v39, 0 }
 0xada   : > { %3924 = vrsqrt.f32 %v1438_v41  ;;  %v1590_v41 = vld [vmem:[%s4713_s12 + $0x4] sm:$0xf] }
 0xae7   : > { %v3925_v42 = vpop.eup %3924 }
 0xae8   : > { %v1440_v44 = vmul.f32 %v3925_v42, %v1432_v31  ;;  %v1823_v42 = vsel %vm846_vm4, %v1590_v41, 0 }
 0xaea   : > { %v1447_v46 = vmul.f32 %v3389_v43, %v1440_v44 }
 0xaec   : > { %v4278_v47 = vadd.f32 %v3390_v45, %v1447_v46 }
 0xaee   : > { %v1455_v48 = vpack.c.bf16 %v4278_v47, %v4278_v47 }
 0xaf0   : > { %3733 = vmatmul.mubr.msk.bf16.vlgmr.msra.gmra.mxu1 %vm723_vm1, %v1455_v48 }
 0xaf1   : > { %3746 = vmatprep.mubr.msk.bf16.mxu1 %vm3955_vm0, %v3954_v1  ;;  %3745 = vmatpush3.bf16.xpose.msra.mxu1 %v1599_v55 }
 0xaf2   : > { %3756 = vmatprep.subr.bf16.mxu1 %v3954_v1 }
 0xaf3   : > { %v1710_v59 = vpop.permute.xlu1 %1709 }
 0xaf4   : > { %v1715_v19 = vsel %vm780_vm2, %v1710_v59, 0 }
 0xbb0   : > { %v1516_v58 = vpop.f32.mrf.mxu1 }
 0xbb1   : > { %v1517_v60 = vadd.f32 %v3391_v57, %v1516_v58 }
 0xbb2   : > { %v3734_v61 = vpop.f32.mrf.mxu1 }
 0xbb3   : > { %v4298_v62 = vpack.c.bf16 %v1517_v60, %v1517_v60 }
 0xbb4   : > { %v1519_v63 = vpop.f32.mrf.mxu1 }
 0xbb5   : > { %1707 = vrot.lane.b32.xlu0 %v4298_v62, %s3956_s28  ;;  %3747 = vmatmul.mubr.msk.bf16.vlgmr.msra.gmra.mxu1 %vm780_vm2, %v4298_v62  ;;  %s4745_s28 = smov 96  }
 0xbb6   : > { %v3735_v0 = vpop.f32.mrf.mxu1  ;;  %3757 = vmatpush3.bf16.xpose.msra.mxu1 %v1715_v19  ;;  %3758 = vmatprep.mubr.msk.bf16.mxu1 %vm3955_vm0, %v3954_v1 }
 0xbb7   : > { %3768 = vmatprep.subr.bf16.mxu1 %v3954_v1 }
 0xc27   : > { %v1708_v2 = vpop.permute.xlu0 %1707 }
 0xc28   : > { %3759 = vmatmul.mubr.msk.bf16.vlgmr.msra.gmra.mxu1 %vm780_vm2, %v1708_v2 }
 0xc29   : > { %3770 = vmatprep.mubr.msk.bf16.mxu1 %vm3955_vm0, %v3954_v1  ;;  %3769 = vmatpush3.bf16.msra.mxu1 %v1823_v42 }
 0xc2a   : > { %3780 = vmatprep.subr.bf16.mxu1 %v3954_v1 }
 0xc75   : > { %v1635_v4 = vpop.f32.mrf.mxu1 }
 0xc76   : > { %v1641_v9 = vmul.f32 0.35355338, %v1635_v4 }
 0xc77   : > { %v3748_v5 = vpop.f32.mrf.mxu1 }
 0xc78   : > { %v1643_v6 = vsel %vm1642_vm5, %v1641_v9, -inf }
 0xc79   : > { %1644 = vmax.xlane.f32.xlu0 %v1643_v6  ;;  %v1638_v7 = vpop.f32.mrf.mxu1 }
 0xc7b   : > { %v3749_v8 = vpop.f32.mrf.mxu1 }
 0xce8   : > { %v1751_v10 = vpop.f32.mrf.mxu1 }
 0xce9   : > { %v1757_v11 = vmul.f32 0.35355338, %v1751_v10 }
 0xcea   : > { %v3760_v12 = vpop.f32.mrf.mxu1 }
 0xceb   : > { %v1758_v13 = vsel %vm1642_vm5, %v1757_v11, -inf }
 0xcec   : > { %1759 = vmax.xlane.f32.xlu1 %v1758_v13  ;;  %v1754_v14 = vpop.f32.mrf.mxu1 }
 0xcee   : > { %v3761_v15 = vpop.f32.mrf.mxu1 }
 0xcfd   : > { %1770 = vrot.lane.b32.xlu1 %v4288_v53, %s3958_s30  ;;  %s695_s30 = scalar_lea.vmem %s4723_s22, %s4104_s1 }
 0xd01   : > { %1913 = vrot.lane.b32.xlu1 %v4288_v53, %s3961_s5 }
 0xd02   : > { %v1645_v16 = vpop.xlane.xlu0 %1644 }
 0xd03   : > { %v1646_v17 = vsub.f32 %v1641_v9, %v1645_v16 }
 0xd05   : > { %v1647_v20 = vmul.f32 1.442695, %v1646_v17 }
 0xd07   : > { %3926 = vpow2.f32 %v1647_v20 }
 0xd14   : > { %v3927_v21 = vpop.eup %3926 }
 0xd15   : > { %v1649_v22 = vsel %vm1642_vm5, %v3927_v21, 0.0 }
 0xd16   : > { %1650 = vadd.xlane.f32.xlu0 %v1649_v22 }
 0xd75   : > { %v1760_v23 = vpop.xlane.xlu1 %1759 }
 0xd76   : > { %v1761_v24 = vsub.f32 %v1757_v11, %v1760_v23 }
 0xd78   : > { %v1762_v25 = vmul.f32 1.442695, %v1761_v24 }
 0xd79   : > { %v1771_v34 = vpop.permute.xlu1 %1770 }
 0xd7a   : > { %3928 = vpow2.f32 %v1762_v25  ;;  %v1776_v35 = vsel %vm1661_vm6, %v1771_v34, 0 }
 0xd7d   : > { %v1914_v49 = vpop.permute.xlu1 %1913 }
 0xd7e   : > { %v1919_v54 = vsel %vm780_vm2, %v1914_v49, 0 }
 0xd87   : > { %v3929_v26 = vpop.eup %3928 }
 0xd88   : > { %v1764_v27 = vsel %vm1642_vm5, %v3929_v26, 0.0 }
 0xd89   : > { %1765 = vadd.xlane.f32.xlu0 %v1764_v27 }
 0xd9f   : > { %1656 = vrot.lane.b32.xlu0 %v4288_v53, %s4745_s28  ;;  %v1651_v28 = vpop.xlane.xlu0 %1650 }
 0xda0   : > { %3930 = vrcp.f32 %v1651_v28 }
 0xda3   : > { %1911 = vrot.lane.b32.xlu0 %v4298_v62, %s3961_s5 }
 0xdad   : > { %v3931_v29 = vpop.eup %3930 }
 0xdae   : > { %v1653_v31 = vmul.f32 %v3931_v29, %v3927_v21 }
 0xdb0   : > { %v1654_v3 = vpack.c.bf16 %v1653_v31, %v1653_v31 }
 0xe12   : > { %v1766_v30 = vpop.xlane.xlu0 %1765 }
 0xe13   : > { %3932 = vrcp.f32 %v1766_v30 }
 0xe16   : > { %v1657_v32 = vpop.permute.xlu0 %1656 }
 0xe17   : > { %v1663_v33 = vsel %vm1661_vm6, %v1657_v32, 0 }
 0xe18   : > { %3751 = vmatpush3.bf16.msra.mxu0 %v1663_v33 }
 0xe19   : > { %3762 = vmatprep.subr.bf16.mxu0 %v3954_v1 }
 0xe1a   : > { %v1912_v57 = vpop.permute.xlu0 %1911 }
 0xe1b   : > { %3753 = vmatmul.mubr.msk.bf16.vlgmr.msra.gmra.mxu0 %vm1642_vm5, %v1654_v3 }
 0xe1c   : > { %3763 = vmatpush3.bf16.msra.mxu0 %v1776_v35  ;;  %3764 = vmatprep.mubr.msk.bf16.mxu0 %vm3955_vm0, %v3954_v1 }
 0xe1d   : > { %3774 = vmatprep.subr.bf16.mxu0 %v3954_v1 }
 0xe20   : > { %v3933_v36 = vpop.eup %3932 }
 0xe21   : > { %v1768_v37 = vmul.f32 %v3933_v36, %v3929_v26  ;;  %v1591_v26 = vld [vmem:[%s4713_s12 + $0x8] sm:$0xf] }
 0xe22   : > { %v2027_v27 = vsel %vm846_vm4, %v1591_v26, 0  ;;  %v3967_v26 = vmov 0  }
 0xe23   : > { %v1769_v38 = vpack.c.bf16 %v1768_v37, %v1768_v37 }
 0xe25   : > { %3765 = vmatmul.mubr.msk.bf16.vlgmr.msra.gmra.mxu0 %vm1642_vm5, %v1769_v38 }
 0xe26   : > { %3776 = vmatprep.mubr.msk.bf16.mxu0 %vm3955_vm0, %v3954_v1  ;;  %3775 = vmatpush3.bf16.msra.mxu0 %v1869_v40 }
 0xe27   : > { %3786 = vmatprep.subr.bf16.mxu0 %v3954_v1 }
 0xedb   : > { %v1699_v43 = vpop.f32.mrf.mxu0 }
 0xedc   : > { %v1705_v44 = vpack.c.bf16 %v1699_v43, %v1699_v43 }
 0xedd   : > { %v3754_v45 = vpop.f32.mrf.mxu0 }
 0xede   : > { %3777 = vmatmul.mubr.msk.bf16.vlgmr.msra.gmra.mxu0 %vm780_vm2, %v1705_v44 }
 0xedf   : > { %v1702_v46 = vpop.f32.mrf.mxu0  ;;  %3788 = vmatprep.mubr.msk.bf16.mxu0 %vm3955_vm0, %v3954_v1 }
 0xee1   : > { %v3755_v48 = vpop.f32.mrf.mxu0 }
 0xee5   : > { %v1812_v50 = vpop.f32.mrf.mxu0 }
 0xee6   : > { %v1818_v51 = vpack.c.bf16 %v1812_v50, %v1812_v50 }
 0xee7   : > { %v3766_v52 = vpop.f32.mrf.mxu0 }
 0xee8   : > { %3771 = vmatmul.mubr.msk.bf16.vlgmr.msra.gmra.mxu1 %vm780_vm2, %v1818_v51 }
 0xee9   : > { %3781 = vmatpush3.bf16.xpose.msra.mxu1 %v1919_v54  ;;  %v1815_v55 = vpop.f32.mrf.mxu0  ;;  %3782 = vmatprep.mubr.msk.bf16.mxu1 %vm3955_vm0, %v3954_v1 }
 0xeea   : > { %3792 = vmatprep.subr.bf16.mxu1 %v3954_v1 }
 0xeeb   : > { %v3767_v56 = vpop.f32.mrf.mxu0 }
 0xef0   : > { %3783 = vmatmul.mubr.msk.bf16.vlgmr.msra.gmra.mxu1 %vm780_vm2, %v1912_v57 }
 0xef1   : > { %3794 = vmatprep.mubr.msk.bf16.mxu1 %vm3955_vm0, %v3954_v1  ;;  %3793 = vmatpush3.bf16.msra.mxu1 %v2027_v27 }
 0xef2   : > { %3804 = vmatprep.subr.bf16.mxu1 %v3954_v1 }
 0xf9e   : > { %v1905_v58 = vpop.f32.mrf.mxu0 }
 0xfa0   : > { %v3778_v59 = vpop.f32.mrf.mxu0 }
 0xfa2   : > { %v1908_v60 = vpop.f32.mrf.mxu0 }
 0xfa4   : > { %v3779_v61 = vpop.f32.mrf.mxu0 }
 0xfa8   : > { %v1859_v19 = vpop.f32.mrf.mxu1 }
 0xfa9   : > { %v4354_v63 = vadd.f32 %v1905_v58, %v1859_v19  ;;  %v3411_v19 = vld [vmem:[%s4714_s13] ss:$0 sm:$0xff] }
 0xfaa   : > { %v3772_v0 = vpop.f32.mrf.mxu1 }
 0xfac   : > { %v1862_v2 = vpop.f32.mrf.mxu1 }
 0xfae   : > { %v3773_v4 = vpop.f32.mrf.mxu1 }
 0xfb0   : > { %v1955_v9 = vpop.f32.mrf.mxu1 }
 0xfb1   : > { %v1961_v5 = vmul.f32 0.35355338, %v1955_v9 }
 0xfb2   : > { %v3784_v6 = vpop.f32.mrf.mxu1 }
 0xfb3   : > { %v1962_v7 = vsel %vm1642_vm5, %v1961_v5, -inf }
 0xfb4   : > { %1963 = vmax.xlane.f32.xlu1 %v1962_v7  ;;  %v1958_v8 = vpop.f32.mrf.mxu1 }
 0xfb6   : > { %v3785_v10 = vpop.f32.mrf.mxu1 }
 0xfc5   : > { %2072 = vrot.lane.b32.xlu1 %v4288_v53, %s4746_s23 }
 0xfc9   : > { %2070 = vrot.lane.b32.xlu1 %v4298_v62, %s4746_s23 }
0x103d   : > { %v1964_v11 = vpop.xlane.xlu1 %1963 }
0x103e   : > { %v1965_v12 = vsub.f32 %v1961_v5, %v1964_v11 }
0x1040   : > { %v1966_v13 = vmul.f32 1.442695, %v1965_v12 }
0x1041   : > { %v2073_v22 = vpop.permute.xlu1 %2072 }
0x1042   : > { %3934 = vpow2.f32 %v1966_v13  ;;  %v2078_v24 = vsel %vm780_vm2, %v2073_v22, 0  ;;  %v2276_v13 = vld [vmem:[%s4717_s16 + $0x40] sm:$0xff] }
0x1043   : > { %v2272_v22 = vld [vmem:[%s4717_s16 + $0x20] sm:$0xff] }
0x1045   : > { %v2071_v25 = vpop.permute.xlu1 %2070 }
0x104f   : > { %v3935_v14 = vpop.eup %3934 }
0x1050   : > { %v1968_v15 = vsel %vm1642_vm5, %v3935_v14, 0.0 }
0x1051   : > { %1969 = vadd.xlane.f32.xlu0 %v1968_v15 }
0x1067   : > { %1974 = vrot.lane.b32.xlu0 %v4288_v53, %s4747_s25 }
0x10da   : > { %v1970_v16 = vpop.xlane.xlu0 %1969 }
0x10db   : > { %3936 = vrcp.f32 %v1970_v16  ;;  %v2281_v16 = vld [vmem:[%s4717_s16 + $0x68] sm:$0xff] }
0x10de   : > { %v1975_v17 = vpop.permute.xlu0 %1974 }
0x10df   : > { %v1980_v20 = vsel %vm1661_vm6, %v1975_v17, 0 }
0x10e0   : > { %3787 = vmatpush3.bf16.msra.mxu0 %v1980_v20 }
0x10e1   : > { %3798 = vmatprep.subr.bf16.mxu0 %v3954_v1 }
0x10e8   : > { %v3937_v62 = vpop.eup %3936 }
0x10e9   : > { %v1972_v21 = vmul.f32 %v3937_v62, %v3935_v14  ;;  %v2280_v14 = vld [vmem:[%s4717_s16 + $0x60] sm:$0xff] }
0x10ea   : > { %v3423_v15 = vcombine.high %v2276_v13, %v2280_v14  ;;  %v3422_v17 = vcombine.low %v2276_v13, %v2280_v14  ;;  %v3864_v13 = vld [vmem:[%s4719_s18 + $0x50] sm:$0xff]  }
0x10eb   : > { %v1973_v23 = vpack.c.bf16 %v1972_v21, %v1972_v21  ;;  %v2268_v21 = vld [vmem:[%s4717_s16] sm:$0xff]  ;;  %v3865_v14 = vld [vmem:[%s4719_s18 + $0xd0] sm:$0xff]  }
0x10ec   : > { %v3414_v27 = vcombine.low %v2268_v21, %v2272_v22 }
0x10ed   : > { %3789 = vmatmul.mubr.msk.bf16.vlgmr.msra.gmra.mxu0 %vm1642_vm5, %v1973_v23  ;;  %v2269_v23 = vld [vmem:[%s4717_s16 + $0x8] sm:$0xff] }
0x10ee   : > { %3799 = vmatpush3.bf16.xpose.msra.mxu0 %v2078_v24  ;;  %3800 = vmatprep.mubr.msk.bf16.mxu0 %vm3955_vm0, %v3954_v1  ;;  %v3415_v24 = vcombine.high %v2268_v21, %v2272_v22  ;;  %v3872_v21 = vld [vmem:[%s4719_s18 + $0x40] sm:$0xff]  }
0x10ef   : > { %3810 = vmatprep.subr.bf16.mxu0 %v3954_v1  ;;  %v3873_v22 = vld [vmem:[%s4719_s18 + $0xc0] sm:$0xff]  }
0x10f5   : > { %3801 = vmatmul.mubr.msk.bf16.vlgmr.msra.gmra.mxu0 %vm780_vm2, %v2071_v25  ;;  %v2273_v25 = vld [vmem:[%s4717_s16 + $0x28] sm:$0xff] }
0x10f6   : > { %3812 = vmatprep.mubr.msk.bf16.mxu0 %vm3955_vm0, %v3954_v1 }
0x11ad   : > { %v2016_v28 = vpop.f32.mrf.mxu0 }
0x11ae   : > { %v2022_v29 = vpack.c.bf16 %v2016_v28, %v2016_v28  ;;  %v3417_v28 = vcombine.high %v2269_v23, %v2273_v25 }
0x11af   : > { %v3790_v30 = vpop.f32.mrf.mxu0 }
0x11b0   : > { %3795 = vmatmul.mubr.msk.bf16.vlgmr.msra.gmra.mxu1 %vm780_vm2, %v2022_v29  ;;  %v3416_v29 = vcombine.low %v2269_v23, %v2273_v25  ;;  %v2278_v30 = vld [vmem:[%s4717_s16 + $0x50] sm:$0xff]  ;;  %v3874_v23 = vld [vmem:[%s4719_s18] sm:$0xff]   ;;  %v3876_v25 = vld [vmem:[%s4719_s18 + $0x178] sm:$0xff]  }
0x11b1   : > { %v2019_v31 = vpop.f32.mrf.mxu0  ;;  %3806 = vmatprep.mubr.msk.bf16.mxu1 %vm3955_vm0, %v3954_v1 }
0x11b2   : > { %v2282_v31 = vld [vmem:[%s4717_s16 + $0x70] sm:$0xff] }
0x11b3   : > { %v3791_v32 = vpop.f32.mrf.mxu0 }
0x11b4   : > { %v2279_v32 = vld [vmem:[%s4717_s16 + $0x58] sm:$0xff] }
0x11b5   : > { %v2114_v33 = vpop.f32.mrf.mxu0 }
0x11b6   : > { %v2120_v34 = vmul.f32 0.35355338, %v2114_v33  ;;  %v3427_v33 = vcombine.high %v2278_v30, %v2282_v31 }
0x11b7   : > { %v3802_v3 = vpop.f32.mrf.mxu0 }
0x11b8   : > { %v2121_v35 = vsel %vm1642_vm5, %v2120_v34, -inf  ;;  %v3426_v3 = vcombine.low %v2278_v30, %v2282_v31  ;;  %v2292_v30 = vsub.s32 1, %v4140_v18  ;;  %v2300_v31 = vsub.s32 3, %v4140_v18 }
0x11b9   : > { %2122 = vmax.xlane.f32.xlu0 %v2121_v35  ;;  %v2117_v36 = vpop.f32.mrf.mxu0 }
0x11bb   : > { %v3803_v37 = vpop.f32.mrf.mxu0 }
0x11cf   : > { %2133 = vrot.lane.b32.xlu0 %v4288_v53, %s4748_s6  ;;  %v1592_v53 = vld [vmem:[%s4713_s12 + $0xc] sm:$0xf] }
0x11d0   : > { %v2186_v48 = vsel %vm846_vm4, %v1592_v53, 0  ;;  %v2275_v53 = vld [vmem:[%s4717_s16 + $0x38] sm:$0xff] }
0x11d1   : > { %3811 = vmatpush3.bf16.msra.mxu0 %v2186_v48 }
0x1242   : > { %v2123_v38 = vpop.xlane.xlu0 %2122 }
0x1243   : > { %v2124_v39 = vsub.f32 %v2120_v34, %v2123_v38  ;;  %v2283_v34 = vld [vmem:[%s4717_s16 + $0x78] sm:$0xff] }
0x1244   : > { %v3428_v35 = vcombine.low %v2279_v32, %v2283_v34  ;;  %v3429_v36 = vcombine.high %v2279_v32, %v2283_v34 }
0x1245   : > { %v2125_v40 = vmul.f32 1.442695, %v2124_v39 }
0x1246   : > { %v2134_v41 = vpop.permute.xlu0 %2133 }
0x1247   : > { %3938 = vpow2.f32 %v2125_v40  ;;  %v2139_v42 = vsel %vm1661_vm6, %v2134_v41, 0  ;;  %v3412_v41 = vld [vmem:[%s4715_s14] ss:$0 sm:$0xff] }
0x1248   : > { %3805 = vmatpush3.bf16.msra.mxu1 %v2139_v42 }
0x1249   : > { %2421 = vmatprep.subr.bf16.mxu1 %v3423_v15  ;;  %v3867_v15 = vld [vmem:[%s4719_s18 + $0x90] sm:$0xff]  }
0x1254   : > { %v3939_v1 = vpop.eup %3938 }
0x1255   : > { %v2127_v43 = vsel %vm1642_vm5, %v3939_v1, 0.0 }
0x1256   : > { %2128 = vadd.xlane.f32.xlu1 %v2127_v43 }
0x1270   : > { %v2063_v44 = vpop.f32.mrf.mxu1 }
0x1271   : > { %v2069_v45 = vadd.f32 %v2063_v44, %v4354_v63  ;;  %v2270_v44 = vld [vmem:[%s4717_s16 + $0x10] sm:$0xff] }
0x1272   : > { %v3796_v46 = vpop.f32.mrf.mxu1 }
0x1273   : > { %v2271_v46 = vld [vmem:[%s4717_s16 + $0x18] sm:$0xff] }
0x1274   : > { %v2066_v49 = vpop.f32.mrf.mxu1 }
0x1276   : > { %v3797_v50 = vpop.f32.mrf.mxu1 }
0x12df   : > { %v2129_v51 = vpop.xlane.xlu1 %2128 }
0x12e0   : > { %3940 = vrcp.f32 %v2129_v51  ;;  %v3421_v51 = vcombine.high %v2271_v46, %v2275_v53 }
0x12ed   : > { %v3941_v52 = vpop.eup %3940 }
0x12ee   : > { %v2131_v54 = vmul.f32 %v3941_v52, %v3939_v1  ;;  %v3413_v1 = vld [vmem:[%s4716_s15] ss:$0 sm:$0xff] }
0x12f0   : > { %v2132_v55 = vpack.c.bf16 %v2131_v54, %v2131_v54  ;;  %v3420_v54 = vcombine.low %v2271_v46, %v2275_v53 }
0x12f2   : > { %3807 = vmatmul.mubr.msk.bf16.vlgmr.msra.gmra.mxu1 %vm1642_vm5, %v2132_v55  ;;  %v3844_v55 = vld [vmem:[%s4719_s18 + $0x78] sm:$0xff]  }
0x12f3   : > { %2441 = vmatprep.mubr.bf16.mxu1 %v3967_v26  ;;  %2422 = vmatpush1.bf16.msra.mxu1 %v3422_v17  ;;  %v3869_v17 = vld [vmem:[%s4719_s18 + $0xc8] sm:$0xff]  }
0x12f4   : > { %2423 = vmatprep.subr.bf16.mxu1 %v3415_v24  ;;  %v3875_v24 = vld [vmem:[%s4719_s18 + $0x80] sm:$0xff]  }
0x12f7   : > { %2424 = vmatpush1.bf16.msra.mxu1 %v3414_v27  ;;  %v2288_v27 = vsub.s32 0, %v4140_v18 }
0x12f8   : > { %2503 = vmatprep.subr.bf16.mxu1 %v3427_v33 }
0x13b2   : > { %v2175_v56 = vpop.f32.mrf.mxu1 }
0x13b3   : > { %v2181_v57 = vpack.c.bf16 %v2175_v56, %v2175_v56  ;;  %v3845_v56 = vld [vmem:[%s4719_s18 + $0xf8] sm:$0xff]  }
0x13b4   : > { %v3808_v58 = vpop.f32.mrf.mxu1 }
0x13b5   : > { %3813 = vmatmul.mubr.msk.bf16.vlgmr.msra.gmra.mxu0 %vm780_vm2, %v2181_v57  ;;  %v3846_v57 = vld [vmem:[%s4719_s18 + $0x38] sm:$0xff]  }
0x13b6   : > { %v2178_v59 = vpop.f32.mrf.mxu1  ;;  %2482 = vmatprep.mubr.bf16.mxu0 %v3967_v26  ;;  %v3847_v58 = vld [vmem:[%s4719_s18 + $0xb8] sm:$0xff]  }
0x13b7   : > { %v3848_v59 = vld [vmem:[%s4719_s18 + $0x70] sm:$0xff]  }
0x13b8   : > { %v3809_v60 = vpop.f32.mrf.mxu1 }
0x13b9   : > { %v3849_v60 = vld [vmem:[%s4719_s18 + $0xf0] sm:$0xff]  }
0x1475   : > { %v2222_v61 = vpop.f32.mrf.mxu0 }
0x1476   : > { %v2228_v63 = vadd.f32 %v2222_v61, %v2069_v45  ;;  %v2274_v45 = vld [vmem:[%s4717_s16 + $0x30] sm:$0xff] }
0x1477   : > { %v3814_v0 = vpop.f32.mrf.mxu0  ;;  %v3419_v50 = vcombine.high %v2270_v44, %v2274_v45  ;;  %v3418_v52 = vcombine.low %v2270_v44, %v2274_v45  ;;  %v3850_v61 = vld [vmem:[%s4719_s18 + $0x30] sm:$0xff]  }
0x1478   : > { %v2236_v2 = vadd.f32 %v3411_v19, %v2228_v63  ;;  %v3851_v19 = vld [vmem:[%s4719_s18 + $0xb0] sm:$0xff]   ;;  %v3852_v63 = vld [vmem:[%s4719_s18 + $0x68] sm:$0xff]  }
0x1479   : > { %v2225_v4 = vpop.f32.mrf.mxu0  ;;  %v3853_v0 = vld [vmem:[%s4719_s18 + $0xe8] sm:$0xff]  }
0x147a   : > { %v2239_v9 = vadd.f32 %v2236_v2, %v4278_v47  ;;  %v2277_v47 = vld [vmem:[%s4717_s16 + $0x48] sm:$0xff] }
0x147b   : > { %v3815_v5 = vpop.f32.mrf.mxu0  ;;  %v3424_v20 = vcombine.low %v2277_v47, %v2281_v16  ;;  %v3425_v62 = vcombine.high %v2277_v47, %v2281_v16  ;;  %v3854_v2 = vld [vmem:[%s4719_s18 + $0x28] sm:$0xff]   ;;  %v3866_v47 = vld [vmem:[%s4719_s18 + $0x10] sm:$0xff]  }
0x147c   : > { %v2240_v6 = vsel %vm723_vm1, %v2239_v9, 0.0  ;;  %v3855_v4 = vld [vmem:[%s4719_s18 + $0xa8] sm:$0xff]   ;;  %v3857_v5 = vld [vmem:[%s4719_s18 + $0xe0] sm:$0xff]  }
0x147d   : > { %2241 = vadd.xlane.f32.xlu1 %v2240_v6  ;;  %2462 = vmatprep.subr.bf16.mxu0 %v3425_v62  ;;  %v3858_v6 = vld [vmem:[%s4719_s18 + $0x20] sm:$0xff]   ;;  %v3868_v16 = vld [vmem:[%s4719_s18 + $0x48] sm:$0xff]  }
0x147e   : > { %2463 = vmatpush1.bf16.msra.mxu0 %v3424_v20  ;;  %v3870_v20 = vld [vmem:[%s4719_s18 + $0x8] sm:$0xff]  }
0x147f   : > { %2464 = vmatprep.subr.bf16.mxu0 %v3417_v28  ;;  %v3871_v62 = vld [vmem:[%s4719_s18 + $0x88] sm:$0xff]   ;;  %v2296_v28 = vsub.s32 2, %v4140_v18 }
0x1482   : > { %2465 = vmatpush1.bf16.msra.mxu0 %v3416_v29  ;;  %v4569_v29 = vld [vmem:[%s4718_s17] sm:$0xff] }
0x1483   : > { %2544 = vmatprep.subr.bf16.mxu0 %v3429_v36  ;;  %v2289_v32 = vrot.slane %v4569_v29, %v2288_v27  ;;  %v2297_v33 = vrot.slane %v4569_v29, %v2296_v28  ;;  %v2293_v34 = vrot.slane %v4569_v29, %v2292_v30  ;;  %v3893_v27 = vld [vmem:[%s4719_s18 + $0x1d8] sm:$0xff]  }
0x1484   : > { %v3894_v28 = vld [vmem:[%s4719_s18 + $0x118] sm:$0xff]  }
0x1485   : > { %v3895_v30 = vld [vmem:[%s4719_s18 + $0x198] sm:$0xff]  }
0x1506   : > { %v2242_v7 = vpop.xlane.xlu1 %2241 }
0x1507   : > { %v2243_v8 = vmul.f32 0.03125, %v2242_v7  ;;  %v3859_v7 = vld [vmem:[%s4719_s18 + $0xa0] sm:$0xff]  }
0x1509   : > { %v2244_v10 = vsub.f32 %v2239_v9, %v2243_v8  ;;  %v3856_v9 = vld [vmem:[%s4719_s18 + $0x60] sm:$0xff]   ;;  %v3860_v8 = vld [vmem:[%s4719_s18 + $0x58] sm:$0xff]  }
0x150b   : > { %v2245_v11 = vmul.f32 %v2244_v10, %v2244_v10 }
0x150d   : > { %v2246_v12 = vsel %vm723_vm1, %v2245_v11, 0.0  ;;  %v3862_v11 = vld [vmem:[%s4719_s18 + $0x18] sm:$0xff]  }
0x150e   : > { %2247 = vadd.xlane.f32.xlu1 %v2246_v12  ;;  %v3863_v12 = vld [vmem:[%s4719_s18 + $0x98] sm:$0xff]  }
0x1597   : > { %v2248_v37 = vpop.xlane.xlu1 %2247 }
0x1598   : > { %v2249_v38 = vmul.f32 0.03125, %v2248_v37 }
0x159a   : > { %v2250_v39 = vadd.f32 1e-05, %v2249_v38 }
0x159c   : > { %3942 = vrsqrt.f32 %v2250_v39 }
0x15a9   : > { %v3943_v40 = vpop.eup %3942 }
0x15aa   : > { %v2252_v42 = vmul.f32 %v3943_v40, %v2244_v10  ;;  %v3861_v10 = vld [vmem:[%s4719_s18 + $0xd8] sm:$0xff]  }
0x15ac   : > { %v2259_v43 = vmul.f32 %v3412_v41, %v2252_v42 }
0x15ae   : > { %v4454_v48 = vadd.f32 %v3413_v1, %v2259_v43  ;;  %v2308_v1 = vsub.s32 5, %v4140_v18  ;;  %v2316_v43 = vsub.s32 7, %v4140_v18 }
0x15b0   : > { %v2267_v49 = vpack.c.bf16 %v4454_v48, %v4454_v48 }
0x15b2   : > { %3430 = vmatmul.mubr.msk.bf16.vlgmr.msra.gmra.mxu1 %vm723_vm1, %v2267_v49  ;;  %3431 = vmatmul.mubr.msk.bf16.vlgmr.msra.gmra.mxu0 %vm723_vm1, %v2267_v49 }
0x15b3   : > { %2504 = vmatpush1.bf16.msra.mxu1 %v3426_v3  ;;  %2545 = vmatpush1.bf16.msra.mxu0 %v3428_v35  ;;  %v2301_v3 = vrot.slane %v4569_v29, %v2300_v31  ;;  %v2304_v31 = vsub.s32 4, %v4140_v18 }
0x15b4   : > { %2505 = vmatprep.subr.bf16.mxu1 %v3419_v50  ;;  %2546 = vmatprep.subr.bf16.mxu0 %v3421_v51 }
0x15b5   : > { %2523 = vmatprep.mubr.bf16.mxu1 %v3967_v26  ;;  %2564 = vmatprep.mubr.bf16.mxu0 %v3967_v26  ;;  %v3877_v26 = vld [vmem:[%s4719_s18 + $0x1f8] sm:$0xff]  }
0x15b7   : > { %2506 = vmatpush1.bf16.msra.mxu1 %v3418_v52  ;;  %2547 = vmatpush1.bf16.msra.mxu0 %v3420_v54 }
0x15b8   : > { %3560 = vmatprep.subr.bf16.mxu1 %v3844_v55  ;;  %3582 = vmatprep.subr.bf16.mxu0 %v3845_v56  ;;  %v2309_v56 = vrot.slane %v4569_v29, %v2308_v1  ;;  %v3905_v1 = vld [vmem:[%s4719_s18 + $0x1c0] sm:$0xff]  }
0x15ba   : > { %3432 = vmatmul.mubr.msk.bf16.vlgmr.msra.gmra.mxu1 %vm723_vm1, %v2267_v49  ;;  %3433 = vmatmul.mubr.msk.bf16.vlgmr.msra.gmra.mxu0 %vm723_vm1, %v2267_v49 }
0x15bb   : > { %3561 = vmatpush3.bf16.msra.mxu1 %v3846_v57  ;;  %3583 = vmatpush3.bf16.msra.mxu0 %v3847_v58  ;;  %v2317_v57 = vrot.slane %v4569_v29, %v2316_v43  ;;  %v3878_v58 = vld [vmem:[%s4719_s18 + $0x138] sm:$0xff]   ;;  %v3906_v43 = vld [vmem:[%s4719_s18 + $0x100] sm:$0xff]  }
0x15bc   : > { %3562 = vmatprep.subr.bf16.mxu1 %v3848_v59  ;;  %3584 = vmatprep.subr.bf16.mxu0 %v3849_v60  ;;  %v3879_v59 = vld [vmem:[%s4719_s18 + $0x1b8] sm:$0xff]  }
0x15bf   : > { %3563 = vmatpush3.bf16.msra.mxu1 %v3850_v61  ;;  %3585 = vmatpush3.bf16.msra.mxu0 %v3851_v19 }
0x15c0   : > { %3564 = vmatprep.subr.bf16.mxu1 %v3852_v63  ;;  %3586 = vmatprep.subr.bf16.mxu0 %v3853_v0  ;;  %v3880_v0 = vld [vmem:[%s4719_s18 + $0x170] sm:$0xff]  }
0x15c3   : > { %3565 = vmatpush3.bf16.msra.mxu1 %v3854_v2  ;;  %3587 = vmatpush3.bf16.msra.mxu0 %v3855_v4  ;;  %v3881_v2 = vld [vmem:[%s4719_s18 + $0x1f0] sm:$0xff]  }
0x15c4   : > { %3566 = vmatprep.subr.bf16.mxu1 %v3856_v9  ;;  %3588 = vmatprep.subr.bf16.mxu0 %v3857_v5 }
0x15c7   : > { %3567 = vmatpush3.bf16.msra.mxu1 %v3858_v6  ;;  %3589 = vmatpush3.bf16.msra.mxu0 %v3859_v7  ;;  %v3882_v7 = vld [vmem:[%s4719_s18 + $0x130] sm:$0xff]  }
0x15c8   : > { %3568 = vmatprep.subr.bf16.mxu1 %v3860_v8  ;;  %3590 = vmatprep.subr.bf16.mxu0 %v3861_v10  ;;  %v3883_v8 = vld [vmem:[%s4719_s18 + $0x1b0] sm:$0xff]  }
0x15cb   : > { %3569 = vmatpush3.bf16.msra.mxu1 %v3862_v11  ;;  %3591 = vmatpush3.bf16.msra.mxu0 %v3863_v12  ;;  %v3884_v12 = vld [vmem:[%s4719_s18 + $0x168] sm:$0xff]  }
0x15cc   : > { %3570 = vmatprep.subr.bf16.mxu1 %v3864_v13  ;;  %3592 = vmatprep.subr.bf16.mxu0 %v3865_v14  ;;  %v3885_v13 = vld [vmem:[%s4719_s18 + $0x1e8] sm:$0xff]  }
0x15cf   : > { %3571 = vmatpush3.bf16.msra.mxu1 %v3866_v47  ;;  %3593 = vmatpush3.bf16.msra.mxu0 %v3867_v15 }
0x15d0   : > { %3572 = vmatprep.subr.bf16.mxu1 %v3868_v16  ;;  %3594 = vmatprep.subr.bf16.mxu0 %v3869_v17 }
0x15d3   : > { %3573 = vmatpush3.bf16.msra.mxu1 %v3870_v20  ;;  %3595 = vmatpush3.bf16.msra.mxu0 %v3871_v62  ;;  %v3886_v62 = vld [vmem:[%s4719_s18 + $0x128] sm:$0xff]  }
0x15d4   : > { %3574 = vmatprep.subr.bf16.mxu1 %v3872_v21  ;;  %3596 = vmatprep.subr.bf16.mxu0 %v3873_v22  ;;  %v3887_v21 = vld [vmem:[%s4719_s18 + $0x1a8] sm:$0xff]   ;;  %v3888_v22 = vld [vmem:[%s4719_s18 + $0x160] sm:$0xff]  }
0x15d7   : > { %3575 = vmatpush3.bf16.msra.mxu1 %v3874_v23  ;;  %3597 = vmatpush3.bf16.msra.mxu0 %v3875_v24  ;;  %v3889_v23 = vld [vmem:[%s4719_s18 + $0x1e0] sm:$0xff]  }
0x15d8   : > { %3604 = vmatprep.subr.bf16.mxu1 %v3876_v25  ;;  %3626 = vmatprep.subr.bf16.mxu0 %v3877_v26  ;;  %v3890_v24 = vld [vmem:[%s4719_s18 + $0x120] sm:$0xff]   ;;  %v3892_v26 = vld [vmem:[%s4719_s18 + $0x158] sm:$0xff]  }
0x15d9   : > { %v3891_v25 = vld [vmem:[%s4719_s18 + $0x1a0] sm:$0xff]  }
0x1672   : > { %v2443_v35 = vpop.f32.mrf.mxu1  ;;  %v2484_v36 = vpop.f32.mrf.mxu0 }
0x1673   : > { %v2444_v37 = vadd.f32 %v2443_v35, %v2289_v32  ;;  %v2485_v38 = vadd.f32 %v2484_v36, %v2297_v33  ;;  %v2312_v32 = vsub.s32 6, %v4140_v18  ;;  %v3896_v33 = vld [vmem:[%s4719_s18 + $0x150] sm:$0xff]   ;;  %v2305_v35 = vrot.slane %v4569_v29, %v2304_v31 }
0x1674   : > { %v2445_v39 = vpop.f32.mrf.mxu1  ;;  %v2486_v40 = vpop.f32.mrf.mxu0  ;;  %v3899_v18 = vld [vmem:[%s4719_s18 + $0x190] sm:$0xff]  }
0x1675   : > { %v2446_v41 = vadd.f32 %v2445_v39, %v2293_v34  ;;  %v2487_v42 = vadd.f32 %v2486_v40, %v2301_v3  ;;  %v2573_v44 = vmax.f32 %v2444_v37, 0.0  ;;  %v2575_v45 = vmax.f32 %v2485_v38, 0.0  ;;  %v3897_v34 = vld [vmem:[%s4719_s18 + $0x1d0] sm:$0xff]   ;;  %v3900_v37 = vld [vmem:[%s4719_s18 + $0x148] sm:$0xff]  }
0x1676   : > { %v2447_v46 = vpop.f32.mrf.mxu1  ;;  %v2488_v53 = vpop.f32.mrf.mxu0  ;;  %v3898_v3 = vld [vmem:[%s4719_s18 + $0x110] sm:$0xff]   ;;  %v2313_v36 = vrot.slane %v4569_v29, %v2312_v32  ;;  %v3901_v38 = vld [vmem:[%s4719_s18 + $0x1c8] sm:$0xff]  }
0x1677   : > { %v2574_v49 = vmax.f32 %v2446_v41, 0.0  ;;  %v2576_v50 = vmax.f32 %v2487_v42, 0.0  ;;  %v2581_v60 = vpack.c.bf16 %v2573_v44, %v2573_v44  ;;  %v2583_v61 = vpack.c.bf16 %v2575_v45, %v2575_v45  ;;  %v3902_v39 = vld [vmem:[%s4719_s18 + $0x108] sm:$0xff]   ;;  %v3904_v42 = vld [vmem:[%s4719_s18 + $0x140] sm:$0xff]  }
0x1678   : > { %v2448_v51 = vpop.f32.mrf.mxu1  ;;  %v2489_v52 = vpop.f32.mrf.mxu0  ;;  %v3903_v29 = vld [vmem:[%s4719_s18 + $0x188] sm:$0xff]   ;;  %v3907_v44 = vld [vmem:[%s4719_s18 + $0x180] sm:$0xff]  }
0x1679   : > { %v2582_v54 = vpack.c.bf16 %v2574_v49, %v2574_v49  ;;  %v2584_v55 = vpack.c.bf16 %v2576_v50, %v2576_v50 }
0x167a   : > { %v4587_v19 = vpop.f32.mrf.mxu1  ;;  %v4589_v63 = vpop.f32.mrf.mxu0 }
0x167b   : > { %3140 = vmatprep.mubr.bf16.mxu1 %v2582_v54  ;;  %3180 = vmatprep.mubr.bf16.mxu0 %v2584_v55  ;;  %v2526_v40 = vadd.f32 %v4587_v19, %v2305_v35  ;;  %v2567_v41 = vadd.f32 %v4589_v63, %v2313_v36 }
0x167c   : > { %v2527_v4 = vpop.f32.mrf.mxu1  ;;  %v2568_v9 = vpop.f32.mrf.mxu0  ;;  %3141 = vmatmul.mubr.bf16.vlgmr.msra.gmra.mxu1 %v2581_v60  ;;  %3181 = vmatmul.mubr.bf16.vlgmr.msra.gmra.mxu0 %v2583_v61  ;;  %v3434_v60 = vld [vmem:[%s4720_s19] ss:$0 sm:$0xff] }
0x167d   : > { %v2528_v5 = vadd.f32 %v2527_v4, %v2309_v56  ;;  %v2569_v6 = vadd.f32 %v2568_v9, %v2317_v57  ;;  %3605 = vmatpush3.bf16.msra.mxu1 %v3878_v58  ;;  %3627 = vmatpush3.bf16.msra.mxu0 %v3879_v59  ;;  %v2577_v45 = vmax.f32 %v2526_v40, 0.0  ;;  %v2579_v46 = vmax.f32 %v2567_v41, 0.0 }
0x167e   : > { %v2529_v10 = vpop.f32.mrf.mxu1  ;;  %v2570_v11 = vpop.f32.mrf.mxu0  ;;  %3606 = vmatprep.subr.bf16.mxu1 %v3880_v0  ;;  %3628 = vmatprep.subr.bf16.mxu0 %v3881_v2 }
0x167f   : > { %v2578_v14 = vmax.f32 %v2528_v5, 0.0  ;;  %v2580_v47 = vmax.f32 %v2569_v6, 0.0  ;;  %v2585_v53 = vpack.c.bf16 %v2577_v45, %v2577_v45  ;;  %v2587_v49 = vpack.c.bf16 %v2579_v46, %v2579_v46 }
0x1680   : > { %v2530_v15 = vpop.f32.mrf.mxu1  ;;  %v2571_v16 = vpop.f32.mrf.mxu0 }
0x1681   : > { %v2586_v17 = vpack.c.bf16 %v2578_v14, %v2578_v14  ;;  %v2588_v20 = vpack.c.bf16 %v2580_v47, %v2580_v47  ;;  %3607 = vmatpush3.bf16.msra.mxu1 %v3882_v7  ;;  %3629 = vmatpush3.bf16.msra.mxu0 %v3883_v8 }
0x1682   : > { %3608 = vmatprep.subr.bf16.mxu1 %v3884_v12  ;;  %3630 = vmatprep.subr.bf16.mxu0 %v3885_v13 }
0x1683   : > { %3220 = vmatprep.mubr.bf16.mxu1 %v2586_v17  ;;  %3260 = vmatprep.mubr.bf16.mxu0 %v2588_v20 }
0x1685   : > { %3609 = vmatpush3.bf16.msra.mxu1 %v3886_v62  ;;  %3631 = vmatpush3.bf16.msra.mxu0 %v3887_v21 }
0x1686   : > { %3610 = vmatprep.subr.bf16.mxu1 %v3888_v22  ;;  %3632 = vmatprep.subr.bf16.mxu0 %v3889_v23 }
0x1689   : > { %3611 = vmatpush3.bf16.msra.mxu1 %v3890_v24  ;;  %3633 = vmatpush3.bf16.msra.mxu0 %v3891_v25 }
0x168a   : > { %3612 = vmatprep.subr.bf16.mxu1 %v3892_v26  ;;  %3634 = vmatprep.subr.bf16.mxu0 %v3893_v27  ;;  %v3500_v26 = vld [vmem:[%s4722_s21] ss:$0 sm:$0xff] }
0x168d   : > { %3613 = vmatpush3.bf16.msra.mxu1 %v3894_v28  ;;  %3635 = vmatpush3.bf16.msra.mxu0 %v3895_v30 }
0x168e   : > { %3614 = vmatprep.subr.bf16.mxu1 %v3896_v33  ;;  %3636 = vmatprep.subr.bf16.mxu0 %v3897_v34 }
0x1691   : > { %3615 = vmatpush3.bf16.msra.mxu1 %v3898_v3  ;;  %3637 = vmatpush3.bf16.msra.mxu0 %v3899_v18 }
0x1692   : > { %3616 = vmatprep.subr.bf16.mxu1 %v3900_v37  ;;  %3638 = vmatprep.subr.bf16.mxu0 %v3901_v38 }
0x1695   : > { %3617 = vmatpush3.bf16.msra.mxu1 %v3902_v39  ;;  %3639 = vmatpush3.bf16.msra.mxu0 %v3903_v29 }
0x1696   : > { %3618 = vmatprep.subr.bf16.mxu1 %v3904_v42  ;;  %3640 = vmatprep.subr.bf16.mxu0 %v3905_v1 }
0x1699   : > { %3619 = vmatpush3.bf16.msra.mxu1 %v3906_v43  ;;  %3641 = vmatpush3.bf16.msra.mxu0 %v3907_v44 }
0x169c   : > { %3221 = vmatmul.mubr.bf16.vlgmr.msra.gmra.mxu1 %v2585_v53  ;;  %3261 = vmatmul.mubr.bf16.vlgmr.msra.gmra.mxu0 %v2587_v49 }
0x173c   : > { %v3576_v50 = vpop.f32.mrf.mxu1  ;;  %v3598_v51 = vpop.f32.mrf.mxu0 }
0x173e   : > { %v3577_v52 = vpop.f32.mrf.mxu1  ;;  %v3599_v54 = vpop.f32.mrf.mxu0 }
0x173f   : > { %v3578_v59 = vadd.f32 %v3577_v52, %v3576_v50  ;;  %v3600_v0 = vadd.f32 %v3599_v54, %v3598_v51 }
0x1740   : > { %v3579_v55 = vpop.f32.mrf.mxu1  ;;  %v3601_v56 = vpop.f32.mrf.mxu0 }
0x1741   : > { %v3143_v61 = vadd.f32 %v3578_v59, %v3434_v60 }
0x1742   : > { %v3580_v57 = vpop.f32.mrf.mxu1  ;;  %v3602_v58 = vpop.f32.mrf.mxu0 }
0x1743   : > { %v3183_v9 = vadd.f32 %v3600_v0, %v3143_v61 }
0x175c   : > { %v3620_v19 = vpop.f32.mrf.mxu1  ;;  %v3642_v63 = vpop.f32.mrf.mxu0 }
0x175e   : > { %v3621_v2 = vpop.f32.mrf.mxu1  ;;  %v3643_v4 = vpop.f32.mrf.mxu0 }
0x175f   : > { %v3622_v5 = vadd.f32 %v3621_v2, %v3620_v19  ;;  %v3644_v10 = vadd.f32 %v3643_v4, %v3642_v63 }
0x1760   : > { %v3623_v6 = vpop.f32.mrf.mxu1  ;;  %v3645_v7 = vpop.f32.mrf.mxu0 }
0x1761   : > { %v3223_v8 = vadd.f32 %v3622_v5, %v3183_v9 }
0x1762   : > { %v3624_v11 = vpop.f32.mrf.mxu1  ;;  %v3646_v12 = vpop.f32.mrf.mxu0 }
0x1763   : > { %v3263_v13 = vadd.f32 %v3644_v10, %v3223_v8 }
0x1765   : > { %v3270_v14 = vadd.f32 %v3263_v13, %v4454_v48  ;;  %v3499_v48 = vld [vmem:[%s4721_s20] ss:$0 sm:$0xff] }
0x1767   : > { %v3271_v47 = vsel %vm723_vm1, %v3270_v14, 0.0 }
0x1768   : > { %3272 = vadd.xlane.f32.xlu1 %v3271_v47 }
0x17f1   : > { %v3273_v15 = vpop.xlane.xlu1 %3272 }
0x17f2   : > { %v3274_v16 = vmul.f32 0.03125, %v3273_v15 }
0x17f4   : > { %v3275_v17 = vsub.f32 %v3270_v14, %v3274_v16 }
0x17f6   : > { %v3276_v20 = vmul.f32 %v3275_v17, %v3275_v17 }
0x17f8   : > { %v3277_v62 = vsel %vm723_vm1, %v3276_v20, 0.0 }
0x17f9   : > { %3278 = vadd.xlane.f32.xlu1 %v3277_v62 }
0x1882   : > { %v3279_v21 = vpop.xlane.xlu1 %3278 }
0x1883   : > { %v3280_v22 = vmul.f32 0.03125, %v3279_v21 }
0x1885   : > { %v3281_v23 = vadd.f32 1e-05, %v3280_v22 }
0x1887   : > { %3944 = vrsqrt.f32 %v3281_v23 }
0x1894   : > { %v3945_v24 = vpop.eup %3944 }
0x1895   : > { %v3283_v25 = vmul.f32 %v3945_v24, %v3275_v17 }
0x1897   : > { %v3290_v27 = vmul.f32 %v3499_v48, %v3283_v25 }
0x1899   : > { %v3297_v28 = vadd.f32 %v3500_v26, %v3290_v27 }
0x189b   : > { %3298 = vst.msk [vmem:[%s695_s30] sm:$0xff] %vm723_vm1, %v3297_v28 }
0x189c PF: > { %s32_s3 = sadd.s32 1, %s3952_s3  }
0x189d   : > { %p29_p4 = scmp.ge.s32.totalorder %s32_s3, 4  }
0x189f   :  { %31 = sbr.rel (!%p29_p4) target bundleno = 8 (0x8), region = 141 }

</bundles_post_ra>
